<compile_context>
chip_gen: v7x
topology: tpu7x:2x2x1
jax: 0.10.0
libtpu: 0.0.40
codegen_flags: <defaults>
</compile_context>

<pallas_src>
import functools
import math

import jax
import jax.numpy as jnp
from jax.experimental import pallas as pl
from jax.experimental.pallas import tpu as pltpu


# ---------------------------------------------------------------------------
# Kernel 1: multi-head graph attention + O projection + residual (+ BN1 partial stats)
# ---------------------------------------------------------------------------
def _attn_kernel(h_dst_ref, h_src_ref, adjt_ref, wq_ref, wkv_ref, wo_ref, bo_ref,
                 h1_ref, stats_ref,
                 q_scr, k_scr, v_scr, wv_scr, z_scr,
                 *, num_heads, head_dim, inv_scale):
    j = pl.program_id(1)
    n_src_steps = pl.num_programs(1)
    dh = head_dim
    dout = num_heads * head_dim

    # ---- init once per dst tile: zero accumulators, project Q for the dst rows ----
    @pl.when(j == 0)
    def _():
        wv_scr[...] = jnp.zeros_like(wv_scr)
        z_scr[...] = jnp.zeros_like(z_scr)
        hd_bf = h_dst_ref[...].astype(jnp.bfloat16)
        q = jnp.dot(hd_bf, wq_ref[...], preferred_element_type=jnp.float32)   # [TD, Dout]
        for hh in range(num_heads):                                           # layout only
            q_scr[hh] = q[:, hh * dh:(hh + 1) * dh].astype(jnp.bfloat16)

    # ---- K/V projection for this src tile (fused [Wk | Wv] weight, one MXU pass) ----
    hs_bf = h_src_ref[...].astype(jnp.bfloat16)
    kv = jnp.dot(hs_bf, wkv_ref[...], preferred_element_type=jnp.float32)     # [TS, 2*Dout]
    for hh in range(num_heads):                                               # layout only
        k_scr[hh] = kv[:, hh * dh:(hh + 1) * dh].astype(jnp.bfloat16)
        v_scr[hh] = kv[:, dout + hh * dh: dout + (hh + 1) * dh].astype(jnp.bfloat16)

    # ---- masked edge scores, batched over heads (leading batch dim) ----
    s = jnp.einsum('hvd,hud->hvu', q_scr[...], k_scr[...],
                   preferred_element_type=jnp.float32)                        # [H, TD, TS]
    e = jnp.exp(jnp.clip(s * inv_scale, -5.0, 5.0))
    mask = adjt_ref[...] != 0                                                 # [TD, TS]
    e = jnp.where(mask[None, :, :], e, 0.0)

    # ---- accumulate z (XLU lane-reduce, overlaps MXU) and wV (MXU contraction) ----
    z_scr[...] += jnp.sum(e, axis=-1, keepdims=True)                          # [H, TD, 1]
    wv_scr[...] += jnp.einsum('hvu,hud->hvd', e.astype(jnp.bfloat16), v_scr[...],
                              preferred_element_type=jnp.float32)             # [H, TD, dh]

    # ---- finalize: head_out, O projection (folded per head), residual, BN1 partials ----
    @pl.when(j == n_src_steps - 1)
    def _():
        z = z_scr[...]
        # Zero-in-degree guard (the original module would produce NaN here).
        inv_z = jnp.where(z > 0.0, pl.reciprocal(z, approx=True), 0.0)
        head_out = (wv_scr[...] * inv_z).astype(jnp.bfloat16)                 # [H, TD, dh]
        # O(concat_h head_out) == sum_h head_out_h @ Wo[h*dh:(h+1)*dh, :]
        per_head = jnp.einsum('hvd,hde->hve', head_out, wo_ref[...],
                              preferred_element_type=jnp.float32)             # [H, TD, Dout]
        o = jnp.sum(per_head, axis=0) + bo_ref[...]
        h1 = h_dst_ref[...] + o                                               # residual
        h1_ref[...] = h1
        s1 = jnp.sum(h1, axis=0, keepdims=True)
        s2 = jnp.sum(h1 * h1, axis=0, keepdims=True)
        stats_ref[...] = jnp.concatenate([s1, s2], axis=0)[None]              # [1, 2, Dout]


def _bn_scale_shift(stats, n_nodes, gamma, beta, eps):
    """Global BatchNorm scale/shift from per-tile (sum, sum-of-squares) partials."""
    ssum = jnp.sum(stats, axis=0)                       # [2, D]
    mean = ssum[0:1, :] * (1.0 / n_nodes)               # [1, D]
    msq = ssum[1:2, :] * (1.0 / n_nodes)
    var = jnp.maximum(msq - mean * mean, 0.0)           # biased (training-mode) variance
    scale = gamma * jax.lax.rsqrt(var + eps)
    shift = beta - mean * scale
    return scale, shift


# ---------------------------------------------------------------------------
# Kernel 2: BN1 + FFN + residual (+ BN2 partial stats)
# ---------------------------------------------------------------------------
def _bn_ffn_kernel(h1_ref, stats1_ref, bn1w_ref, bn1b_ref,
                   w1_ref, fb1_ref, w2_ref, fb2_ref,
                   h2_ref, stats2_ref, *, n_nodes, eps):
    scale1, shift1 = _bn_scale_shift(stats1_ref[...], n_nodes, bn1w_ref[...], bn1b_ref[...], eps)
    x = h1_ref[...] * scale1 + shift1                                         # BN1, f32
    f = jnp.dot(x.astype(jnp.bfloat16), w1_ref[...],
                preferred_element_type=jnp.float32) + fb1_ref[...]
    f = jnp.maximum(f, 0.0)
    f = jnp.dot(f.astype(jnp.bfloat16), w2_ref[...],
                preferred_element_type=jnp.float32) + fb2_ref[...]
    h2 = x + f                                                                # residual (h_in2)
    h2_ref[...] = h2
    s1 = jnp.sum(h2, axis=0, keepdims=True)
    s2 = jnp.sum(h2 * h2, axis=0, keepdims=True)
    stats2_ref[...] = jnp.concatenate([s1, s2], axis=0)[None]


# ---------------------------------------------------------------------------
# Kernel 3: BN2
# ---------------------------------------------------------------------------
def _bn2_kernel(h2_ref, stats2_ref, bn2w_ref, bn2b_ref, out_ref, *, n_nodes, eps):
    scale2, shift2 = _bn_scale_shift(stats2_ref[...], n_nodes, bn2w_ref[...], bn2b_ref[...], eps)
    out_ref[...] = h2_ref[...] * scale2 + shift2


def _pick_tile(n, preferred, granule):
    """Largest t <= preferred with t % granule == 0 and n % t == 0; else the full n."""
    if n <= preferred or n % granule != 0:
        return n
    t = (preferred // granule) * granule
    while t >= granule:
        if n % t == 0:
            return t
        t -= granule
    return n


def graph_transformer_layer(h, adj, params, *, num_heads,
                            tile_dst=None, tile_src=None, tile_nodes=None, eps=1e-5):
    n, d = h.shape
    assert d % num_heads == 0
    dh = d // num_heads
    dout = d                                   # residual requires in_dim == out_dim

    # Tile constraints:
    #   adj^T tile is (tile_dst, tile_src):  tile_src must be a multiple of 128 (lane axis)
    #   or the full n; tile_dst a multiple of 32 (int8 sublanes) or the full n.
    tile_dst = tile_dst or _pick_tile(n, 128, 32)
    tile_src = tile_src or _pick_tile(n, 512, 128)
    tile_nodes = tile_nodes or _pick_tile(n, 256, 8)
    assert n % tile_dst == 0 and (tile_dst == n or tile_dst % 32 == 0)
    assert n % tile_src == 0 and (tile_src == n or tile_src % 128 == 0)
    assert n % tile_nodes == 0 and (tile_nodes == n or tile_nodes % 8 == 0)
    n_dst, n_src, n_tiles = n // tile_dst, n // tile_src, n // tile_nodes

    f32, bf16 = jnp.float32, jnp.bfloat16
    h = h.astype(f32)
    adj_t = jnp.transpose(adj).astype(jnp.int8)          # adj_t[v, u] = adj[u, v], 4x less HBM
    wq = params["wq"].astype(bf16)
    wkv = jnp.concatenate([params["wk"], params["wv"]], axis=1).astype(bf16)   # fused K|V
    wo_h = params["wo"].reshape(num_heads, dh, dout).astype(bf16)              # per-head Wo
    bo = params["bo"].astype(f32)
    w1 = params["w1"].astype(bf16)
    b1 = params["b1"].astype(f32)
    w2 = params["w2"].astype(bf16)
    b2 = params["b2"].astype(f32)
    bn1w, bn1b = params["bn1_w"].astype(f32), params["bn1_b"].astype(f32)
    bn2w, bn2b = params["bn2_w"].astype(f32), params["bn2_b"].astype(f32)

    # ---- kernel 1: attention + O + residual, per-dst-tile BN1 partial stats ----
    k1 = functools.partial(_attn_kernel, num_heads=num_heads, head_dim=dh,
                           inv_scale=1.0 / math.sqrt(dh))
    h1_pre, stats1 = pl.pallas_call(
        k1,
        out_shape=(jax.ShapeDtypeStruct((n, dout), f32),
                   jax.ShapeDtypeStruct((n_dst, 2, dout), f32)),
        grid_spec=pltpu.PrefetchScalarGridSpec(
            num_scalar_prefetch=0,
            grid=(n_dst, n_src),
            in_specs=[
                pl.BlockSpec((tile_dst, d), lambda i, j: (i, 0)),          # h (dst rows)
                pl.BlockSpec((tile_src, d), lambda i, j: (j, 0)),          # h (src rows)
                pl.BlockSpec((tile_dst, tile_src), lambda i, j: (i, j)),   # adj^T tile (int8)
                pl.BlockSpec((d, dout), lambda i, j: (0, 0)),              # Wq
                pl.BlockSpec((d, 2 * dout), lambda i, j: (0, 0)),          # [Wk | Wv]
                pl.BlockSpec((num_heads, dh, dout), lambda i, j: (0, 0, 0)),  # Wo per head
                pl.BlockSpec((1, dout), lambda i, j: (0, 0)),              # bo
            ],
            out_specs=[
                pl.BlockSpec((tile_dst, dout), lambda i, j: (i, 0)),
                pl.BlockSpec((1, 2, dout), lambda i, j: (i, 0, 0)),
            ],
            scratch_shapes=[
                pltpu.VMEM((num_heads, tile_dst, dh), bf16),       # Q  (per-head layout)
                pltpu.VMEM((num_heads, tile_src, dh), bf16),       # K
                pltpu.VMEM((num_heads, tile_src, dh), bf16),       # V
                pltpu.VMEM((num_heads, tile_dst, dh), f32),        # wV accumulator
                pltpu.VMEM((num_heads, tile_dst, 1), f32),         # z accumulator
            ]),
        compiler_params=pltpu.CompilerParams(
            dimension_semantics=("parallel", "arbitrary"),
            vmem_limit_bytes=48 * 1024 * 1024),
    )(h, h, adj_t, wq, wkv, wo_h, bo)

    # ---- kernel 2: BN1 + FFN + residual, per-tile BN2 partial stats ----
    k2 = functools.partial(_bn_ffn_kernel, n_nodes=n, eps=eps)
    h2_pre, stats2 = pl.pallas_call(
        k2,
        out_shape=(jax.ShapeDtypeStruct((n, dout), f32),
                   jax.ShapeDtypeStruct((n_tiles, 2, dout), f32)),
        grid_spec=pltpu.PrefetchScalarGridSpec(
            num_scalar_prefetch=0,
            grid=(n_tiles,),
            in_specs=[
                pl.BlockSpec((tile_nodes, dout), lambda i: (i, 0)),
                pl.BlockSpec((n_dst, 2, dout), lambda i: (0, 0, 0)),
                pl.BlockSpec((1, dout), lambda i: (0, 0)),
                pl.BlockSpec((1, dout), lambda i: (0, 0)),
                pl.BlockSpec((dout, 2 * dout), lambda i: (0, 0)),
                pl.BlockSpec((1, 2 * dout), lambda i: (0, 0)),
                pl.BlockSpec((2 * dout, dout), lambda i: (0, 0)),
                pl.BlockSpec((1, dout), lambda i: (0, 0)),
            ],
            out_specs=[
                pl.BlockSpec((tile_nodes, dout), lambda i: (i, 0)),
                pl.BlockSpec((1, 2, dout), lambda i: (i, 0, 0)),
            ]),
        compiler_params=pltpu.CompilerParams(dimension_semantics=("parallel",)),
    )(h1_pre, stats1, bn1w, bn1b, w1, b1, w2, b2)

    # ---- kernel 3: BN2 ----
    k3 = functools.partial(_bn2_kernel, n_nodes=n, eps=eps)
    out = pl.pallas_call(
        k3,
        out_shape=jax.ShapeDtypeStruct((n, dout), f32),
        grid_spec=pltpu.PrefetchScalarGridSpec(
            num_scalar_prefetch=0,
            grid=(n_tiles,),
            in_specs=[
                pl.BlockSpec((tile_nodes, dout), lambda i: (i, 0)),
                pl.BlockSpec((n_tiles, 2, dout), lambda i: (0, 0, 0)),
                pl.BlockSpec((1, dout), lambda i: (0, 0)),
                pl.BlockSpec((1, dout), lambda i: (0, 0)),
            ],
            out_specs=pl.BlockSpec((tile_nodes, dout), lambda i: (i, 0))),
        compiler_params=pltpu.CompilerParams(dimension_semantics=("parallel",)),
    )(h2_pre, stats2, bn2w, bn2b)

    return out


def init_params(key, in_dim, out_dim):
    ks = jax.random.split(key, 8)
    scale = 0.1
    # Linear weights stored pre-transposed as [in, out] so the kernels do x @ W.
    return {
        "wq": scale * jax.random.normal(ks[0], (in_dim, out_dim), jnp.float32),
        "wk": scale * jax.random.normal(ks[1], (in_dim, out_dim), jnp.float32),
        "wv": scale * jax.random.normal(ks[2], (in_dim, out_dim), jnp.float32),
        "wo": scale * jax.random.normal(ks[3], (out_dim, out_dim), jnp.float32),
        "bo": scale * jax.random.normal(ks[4], (1, out_dim), jnp.float32),
        "w1": scale * jax.random.normal(ks[5], (out_dim, 2 * out_dim), jnp.float32),
        "b1": scale * jax.random.normal(ks[6], (1, 2 * out_dim), jnp.float32),
        "w2": scale * jax.random.normal(ks[7], (2 * out_dim, out_dim), jnp.float32),
        "b2": jnp.zeros((1, out_dim), jnp.float32),
        # BatchNorm affine params (PyTorch default init: weight=1, bias=0)
        "bn1_w": jnp.ones((1, out_dim), jnp.float32),
        "bn1_b": jnp.zeros((1, out_dim), jnp.float32),
        "bn2_w": jnp.ones((1, out_dim), jnp.float32),
        "bn2_b": jnp.zeros((1, out_dim), jnp.float32),
    }
    # TODO(synk): BatchNorm running_mean/running_var buffers are not maintained
    # (training-mode batch statistics only, matching the module's training forward).


def _reference(h, adj, params, num_heads, eps=1e-5):
    """Pure-JAX f32 reference of the same forward pass (for validation only)."""
    n, d = h.shape
    dh = d // num_heads
    qh = (h @ params["wq"]).reshape(n, num_heads, dh)
    kh = (h @ params["wk"]).reshape(n, num_heads, dh)
    vh = (h @ params["wv"]).reshape(n, num_heads, dh)
    s = jnp.einsum('vhd,uhd->hvu', qh, kh) / math.sqrt(dh)
    e = jnp.exp(jnp.clip(s, -5.0, 5.0)) * jnp.transpose(adj)[None, :, :]
    wv = jnp.einsum('hvu,uhd->vhd', e, vh)
    z = jnp.transpose(jnp.sum(e, axis=-1))[:, :, None]          # [v, h, 1]
    head_out = wv / z
    o = head_out.reshape(n, d) @ params["wo"] + params["bo"]
    h1 = h + o

    def bn(x, gamma, beta):
        mean = jnp.mean(x, axis=0, keepdims=True)
        var = jnp.mean((x - mean) ** 2, axis=0, keepdims=True)
        return (x - mean) * jax.lax.rsqrt(var + eps) * gamma + beta

    h1 = bn(h1, params["bn1_w"], params["bn1_b"])
    f = jnp.maximum(h1 @ params["w1"] + params["b1"], 0.0)
    f = f @ params["w2"] + params["b2"]
    h2 = h1 + f
    return bn(h2, params["bn2_w"], params["bn2_b"])


if __name__ == "__main__":
    N = 256        # number of graph nodes (256 so both grid axes / flash accumulation run)
    D = 32         # in_dim == out_dim (required by the residual connection)
    NUM_HEADS = 4

    key = jax.random.PRNGKey(0)
    k_h, k_adj, k_p = jax.random.split(key, 3)

    h = jax.random.normal(k_h, (N, D), jnp.float32)

    # Random directed graph as dense adjacency (adj[u, v] = 1 iff edge u -> v),
    # with self-loops so every node has at least one incoming edge (z > 0).
    adj = (jax.random.uniform(k_adj, (N, N)) < 0.05).astype(jnp.float32)
    adj = jnp.maximum(adj, jnp.eye(N, dtype=jnp.float32))

    params = init_params(k_p, D, D)

    out = graph_transformer_layer(
        h, adj, params, num_heads=NUM_HEADS,
        tile_dst=128, tile_src=128, tile_nodes=128)
    out = jax.block_until_ready(out)

    assert out.shape == (N, D)
    assert bool(jnp.all(jnp.isfinite(out)))

    # Loose tolerance: kernel uses bf16 MXU operands with f32 accumulation;
    # outputs are BatchNorm-normalized (unit scale), so absolute error is meaningful.
    ref = _reference(h, adj, params, NUM_HEADS)
    max_err = float(jnp.max(jnp.abs(out - ref)))
    assert max_err < 0.15, f"max abs error vs reference too large: {max_err}"

    print("KERNEL_OK")
</pallas_src>

<mosaic_0001>
module attributes {stable_mosaic.version = 11 : i64} {
  func.func @_attn_kernel(%arg0: i32, %arg1: i32, %arg2: memref<128x32xf32, #tpu.memory_space<vmem>>, %arg3: memref<128x32xf32, #tpu.memory_space<vmem>>, %arg4: memref<128x128xi8, #tpu.memory_space<vmem>>, %arg5: memref<32x32xbf16, #tpu.memory_space<vmem>>, %arg6: memref<32x64xbf16, #tpu.memory_space<vmem>>, %arg7: memref<4x8x32xbf16, #tpu.memory_space<vmem>>, %arg8: memref<1x32xf32, #tpu.memory_space<vmem>>, %arg9: memref<128x32xf32, #tpu.memory_space<vmem>>, %arg10: memref<1x2x32xf32, #tpu.memory_space<vmem>>, %arg11: memref<4x128x8xbf16, #tpu.memory_space<vmem>>, %arg12: memref<4x128x8xbf16, #tpu.memory_space<vmem>>, %arg13: memref<4x128x8xbf16, #tpu.memory_space<vmem>>, %arg14: memref<4x128x8xf32, #tpu.memory_space<vmem>>, %arg15: memref<4x128x1xf32, #tpu.memory_space<vmem>>) attributes {dimension_semantics = [#tpu.dimension_semantics<parallel>, #tpu.dimension_semantics<arbitrary>], iteration_bounds = array<i64: 2, 2>, scalar_prefetch = 0 : i64, scratch_operands = 5 : i64, tpu.core_type = #tpu.core_type<tc>, window_params = [{transform_indices = @transform_0, window_bounds = array<i64: 128, 32>}, {transform_indices = @transform_1, window_bounds = array<i64: 128, 32>}, {transform_indices = @transform_2, window_bounds = array<i64: 128, 128>}, {pipeline_mode = #tpu.pipeline_mode<synchronous>, transform_indices = @transform_3, window_bounds = array<i64: 32, 32>}, {pipeline_mode = #tpu.pipeline_mode<synchronous>, transform_indices = @transform_4, window_bounds = array<i64: 32, 64>}, {pipeline_mode = #tpu.pipeline_mode<synchronous>, transform_indices = @transform_5, window_bounds = array<i64: 4, 8, 32>}, {pipeline_mode = #tpu.pipeline_mode<synchronous>, transform_indices = @transform_6, window_bounds = array<i64: 1, 32>}, {transform_indices = @transform_7, window_bounds = array<i64: 128, 32>}, {transform_indices = @transform_8, window_bounds = array<i64: 1, 2, 32>}]} {
    %c0_i32 = arith.constant 0 : i32
    %0 = arith.cmpi eq, %arg1, %c0_i32 : i32
    %1 = arith.extui %0 : i1 to i32
    %c0_i32_0 = arith.constant 0 : i32
    %2 = arith.cmpi ne, %1, %c0_i32_0 : i32
    scf.if %2 {
      %cst_56 = arith.constant 0.000000e+00 : f32
      %79 = vector.broadcast %cst_56 : f32 to vector<4x128x8xf32>
      %c0_57 = arith.constant 0 : index
      %c0_58 = arith.constant 0 : index
      %c0_59 = arith.constant 0 : index
      %80 = vector.load %arg14[%c0_57, %c0_58, %c0_59] : memref<4x128x8xf32, #tpu.memory_space<vmem>>, vector<4x128x8xf32>
      tpu.vector_store %arg14[%c0_57, %c0_58, %c0_59], %79 {strides = array<i32>} : memref<4x128x8xf32, #tpu.memory_space<vmem>>, vector<4x128x8xf32>,
      %cst_60 = arith.constant 0.000000e+00 : f32
      %81 = vector.broadcast %cst_60 : f32 to vector<4x128x1xf32>
      %c0_61 = arith.constant 0 : index
      %c0_62 = arith.constant 0 : index
      %c0_63 = arith.constant 0 : index
      %82 = vector.load %arg15[%c0_61, %c0_62, %c0_63] : memref<4x128x1xf32, #tpu.memory_space<vmem>>, vector<4x128x1xf32>
      tpu.vector_store %arg15[%c0_61, %c0_62, %c0_63], %81 {strides = array<i32>} : memref<4x128x1xf32, #tpu.memory_space<vmem>>, vector<4x128x1xf32>,
      %c0_64 = arith.constant 0 : index
      %c0_65 = arith.constant 0 : index
      %83 = vector.load %arg2[%c0_64, %c0_65] : memref<128x32xf32, #tpu.memory_space<vmem>>, vector<128x32xf32>
      %84 = arith.truncf %83 : vector<128x32xf32> to vector<128x32xbf16>
      %c0_66 = arith.constant 0 : index
      %c0_67 = arith.constant 0 : index
      %85 = vector.load %arg5[%c0_66, %c0_67] : memref<32x32xbf16, #tpu.memory_space<vmem>>, vector<32x32xbf16>
      %cst_68 = arith.constant dense<0.000000e+00> : vector<128x32xf32>
      %86 = tpu.matmul %84, %85, %cst_68 {dimension_numbers = #tpu.dot_dimension_numbers<[1], [0], [0], [1], [0, 0, 1, 1], [], []>} : vector<128x32xbf16>, vector<32x32xbf16>, vector<128x32xf32> -> vector<128x32xf32>
      %87 = vector.extract_strided_slice %86 {offsets = [0, 0], sizes = [128, 8], strides = [1, 1]} : vector<128x32xf32> to vector<128x8xf32>
      %88 = arith.truncf %87 : vector<128x8xf32> to vector<128x8xbf16>
      %c0_69 = arith.constant 0 : index
      %c0_70 = arith.constant 0 : index
      %c0_71 = arith.constant 0 : index
      %89 = vector.load %arg11[%c0_69, %c0_70, %c0_71] : memref<4x128x8xbf16, #tpu.memory_space<vmem>>, vector<1x128x8xbf16>
      %90 = vector.shape_cast %89 : vector<1x128x8xbf16> to vector<128x8xbf16>
      %91 = vector.shape_cast %88 : vector<128x8xbf16> to vector<1x128x8xbf16>
      tpu.vector_store %arg11[%c0_69, %c0_70, %c0_71], %91 {strides = array<i32>} : memref<4x128x8xbf16, #tpu.memory_space<vmem>>, vector<1x128x8xbf16>,
      %92 = vector.extract_strided_slice %86 {offsets = [0, 8], sizes = [128, 8], strides = [1, 1]} : vector<128x32xf32> to vector<128x8xf32>
      %93 = arith.truncf %92 : vector<128x8xf32> to vector<128x8xbf16>
      %c1_72 = arith.constant 1 : index
      %c0_73 = arith.constant 0 : index
      %c0_74 = arith.constant 0 : index
      %94 = vector.load %arg11[%c1_72, %c0_73, %c0_74] : memref<4x128x8xbf16, #tpu.memory_space<vmem>>, vector<1x128x8xbf16>
      %95 = vector.shape_cast %94 : vector<1x128x8xbf16> to vector<128x8xbf16>
      %96 = vector.shape_cast %93 : vector<128x8xbf16> to vector<1x128x8xbf16>
      tpu.vector_store %arg11[%c1_72, %c0_73, %c0_74], %96 {strides = array<i32>} : memref<4x128x8xbf16, #tpu.memory_space<vmem>>, vector<1x128x8xbf16>,
      %97 = vector.extract_strided_slice %86 {offsets = [0, 16], sizes = [128, 8], strides = [1, 1]} : vector<128x32xf32> to vector<128x8xf32>
      %98 = arith.truncf %97 : vector<128x8xf32> to vector<128x8xbf16>
      %c2_75 = arith.constant 2 : index
      %c0_76 = arith.constant 0 : index
      %c0_77 = arith.constant 0 : index
      %99 = vector.load %arg11[%c2_75, %c0_76, %c0_77] : memref<4x128x8xbf16, #tpu.memory_space<vmem>>, vector<1x128x8xbf16>
      %100 = vector.shape_cast %99 : vector<1x128x8xbf16> to vector<128x8xbf16>
      %101 = vector.shape_cast %98 : vector<128x8xbf16> to vector<1x128x8xbf16>
      tpu.vector_store %arg11[%c2_75, %c0_76, %c0_77], %101 {strides = array<i32>} : memref<4x128x8xbf16, #tpu.memory_space<vmem>>, vector<1x128x8xbf16>,
      %102 = vector.extract_strided_slice %86 {offsets = [0, 24], sizes = [128, 8], strides = [1, 1]} : vector<128x32xf32> to vector<128x8xf32>
      %103 = arith.truncf %102 : vector<128x8xf32> to vector<128x8xbf16>
      %c3_78 = arith.constant 3 : index
      %c0_79 = arith.constant 0 : index
      %c0_80 = arith.constant 0 : index
      %104 = vector.load %arg11[%c3_78, %c0_79, %c0_80] : memref<4x128x8xbf16, #tpu.memory_space<vmem>>, vector<1x128x8xbf16>
      %105 = vector.shape_cast %104 : vector<1x128x8xbf16> to vector<128x8xbf16>
      %106 = vector.shape_cast %103 : vector<128x8xbf16> to vector<1x128x8xbf16>
      tpu.vector_store %arg11[%c3_78, %c0_79, %c0_80], %106 {strides = array<i32>} : memref<4x128x8xbf16, #tpu.memory_space<vmem>>, vector<1x128x8xbf16>,
    } else {
    }
    %c0 = arith.constant 0 : index
    %c0_1 = arith.constant 0 : index
    %3 = vector.load %arg3[%c0, %c0_1] : memref<128x32xf32, #tpu.memory_space<vmem>>, vector<128x32xf32>
    %4 = arith.truncf %3 : vector<128x32xf32> to vector<128x32xbf16>
    %c0_2 = arith.constant 0 : index
    %c0_3 = arith.constant 0 : index
    %5 = vector.load %arg6[%c0_2, %c0_3] : memref<32x64xbf16, #tpu.memory_space<vmem>>, vector<32x64xbf16>
    %cst = arith.constant dense<0.000000e+00> : vector<128x64xf32>
    %6 = tpu.matmul %4, %5, %cst {dimension_numbers = #tpu.dot_dimension_numbers<[1], [0], [0], [1], [0, 0, 1, 1], [], []>} : vector<128x32xbf16>, vector<32x64xbf16>, vector<128x64xf32> -> vector<128x64xf32>
    %7 = vector.extract_strided_slice %6 {offsets = [0, 0], sizes = [128, 8], strides = [1, 1]} : vector<128x64xf32> to vector<128x8xf32>
    %8 = arith.truncf %7 : vector<128x8xf32> to vector<128x8xbf16>
    %c0_4 = arith.constant 0 : index
    %c0_5 = arith.constant 0 : index
    %c0_6 = arith.constant 0 : index
    %9 = vector.load %arg12[%c0_4, %c0_5, %c0_6] : memref<4x128x8xbf16, #tpu.memory_space<vmem>>, vector<1x128x8xbf16>
    %10 = vector.shape_cast %9 : vector<1x128x8xbf16> to vector<128x8xbf16>
    %11 = vector.shape_cast %8 : vector<128x8xbf16> to vector<1x128x8xbf16>
    tpu.vector_store %arg12[%c0_4, %c0_5, %c0_6], %11 {strides = array<i32>} : memref<4x128x8xbf16, #tpu.memory_space<vmem>>, vector<1x128x8xbf16>,
    %12 = vector.extract_strided_slice %6 {offsets = [0, 32], sizes = [128, 8], strides = [1, 1]} : vector<128x64xf32> to vector<128x8xf32>
    %13 = arith.truncf %12 : vector<128x8xf32> to vector<128x8xbf16>
    %c0_7 = arith.constant 0 : index
    %c0_8 = arith.constant 0 : index
    %c0_9 = arith.constant 0 : index
    %14 = vector.load %arg13[%c0_7, %c0_8, %c0_9] : memref<4x128x8xbf16, #tpu.memory_space<vmem>>, vector<1x128x8xbf16>
    %15 = vector.shape_cast %14 : vector<1x128x8xbf16> to vector<128x8xbf16>
    %16 = vector.shape_cast %13 : vector<128x8xbf16> to vector<1x128x8xbf16>
    tpu.vector_store %arg13[%c0_7, %c0_8, %c0_9], %16 {strides = array<i32>} : memref<4x128x8xbf16, #tpu.memory_space<vmem>>, vector<1x128x8xbf16>,
    %17 = vector.extract_strided_slice %6 {offsets = [0, 8], sizes = [128, 8], strides = [1, 1]} : vector<128x64xf32> to vector<128x8xf32>
    %18 = arith.truncf %17 : vector<128x8xf32> to vector<128x8xbf16>
    %c1 = arith.constant 1 : index
    %c0_10 = arith.constant 0 : index
    %c0_11 = arith.constant 0 : index
    %19 = vector.load %arg12[%c1, %c0_10, %c0_11] : memref<4x128x8xbf16, #tpu.memory_space<vmem>>, vector<1x128x8xbf16>
    %20 = vector.shape_cast %19 : vector<1x128x8xbf16> to vector<128x8xbf16>
    %21 = vector.shape_cast %18 : vector<128x8xbf16> to vector<1x128x8xbf16>
    tpu.vector_store %arg12[%c1, %c0_10, %c0_11], %21 {strides = array<i32>} : memref<4x128x8xbf16, #tpu.memory_space<vmem>>, vector<1x128x8xbf16>,
    %22 = vector.extract_strided_slice %6 {offsets = [0, 40], sizes = [128, 8], strides = [1, 1]} : vector<128x64xf32> to vector<128x8xf32>
    %23 = arith.truncf %22 : vector<128x8xf32> to vector<128x8xbf16>
    %c1_12 = arith.constant 1 : index
    %c0_13 = arith.constant 0 : index
    %c0_14 = arith.constant 0 : index
    %24 = vector.load %arg13[%c1_12, %c0_13, %c0_14] : memref<4x128x8xbf16, #tpu.memory_space<vmem>>, vector<1x128x8xbf16>
    %25 = vector.shape_cast %24 : vector<1x128x8xbf16> to vector<128x8xbf16>
    %26 = vector.shape_cast %23 : vector<128x8xbf16> to vector<1x128x8xbf16>
    tpu.vector_store %arg13[%c1_12, %c0_13, %c0_14], %26 {strides = array<i32>} : memref<4x128x8xbf16, #tpu.memory_space<vmem>>, vector<1x128x8xbf16>,
    %27 = vector.extract_strided_slice %6 {offsets = [0, 16], sizes = [128, 8], strides = [1, 1]} : vector<128x64xf32> to vector<128x8xf32>
    %28 = arith.truncf %27 : vector<128x8xf32> to vector<128x8xbf16>
    %c2 = arith.constant 2 : index
    %c0_15 = arith.constant 0 : index
    %c0_16 = arith.constant 0 : index
    %29 = vector.load %arg12[%c2, %c0_15, %c0_16] : memref<4x128x8xbf16, #tpu.memory_space<vmem>>, vector<1x128x8xbf16>
    %30 = vector.shape_cast %29 : vector<1x128x8xbf16> to vector<128x8xbf16>
    %31 = vector.shape_cast %28 : vector<128x8xbf16> to vector<1x128x8xbf16>
    tpu.vector_store %arg12[%c2, %c0_15, %c0_16], %31 {strides = array<i32>} : memref<4x128x8xbf16, #tpu.memory_space<vmem>>, vector<1x128x8xbf16>,
    %32 = vector.extract_strided_slice %6 {offsets = [0, 48], sizes = [128, 8], strides = [1, 1]} : vector<128x64xf32> to vector<128x8xf32>
    %33 = arith.truncf %32 : vector<128x8xf32> to vector<128x8xbf16>
    %c2_17 = arith.constant 2 : index
    %c0_18 = arith.constant 0 : index
    %c0_19 = arith.constant 0 : index
    %34 = vector.load %arg13[%c2_17, %c0_18, %c0_19] : memref<4x128x8xbf16, #tpu.memory_space<vmem>>, vector<1x128x8xbf16>
    %35 = vector.shape_cast %34 : vector<1x128x8xbf16> to vector<128x8xbf16>
    %36 = vector.shape_cast %33 : vector<128x8xbf16> to vector<1x128x8xbf16>
    tpu.vector_store %arg13[%c2_17, %c0_18, %c0_19], %36 {strides = array<i32>} : memref<4x128x8xbf16, #tpu.memory_space<vmem>>, vector<1x128x8xbf16>,
    %37 = vector.extract_strided_slice %6 {offsets = [0, 24], sizes = [128, 8], strides = [1, 1]} : vector<128x64xf32> to vector<128x8xf32>
    %38 = arith.truncf %37 : vector<128x8xf32> to vector<128x8xbf16>
    %c3 = arith.constant 3 : index
    %c0_20 = arith.constant 0 : index
    %c0_21 = arith.constant 0 : index
    %39 = vector.load %arg12[%c3, %c0_20, %c0_21] : memref<4x128x8xbf16, #tpu.memory_space<vmem>>, vector<1x128x8xbf16>
    %40 = vector.shape_cast %39 : vector<1x128x8xbf16> to vector<128x8xbf16>
    %41 = vector.shape_cast %38 : vector<128x8xbf16> to vector<1x128x8xbf16>
    tpu.vector_store %arg12[%c3, %c0_20, %c0_21], %41 {strides = array<i32>} : memref<4x128x8xbf16, #tpu.memory_space<vmem>>, vector<1x128x8xbf16>,
    %42 = vector.extract_strided_slice %6 {offsets = [0, 56], sizes = [128, 8], strides = [1, 1]} : vector<128x64xf32> to vector<128x8xf32>
    %43 = arith.truncf %42 : vector<128x8xf32> to vector<128x8xbf16>
    %c3_22 = arith.constant 3 : index
    %c0_23 = arith.constant 0 : index
    %c0_24 = arith.constant 0 : index
    %44 = vector.load %arg13[%c3_22, %c0_23, %c0_24] : memref<4x128x8xbf16, #tpu.memory_space<vmem>>, vector<1x128x8xbf16>
    %45 = vector.shape_cast %44 : vector<1x128x8xbf16> to vector<128x8xbf16>
    %46 = vector.shape_cast %43 : vector<128x8xbf16> to vector<1x128x8xbf16>
    tpu.vector_store %arg13[%c3_22, %c0_23, %c0_24], %46 {strides = array<i32>} : memref<4x128x8xbf16, #tpu.memory_space<vmem>>, vector<1x128x8xbf16>,
    %c0_25 = arith.constant 0 : index
    %c0_26 = arith.constant 0 : index
    %c0_27 = arith.constant 0 : index
    %47 = vector.load %arg11[%c0_25, %c0_26, %c0_27] : memref<4x128x8xbf16, #tpu.memory_space<vmem>>, vector<4x128x8xbf16>
    %c0_28 = arith.constant 0 : index
    %c0_29 = arith.constant 0 : index
    %c0_30 = arith.constant 0 : index
    %48 = vector.load %arg12[%c0_28, %c0_29, %c0_30] : memref<4x128x8xbf16, #tpu.memory_space<vmem>>, vector<4x128x8xbf16>
    "tpu.trace_start"() <{level = 10 : i32, message = "hvd,hud->hvu"}> : () -> ()
    %cst_31 = arith.constant dense<0.000000e+00> : vector<4x128x128xf32>
    %49 = tpu.matmul %47, %48, %cst_31 {dimension_numbers = #tpu.dot_dimension_numbers<[2], [2], [1], [1], [0, 0, 0, 1, 1, 1], [0], [0]>} : vector<4x128x8xbf16>, vector<4x128x8xbf16>, vector<4x128x128xf32> -> vector<4x128x128xf32>
    "tpu.trace_stop"() : () -> ()
    %cst_32 = arith.constant 0.353553385 : f32
    %50 = vector.broadcast %cst_32 : f32 to vector<4x128x128xf32>
    %51 = arith.mulf %49, %50 : vector<4x128x128xf32>
    %cst_33 = arith.constant -5.000000e+00 : f32
    %cst_34 = arith.constant 5.000000e+00 : f32
    %52 = vector.broadcast %cst_33 : f32 to vector<4x128x128xf32>
    %53 = arith.maximumf %52, %51 : vector<4x128x128xf32>
    %54 = vector.broadcast %cst_34 : f32 to vector<4x128x128xf32>
    %55 = arith.minimumf %54, %53 : vector<4x128x128xf32>
    %56 = math.exp %55 : vector<4x128x128xf32>
    %c0_35 = arith.constant 0 : index
    %c0_36 = arith.constant 0 : index
    %57 = vector.load %arg4[%c0_35, %c0_36] : memref<128x128xi8, #tpu.memory_space<vmem>>, vector<128x128xi8>
    %c0_i8 = arith.constant 0 : i8
    %58 = vector.broadcast %c0_i8 : i8 to vector<128x128xi8>
    %59 = arith.cmpi ne, %57, %58 : vector<128x128xi8>
    %60 = vector.shape_cast %59 : vector<128x128xi1> to vector<1x128x128xi1>
    %cst_37 = arith.constant 0.000000e+00 : f32
    %61 = vector.shape_cast %60 : vector<1x128x128xi1> to vector<1x128x128xi1>
    %62 = vector.broadcast %61 : vector<1x128x128xi1> to vector<4x128x128xi1>
    %63 = vector.broadcast %cst_37 : f32 to vector<4x128x128xf32>
    %64 = arith.select %62, %56, %63 : vector<4x128x128xi1>, vector<4x128x128xf32>
    %c0_38 = arith.constant 0 : index
    %c0_39 = arith.constant 0 : index
    %c0_40 = arith.constant 0 : index
    %65 = vector.load %arg15[%c0_38, %c0_39, %c0_40] : memref<4x128x1xf32, #tpu.memory_space<vmem>>, vector<4x128x1xf32>
    %cst_41 = arith.constant dense<0.000000e+00> : vector<4x128xf32>
    %66 = vector.multi_reduction <add>, %64, %cst_41 [2] : vector<4x128x128xf32> to vector<4x128xf32>
    %67 = vector.shape_cast %66 : vector<4x128xf32> to vector<4x128x1xf32>
    %68 = arith.addf %65, %67 : vector<4x128x1xf32>
    %c0_42 = arith.constant 0 : index
    %c0_43 = arith.constant 0 : index
    %c0_44 = arith.constant 0 : index
    %69 = vector.load %arg15[%c0_42, %c0_43, %c0_44] : memref<4x128x1xf32, #tpu.memory_space<vmem>>, vector<4x128x1xf32>
    tpu.vector_store %arg15[%c0_42, %c0_43, %c0_44], %68 {strides = array<i32>} : memref<4x128x1xf32, #tpu.memory_space<vmem>>, vector<4x128x1xf32>,
    %c0_45 = arith.constant 0 : index
    %c0_46 = arith.constant 0 : index
    %c0_47 = arith.constant 0 : index
    %70 = vector.load %arg14[%c0_45, %c0_46, %c0_47] : memref<4x128x8xf32, #tpu.memory_space<vmem>>, vector<4x128x8xf32>
    %71 = arith.truncf %64 : vector<4x128x128xf32> to vector<4x128x128xbf16>
    %c0_48 = arith.constant 0 : index
    %c0_49 = arith.constant 0 : index
    %c0_50 = arith.constant 0 : index
    %72 = vector.load %arg13[%c0_48, %c0_49, %c0_50] : memref<4x128x8xbf16, #tpu.memory_space<vmem>>, vector<4x128x8xbf16>
    "tpu.trace_start"() <{level = 10 : i32, message = "hvu,hud->hvd"}> : () -> ()
    %cst_51 = arith.constant dense<0.000000e+00> : vector<4x128x8xf32>
    %73 = tpu.matmul %71, %72, %cst_51 {dimension_numbers = #tpu.dot_dimension_numbers<[2], [1], [1], [2], [0, 0, 0, 1, 1, 2], [0], [0]>} : vector<4x128x128xbf16>, vector<4x128x8xbf16>, vector<4x128x8xf32> -> vector<4x128x8xf32>
    "tpu.trace_stop"() : () -> ()
    %74 = arith.addf %70, %73 : vector<4x128x8xf32>
    %c0_52 = arith.constant 0 : index
    %c0_53 = arith.constant 0 : index
    %c0_54 = arith.constant 0 : index
    %75 = vector.load %arg14[%c0_52, %c0_53, %c0_54] : memref<4x128x8xf32, #tpu.memory_space<vmem>>, vector<4x128x8xf32>
    tpu.vector_store %arg14[%c0_52, %c0_53, %c0_54], %74 {strides = array<i32>} : memref<4x128x8xf32, #tpu.memory_space<vmem>>, vector<4x128x8xf32>,
    %c1_i32 = arith.constant 1 : i32
    %76 = arith.cmpi eq, %arg1, %c1_i32 : i32
    %77 = arith.extui %76 : i1 to i32
    %c0_i32_55 = arith.constant 0 : i32
    %78 = arith.cmpi ne, %77, %c0_i32_55 : i32
    scf.if %78 {
      %c0_56 = arith.constant 0 : index
      %c0_57 = arith.constant 0 : index
      %c0_58 = arith.constant 0 : index
      %79 = vector.load %arg15[%c0_56, %c0_57, %c0_58] : memref<4x128x1xf32, #tpu.memory_space<vmem>>, vector<4x128x1xf32>
      %cst_59 = arith.constant 0.000000e+00 : f32
      %80 = vector.broadcast %cst_59 : f32 to vector<4x128x1xf32>
      %81 = arith.cmpf ogt, %79, %80 : vector<4x128x1xf32>
      %82 = tpu.reciprocal %79 {approx = true} : vector<4x128x1xf32> -> vector<4x128x1xf32>
      %cst_60 = arith.constant 0.000000e+00 : f32
      %83 = vector.broadcast %cst_60 : f32 to vector<4x128x1xf32>
      %84 = arith.select %81, %82, %83 : vector<4x128x1xi1>, vector<4x128x1xf32>
      %c0_61 = arith.constant 0 : index
      %c0_62 = arith.constant 0 : index
      %c0_63 = arith.constant 0 : index
      %85 = vector.load %arg14[%c0_61, %c0_62, %c0_63] : memref<4x128x8xf32, #tpu.memory_space<vmem>>, vector<4x128x8xf32>
      %86 = vector.broadcast %84 : vector<4x128x1xf32> to vector<4x128x8xf32>
      %87 = arith.mulf %85, %86 : vector<4x128x8xf32>
      %88 = arith.truncf %87 : vector<4x128x8xf32> to vector<4x128x8xbf16>
      %c0_64 = arith.constant 0 : index
      %c0_65 = arith.constant 0 : index
      %c0_66 = arith.constant 0 : index
      %89 = vector.load %arg7[%c0_64, %c0_65, %c0_66] : memref<4x8x32xbf16, #tpu.memory_space<vmem>>, vector<4x8x32xbf16>
      "tpu.trace_start"() <{level = 10 : i32, message = "hvd,hde->hve"}> : () -> ()
      %cst_67 = arith.constant dense<0.000000e+00> : vector<4x128x32xf32>
      %90 = tpu.matmul %88, %89, %cst_67 {dimension_numbers = #tpu.dot_dimension_numbers<[2], [1], [1], [2], [0, 0, 0, 1, 1, 2], [0], [0]>} : vector<4x128x8xbf16>, vector<4x8x32xbf16>, vector<4x128x32xf32> -> vector<4x128x32xf32>
      "tpu.trace_stop"() : () -> ()
      %cst_68 = arith.constant dense<0.000000e+00> : vector<128x32xf32>
      %91 = vector.multi_reduction <add>, %90, %cst_68 [0] : vector<4x128x32xf32> to vector<128x32xf32>
      %c0_69 = arith.constant 0 : index
      %c0_70 = arith.constant 0 : index
      %92 = vector.load %arg8[%c0_69, %c0_70] : memref<1x32xf32, #tpu.memory_space<vmem>>, vector<1x32xf32>
      %93 = vector.broadcast %92 : vector<1x32xf32> to vector<128x32xf32>
      %94 = arith.addf %91, %93 : vector<128x32xf32>
      %c0_71 = arith.constant 0 : index
      %c0_72 = arith.constant 0 : index
      %95 = vector.load %arg2[%c0_71, %c0_72] : memref<128x32xf32, #tpu.memory_space<vmem>>, vector<128x32xf32>
      %96 = arith.addf %95, %94 : vector<128x32xf32>
      %c0_73 = arith.constant 0 : index
      %c0_74 = arith.constant 0 : index
      %97 = vector.load %arg9[%c0_73, %c0_74] : memref<128x32xf32, #tpu.memory_space<vmem>>, vector<128x32xf32>
      tpu.vector_store %arg9[%c0_73, %c0_74], %96 {strides = array<i32>} : memref<128x32xf32, #tpu.memory_space<vmem>>, vector<128x32xf32>,
      %cst_75 = arith.constant dense<0.000000e+00> : vector<32xf32>
      %98 = vector.multi_reduction <add>, %96, %cst_75 [0] : vector<128x32xf32> to vector<32xf32>
      %99 = vector.shape_cast %98 : vector<32xf32> to vector<1x32xf32>
      %100 = arith.mulf %96, %96 : vector<128x32xf32>
      %cst_76 = arith.constant dense<0.000000e+00> : vector<32xf32>
      %101 = vector.multi_reduction <add>, %100, %cst_76 [0] : vector<128x32xf32> to vector<32xf32>
      %102 = vector.shape_cast %101 : vector<32xf32> to vector<1x32xf32>
      %103 = tpu.concatenate %99, %102 in 0 : vector<1x32xf32>, vector<1x32xf32> -> vector<2x32xf32>
      %104 = vector.shape_cast %103 : vector<2x32xf32> to vector<1x2x32xf32>
      %c0_77 = arith.constant 0 : index
      %c0_78 = arith.constant 0 : index
      %c0_79 = arith.constant 0 : index
      %105 = vector.load %arg10[%c0_77, %c0_78, %c0_79] : memref<1x2x32xf32, #tpu.memory_space<vmem>>, vector<1x2x32xf32>
      tpu.vector_store %arg10[%c0_77, %c0_78, %c0_79], %104 {strides = array<i32>} : memref<1x2x32xf32, #tpu.memory_space<vmem>>, vector<1x2x32xf32>,
    } else {
    }
    return
  }
  func.func @transform_0(%arg0: i32, %arg1: i32) -> (i32, i32) {
    %c0_i32 = arith.constant 0 : i32
    %c0_i32_0 = arith.constant 0 : i32
    return %arg0, %c0_i32 : i32, i32
  }
  func.func @transform_1(%arg0: i32, %arg1: i32) -> (i32, i32) {
    %c0_i32 = arith.constant 0 : i32
    %c0_i32_0 = arith.constant 0 : i32
    return %arg1, %c0_i32 : i32, i32
  }
  func.func @transform_2(%arg0: i32, %arg1: i32) -> (i32, i32) {
    %c0_i32 = arith.constant 0 : i32
    return %arg0, %arg1 : i32, i32
  }
  func.func @transform_3(%arg0: i32, %arg1: i32) -> (i32, i32) {
    %c0_i32 = arith.constant 0 : i32
    %c0_i32_0 = arith.constant 0 : i32
    %c0_i32_1 = arith.constant 0 : i32
    return %c0_i32, %c0_i32_0 : i32, i32
  }
  func.func @transform_4(%arg0: i32, %arg1: i32) -> (i32, i32) {
    %c0_i32 = arith.constant 0 : i32
    %c0_i32_0 = arith.constant 0 : i32
    %c0_i32_1 = arith.constant 0 : i32
    return %c0_i32, %c0_i32_0 : i32, i32
  }
  func.func @transform_5(%arg0: i32, %arg1: i32) -> (i32, i32, i32) {
    %c0_i32 = arith.constant 0 : i32
    %c0_i32_0 = arith.constant 0 : i32
    %c0_i32_1 = arith.constant 0 : i32
    %c0_i32_2 = arith.constant 0 : i32
    return %c0_i32, %c0_i32_0, %c0_i32_1 : i32, i32, i32
  }
  func.func @transform_6(%arg0: i32, %arg1: i32) -> (i32, i32) {
    %c0_i32 = arith.constant 0 : i32
    %c0_i32_0 = arith.constant 0 : i32
    %c0_i32_1 = arith.constant 0 : i32
    return %c0_i32, %c0_i32_0 : i32, i32
  }
  func.func @transform_7(%arg0: i32, %arg1: i32) -> (i32, i32) {
    %c0_i32 = arith.constant 0 : i32
    %c0_i32_0 = arith.constant 0 : i32
    return %arg0, %c0_i32 : i32, i32
  }
  func.func @transform_8(%arg0: i32, %arg1: i32) -> (i32, i32, i32) {
    %c0_i32 = arith.constant 0 : i32
    %c0_i32_0 = arith.constant 0 : i32
    %c0_i32_1 = arith.constant 0 : i32
    return %arg0, %c0_i32, %c0_i32_0 : i32, i32, i32
  }
}

</mosaic_0001>

<bundles_post_ra>
// kernel: tpu_custom_call.1
= control target key start
LH: loop header
LB: loop body
LE: loop exit
PB: predicated region body
PF: predicated region fallthrough
CT: control target
= control target key end

     0   :  { %s8255_s0 = inlined_call_operand.vmem [shape: f32[256,32], index: 0, kind: input, shape index: {}]   ;;  %s8256_s1 = inlined_call_operand.vmem [shape: f32[256,32], index: 1, kind: input, shape index: {}]   ;;  %s8257_s2 = inlined_call_operand.vmem [shape: s8[256,256], index: 2, kind: input, shape index: {}]   ;;  %s8258_s3 = inlined_call_operand.vmem [shape: bf16[32,32], index: 3, kind: input, shape index: {}]   ;;  %s8259_s4 = inlined_call_operand.vmem [shape: bf16[32,64], index: 4, kind: input, shape index: {}]   ;;  %s8260_s5 = inlined_call_operand.vmem [shape: bf16[4,8,32], index: 5, kind: input, shape index: {}]   ;;  %s8261_s6 = inlined_call_operand.vmem [shape: f32[1,32], index: 6, kind: input, shape index: {}]   ;;  %s8262_s7 = inlined_call_operand.vmem [shape: f32[256,32], index: 7, kind: output, shape index: {0}]   ;;  %s8263_s8 = inlined_call_operand.hbm [shape: f32[2,2,32], index: 8, kind: output, shape index: {1}]  }
   0x1   :  { %8303 = sst [smem:[#allocation20_spill]] %s8257_s2 }
   0x2   :  { %14 = vsyncpa [#allocation9], 0 }
   0x3   :  { %16 = vsyncpa [#allocation9 + $0x1], 0  ;;  %s6476_s27 = smov 0   ;;  %s6478_s28 = smov 0  }
   0x4   :  { %s6480_s29 = smov 0   ;;  %s6482_s30 = smov 0  }
   0x5   :  { %s6484_s9 = smov 0   ;;  %s6486_s10 = smov 0  }
   0x6   :  { %s6488_s11 = smov 0   ;;  %s6490_s12 = smov 0  }
   0x7   :  { %s6492_s13 = smov 0   ;;  %s6494_s14 = smov 0  }
   0x8 LB: > { %8304 = sst [smem:[#allocation11_spill]] %s6379_s27  ;;  %s5082_s15 = sadd.s32 4294967295, %s6415_s14   ;;  %s6415_s14 = sphi %s6494_s14, %s22_s14   ;;  %s6411_s13 = sphi %s6492_s13, %s8659_s13   ;;  %s6407_s12 = sphi %s6490_s12, %s8654_s12   ;;  %s6403_s11 = sphi %s6488_s11, %s8653_s11   ;;  %s6399_s10 = sphi %s6486_s10, %s8652_s10   ;;  %s6395_s9 = sphi %s6484_s9, %s8651_s9   ;;  %s6391_s30 = sphi %s6482_s30, %s8650_s30   ;;  %s6387_s29 = sphi %s6480_s29, %s8658_s29   ;;  %s6383_s28 = sphi %s6478_s28, %s8657_s28   ;;  %s6379_s27 = sphi %s6476_s27, %s8656_s27  }
   0x9   : > { %8305 = sst [smem:[#allocation12_spill]] %s6395_s9  ;;  %s5083_s16 = sadd.s32 4294967294, %s6415_s14  }
   0xa   : > { %8306 = sst [smem:[#allocation13_spill]] %s6407_s12  ;;  %s31_s17 = sadd.s32 1, %s6407_s12 }
   0xb   : > { %8307 = sst [smem:[#allocation14_spill]] %s6411_s13  ;;  %s34_s18 = sadd.s32 1, %s6411_s13 }
   0xc   : > { %p32_p0 = scmp.ge.s32.totalorder %s31_s17, 2  ;;  %s95_s19 = sadd.s32 1, %s6395_s9 }
   0xd   : > { %p102_p1 = scmp.ne.s32.totalorder %s6395_s9, %s6391_s30  ;;  %p103_p2 = scmp.eq.s32.totalorder %s6415_s14, 0 }
   0xe   : > { %s8661_s17 = smov (%p32_p0, %s31_s17), 0  ;;  %s8663_s18 = smov (!%p32_p0, %s34_s18), %s6411_s13 }
   0xf   : > { %8308 = sst [smem:[#allocation15_spill]] %s8661_s17  ;;  %s91_s20 = ssub.s32 %s6407_s12, %s8661_s17 }
  0x10   : > { %p6539_p3 = por %p103_p2, %p102_p1  ;;  %p36_p4 = scmp.ge.s32.totalorder %s8663_s18, 2 }
  0x11   : > { %s231_s22 = sadd.s32 1, %s6387_s29  ;;  %p241_p5 = scmp.ne.s32.totalorder %s6387_s29, %s6383_s28 }
  0x12   : > { %p242_p6 = scmp.eq.s32.totalorder %s5082_s15, 3  ;;  %s8665_s18 = smov (%p36_p4, %s8663_s18), 0 }
  0x13   : > { %8310 = sst [smem:[#allocation16_spill]] %s8665_s18  ;;  %p247_p8 = scmp.ne.s32.totalorder %s6383_s28, %s6379_s27 }
  0x14   : > { %p6548_p7 = por %p242_p6, %p241_p5  ;;  %s90_s24 = ssub.s32 %s6411_s13, %s8665_s18 }
  0x15   : > { %p248_p9 = scmp.eq.s32.totalorder %s5083_s16, 3  ;;  %s92_s25 = sor.u32 %s91_s20, %s90_s24 }
  0x16   : > { %p229_p10 = scmp.eq.s32.totalorder %s90_s24, 0  ;;  %p93_p11 = scmp.eq.s32.totalorder %s92_s25, 0 }
  0x17   : > { %p6556_p12 = por %p248_p9, %p247_p8  ;;  %p5085_p13 = scmp.ge.s32.totalorder %s6415_s14, 4 }
  0x18   : > { %s6561_s17 = scalar_select %p229_p10, %s6387_s29, %s231_s22  }
  0x19   : > { %s8312_s26 = scalar_select %p6556_p12, 1, 0 }
  0x1a   : > { %8314 = sst [smem:[#allocation18_spill]] %s6561_s17  ;;  %276 = sbr.rel (%p5085_p13) target bundleno = 45 (0x2d), region = 32 }
  0x1b   : > { %8313 = sst [smem:[#allocation17_spill]] %s8312_s26 }
  0x1c   : > { %s6564_s15 = scalar_select %p93_p11, %s6395_s9, %s95_s19  }
  0x1e   : > { %8315 = sst [smem:[#allocation19_spill]] %s6564_s15 }
  0x21   : > { %297 = sbr.rel (!%p6539_p3) target bundleno = 45 (0x2d), region = 44  ;;  %s299_s16 = sand.u32 (%p6539_p3), 1, %s6395_s9  }
  0x22   : > { %s5350_s20 = sshll.u32 (%p6539_p3), %s6411_s13, 3  ;;  %s5086_s24 = sshll.u32 (%p6539_p3), %s299_s16, 5 }
  0x23   : > { %s304_s25 = sadd.s32 (%p6539_p3), %s6407_s12, %s5350_s20  ;;  %s8316_s2 = sld [smem:[#allocation20_spill]] (%p6539_p3) }
  0x24   : > { %s5089_s18 = sshll.u32 (%p6539_p3), %s304_s25, 3  ;;  %s301_s19 = scalar_lea.vmem (%p6539_p3), [#allocation7], %s5086_s24 }
  0x29   : > { %s306_s22 = scalar_lea.vmem %s8316_s2, %s5089_s18 }
  0x2a   : > { %v340_v0 = vld [vmem:[%s306_s22] sm:$0xff]  ;;  %v342_v1 = vld [vmem:[%s306_s22 + $0x10] sm:$0xff] }
  0x2b   : > { %v344_v2 = vld [vmem:[%s306_s22 + $0x20] sm:$0xff]  ;;  %341 = vst [vmem:[%s301_s19] sm:$0xff] %v340_v0  ;;  %343 = vst [vmem:[%s301_s19 + $0x8] sm:$0xff] %v342_v1  ;;  %v346_v3 = vld [vmem:[%s306_s22 + $0x30] sm:$0xff] }
  0x2c   : > { %345 = vst [vmem:[%s301_s19 + $0x10] sm:$0xff] %v344_v2  ;;  %347 = vst [vmem:[%s301_s19 + $0x18] sm:$0xff] %v346_v3 }
  0x2d PF: > { %p5090_p0 = scmp.ge.s32.totalorder %s6415_s14, 1  ;;  %p352_p1 = scmp.lt.s32.totalorder %s6415_s14, 5 }
  0x2f   : > { %p353_p2 = pnand %p5090_p0, %p352_p1 }
  0x30   : > { %s359_s27 = sand.u32 (!%p353_p2), 1, %s6391_s30   ;;  %s8269_s18 = sand.u32 (!%p353_p2), 1, %s6383_s28  }
  0x31   : > { %356 = sbr.rel (%p353_p2) target bundleno = 1901 (0x76d), region = 82  ;;  %s5091_s21 = sshll.u32 (!%p353_p2), %s359_s27, 5 }
  0x32   : > { %s6581_s26 = sshll.u32 (!%p353_p2), %s8269_s18, 1  ;;  %s5093_s16 = sshll.u32 (!%p353_p2), %s6403_s11, 4 }
  0x33   : > { %s5095_s20 = sshll.u32 (!%p353_p2), %s6399_s10, 4  ;;  %p408_p3 = scmp.lt.s32.totalorder (!%p353_p2), %s5093_s16, 31 }
  0x34   : > { %p414_p4 = scmp.lt.s32.totalorder (!%p353_p2), %s5095_s20, 31  ;;  %s6600_s9 = scalar_lea.vmem (!%p353_p2), [#allocation7], %s5091_s21 }
  0x35   : > { %s406_s17 = scalar_lea.vmem (!%p353_p2), [#allocation8], %s6581_s26  ;;  %p5099_p5 = scmp.ne.s32.totalorder (!%p353_p2), %s6399_s10, 0 }
  0x38   : > { %s8667_s16 = smov (!%p408_p3, %s5093_s16), 31  ;;  %s8669_s20 = smov (!%p414_p4, %s5095_s20), 31 }
  0x39   : > { %s5094_s24 = sshll.u32 %s8667_s16, 3  ;;  %s5096_s2 = sshll.u32 %s8669_s20, 3  ;;  %vm498_vm0 = vcmask (!%p5099_p5), 7168   ;;  %v6417_v4 = vmov (!%p5099_p5), 0.0   ;;  %v6043_v5 = vld [vmem:[%s8258_s3] sm:$0xff] (!%p5099_p5)   ;;  %v6044_v6 = vld [vmem:[%s8258_s3 + $0x8] sm:$0xff] (!%p5099_p5)  }
  0x3a   : > { %s6588_s19 = scalar_lea.vmem %s8255_s0, %s5094_s24  ;;  %s6593_s27 = scalar_lea.vmem %s8256_s1, %s5096_s2  ;;  %499 = vst.msk [vmem:[#allocation6] sm:$0xff] (!%p5099_p5), %vm498_vm0, %v6417_v4  ;;  %500 = vst.msk [vmem:[#allocation6 + $0x8] sm:$0xff] (!%p5099_p5), %vm498_vm0, %v6417_v4  ;;  %5535 = vmatprep.subr.bf16.mxu0 (!%p5099_p5), %v6043_v5  ;;  %5903 = vmatprep.subr.bf16.mxu1 (!%p5099_p5), %v6043_v5  ;;  %vm603_vm1 = vcmask (!%p5099_p5), 261120   ;;  %vm433_vm2 = vcmask (!%p5099_p5), 64512  }
  0x3b   : > { %s6598_s15 = scalar_lea.vmem %s8262_s7, %s5094_s24  ;;  %432 = sbr.rel (%p5099_p5) target bundleno = 443 (0x1bb), region = 90  ;;  %501 = vst.msk [vmem:[#allocation6 + $0x10] sm:$0xff] (!%p5099_p5), %vm498_vm0, %v6417_v4  ;;  %502 = vst.msk [vmem:[#allocation6 + $0x18] sm:$0xff] (!%p5099_p5), %vm498_vm0, %v6417_v4  ;;  %v563_v7 = vld [vmem:[%s6588_s19] sm:$0xff] (!%p5099_p5)  ;;  %v564_v8 = vld [vmem:[%s6588_s19 + $0x8] sm:$0xff] (!%p5099_p5)  ;;  %5536 = vmatpush3.bf16.msra.mxu0 (!%p5099_p5), %v6043_v5  ;;  %5905 = vmatpush3.bf16.msra.mxu1 (!%p5099_p5), %v6043_v5 }
  0x3c   : > { %503 = vst.msk [vmem:[#allocation6 + $0x20] sm:$0xff] (!%p5099_p5), %vm498_vm0, %v6417_v4  ;;  %504 = vst.msk [vmem:[#allocation6 + $0x28] sm:$0xff] (!%p5099_p5), %vm498_vm0, %v6417_v4  ;;  %v579_v9 = vpack.c.bf16 (!%p5099_p5), %v564_v8, %v563_v7  ;;  %v571_v10 = vld [vmem:[%s6588_s19 + $0x40] sm:$0xff] (!%p5099_p5)  ;;  %v572_v11 = vld [vmem:[%s6588_s19 + $0x48] sm:$0xff] (!%p5099_p5)  ;;  %5537 = vmatprep.subr.bf16.mxu0 (!%p5099_p5), %v6044_v6  ;;  %5904 = vmatprep.subr.bf16.mxu1 (!%p5099_p5), %v6044_v6  ;;  %s6418_s21 = smov (!%p5099_p5), 120   ;;  %s6419_s16 = smov (!%p5099_p5), 112  }
  0x3d   : > { %505 = vst.msk [vmem:[#allocation6 + $0x30] sm:$0xff] (!%p5099_p5), %vm498_vm0, %v6417_v4  ;;  %506 = vst.msk [vmem:[#allocation6 + $0x38] sm:$0xff] (!%p5099_p5), %vm498_vm0, %v6417_v4  ;;  %v565_v12 = vld [vmem:[%s6588_s19 + $0x10] sm:$0xff] (!%p5099_p5)  ;;  %v583_v13 = vpack.c.bf16 (!%p5099_p5), %v572_v11, %v571_v10  ;;  %v566_v14 = vld [vmem:[%s6588_s19 + $0x18] sm:$0xff] (!%p5099_p5)  ;;  %s6420_s20 = smov (!%p5099_p5), 104  }
  0x3e   : > { %507 = vst.msk [vmem:[#allocation6 + $0x40] sm:$0xff] (!%p5099_p5), %vm498_vm0, %v6417_v4  ;;  %508 = vst.msk [vmem:[#allocation6 + $0x48] sm:$0xff] (!%p5099_p5), %vm498_vm0, %v6417_v4  ;;  %v573_v15 = vld [vmem:[%s6588_s19 + $0x50] sm:$0xff] (!%p5099_p5)  ;;  %v574_v16 = vld [vmem:[%s6588_s19 + $0x58] sm:$0xff] (!%p5099_p5)  ;;  %5539 = vmatprep.mubr.msk.bf16.mxu0 (!%p5099_p5), %vm603_vm1, %v579_v9  ;;  %v580_v21 = vpack.c.bf16 (!%p5099_p5), %v566_v14, %v565_v12 }
  0x3f   : > { %509 = vst.msk [vmem:[#allocation6 + $0x50] sm:$0xff] (!%p5099_p5), %vm498_vm0, %v6417_v4  ;;  %510 = vst.msk [vmem:[#allocation6 + $0x58] sm:$0xff] (!%p5099_p5), %vm498_vm0, %v6417_v4  ;;  %v567_v17 = vld [vmem:[%s6588_s19 + $0x20] sm:$0xff] (!%p5099_p5)  ;;  %v568_v18 = vld [vmem:[%s6588_s19 + $0x28] sm:$0xff] (!%p5099_p5)  ;;  %5547 = vmatprep.mubr.msk.bf16.mxu1 (!%p5099_p5), %vm603_vm1, %v583_v13  ;;  %v584_v22 = vpack.c.bf16 (!%p5099_p5), %v574_v16, %v573_v15  ;;  %5538 = vmatpush3.bf16.msra.mxu0 (!%p5099_p5), %v6044_v6 }
  0x40   : > { %511 = vst.msk [vmem:[#allocation6 + $0x60] sm:$0xff] (!%p5099_p5), %vm498_vm0, %v6417_v4  ;;  %512 = vst.msk [vmem:[#allocation6 + $0x68] sm:$0xff] (!%p5099_p5), %vm498_vm0, %v6417_v4  ;;  %v575_v19 = vld [vmem:[%s6588_s19 + $0x60] sm:$0xff] (!%p5099_p5)  ;;  %v576_v20 = vld [vmem:[%s6588_s19 + $0x68] sm:$0xff] (!%p5099_p5)  ;;  %5906 = vmatpush3.bf16.msra.mxu1 (!%p5099_p5), %v6044_v6  ;;  %v581_v23 = vpack.c.bf16 (!%p5099_p5), %v568_v18, %v567_v17 }
  0x41   : > { %513 = vst.msk [vmem:[#allocation6 + $0x70] sm:$0xff] (!%p5099_p5), %vm498_vm0, %v6417_v4  ;;  %514 = vst.msk [vmem:[#allocation6 + $0x78] sm:$0xff] (!%p5099_p5), %vm498_vm0, %v6417_v4  ;;  %v585_v24 = vpack.c.bf16 (!%p5099_p5), %v576_v20, %v575_v19  ;;  %v569_v25 = vld [vmem:[%s6588_s19 + $0x30] sm:$0xff] (!%p5099_p5)  ;;  %v570_v26 = vld [vmem:[%s6588_s19 + $0x38] sm:$0xff] (!%p5099_p5) }
  0x42   : > { %515 = vst.msk [vmem:[#allocation6 + $0x80] sm:$0xff] %vm498_vm0, %v6417_v4  ;;  %516 = vst.msk [vmem:[#allocation6 + $0x88] sm:$0xff] %vm498_vm0, %v6417_v4  ;;  %5540 = vmatmul.mubr.msk.bf16.vlgmr.msra.gmra.mrb[0].mxu0 %vm603_vm1, %v580_v21  ;;  %v577_v27 = vld [vmem:[%s6588_s19 + $0x70] sm:$0xff]  ;;  %v578_v28 = vld [vmem:[%s6588_s19 + $0x78] sm:$0xff]  ;;  %v582_v29 = vpack.c.bf16 %v570_v26, %v569_v25 }
  0x43   : > { %517 = vst.msk [vmem:[#allocation6 + $0x90] sm:$0xff] %vm498_vm0, %v6417_v4  ;;  %518 = vst.msk [vmem:[#allocation6 + $0x98] sm:$0xff] %vm498_vm0, %v6417_v4  ;;  %5548 = vmatmul.mubr.msk.bf16.vlgmr.msra.gmra.mrb[0].mxu1 %vm603_vm1, %v584_v22  ;;  %5543 = vmatprep.mubr.msk.bf16.mxu0 %vm603_vm1, %v581_v23  ;;  %v586_v30 = vpack.c.bf16 %v578_v28, %v577_v27 }
  0x44   : > { %519 = vst.msk [vmem:[#allocation6 + $0xa0] sm:$0xff] %vm498_vm0, %v6417_v4  ;;  %520 = vst.msk [vmem:[#allocation6 + $0xa8] sm:$0xff] %vm498_vm0, %v6417_v4  ;;  %5551 = vmatprep.mubr.msk.bf16.mxu1 %vm603_vm1, %v585_v24 }
  0x45   : > { %521 = vst.msk [vmem:[#allocation6 + $0xb0] sm:$0xff] %vm498_vm0, %v6417_v4  ;;  %522 = vst.msk [vmem:[#allocation6 + $0xb8] sm:$0xff] %vm498_vm0, %v6417_v4 }
  0x46   : > { %523 = vst.msk [vmem:[#allocation6 + $0xc0] sm:$0xff] %vm498_vm0, %v6417_v4  ;;  %524 = vst.msk [vmem:[#allocation6 + $0xc8] sm:$0xff] %vm498_vm0, %v6417_v4 }
  0x47   : > { %525 = vst.msk [vmem:[#allocation6 + $0xd0] sm:$0xff] %vm498_vm0, %v6417_v4  ;;  %526 = vst.msk [vmem:[#allocation6 + $0xd8] sm:$0xff] %vm498_vm0, %v6417_v4 }
  0x48   : > { %527 = vst.msk [vmem:[#allocation6 + $0xe0] sm:$0xff] %vm498_vm0, %v6417_v4  ;;  %528 = vst.msk [vmem:[#allocation6 + $0xe8] sm:$0xff] %vm498_vm0, %v6417_v4 }
  0x49   : > { %529 = vst.msk [vmem:[#allocation6 + $0xf0] sm:$0xff] %vm498_vm0, %v6417_v4  ;;  %530 = vst.msk [vmem:[#allocation6 + $0xf8] sm:$0xff] %vm498_vm0, %v6417_v4 }
  0x4a   : > { %531 = vst.msk [vmem:[#allocation6 + $0x100] sm:$0xff] %vm498_vm0, %v6417_v4  ;;  %532 = vst.msk [vmem:[#allocation6 + $0x108] sm:$0xff] %vm498_vm0, %v6417_v4  ;;  %5544 = vmatmul.mubr.msk.bf16.gmra.mrb[4].mxu0 %vm603_vm1, %v582_v29 }
  0x4b   : > { %533 = vst.msk [vmem:[#allocation6 + $0x110] sm:$0xff] %vm498_vm0, %v6417_v4  ;;  %534 = vst.msk [vmem:[#allocation6 + $0x118] sm:$0xff] %vm498_vm0, %v6417_v4  ;;  %5552 = vmatmul.mubr.msk.bf16.gmra.mrb[4].mxu1 %vm603_vm1, %v586_v30 }
  0x4c   : > { %535 = vst.msk [vmem:[#allocation6 + $0x120] sm:$0xff] %vm498_vm0, %v6417_v4  ;;  %536 = vst.msk [vmem:[#allocation6 + $0x128] sm:$0xff] %vm498_vm0, %v6417_v4 }
  0x4d   : > { %537 = vst.msk [vmem:[#allocation6 + $0x130] sm:$0xff] %vm498_vm0, %v6417_v4  ;;  %538 = vst.msk [vmem:[#allocation6 + $0x138] sm:$0xff] %vm498_vm0, %v6417_v4 }
  0x4e   : > { %539 = vst.msk [vmem:[#allocation6 + $0x140] sm:$0xff] %vm498_vm0, %v6417_v4  ;;  %540 = vst.msk [vmem:[#allocation6 + $0x148] sm:$0xff] %vm498_vm0, %v6417_v4 }
  0x4f   : > { %541 = vst.msk [vmem:[#allocation6 + $0x150] sm:$0xff] %vm498_vm0, %v6417_v4  ;;  %542 = vst.msk [vmem:[#allocation6 + $0x158] sm:$0xff] %vm498_vm0, %v6417_v4 }
  0x50   : > { %543 = vst.msk [vmem:[#allocation6 + $0x160] sm:$0xff] %vm498_vm0, %v6417_v4  ;;  %544 = vst.msk [vmem:[#allocation6 + $0x168] sm:$0xff] %vm498_vm0, %v6417_v4 }
  0x51   : > { %545 = vst.msk [vmem:[#allocation6 + $0x170] sm:$0xff] %vm498_vm0, %v6417_v4  ;;  %546 = vst.msk [vmem:[#allocation6 + $0x178] sm:$0xff] %vm498_vm0, %v6417_v4 }
  0x52   : > { %547 = vst.msk [vmem:[#allocation6 + $0x180] sm:$0xff] %vm498_vm0, %v6417_v4  ;;  %548 = vst.msk [vmem:[#allocation6 + $0x188] sm:$0xff] %vm498_vm0, %v6417_v4 }
  0x53   : > { %549 = vst.msk [vmem:[#allocation6 + $0x190] sm:$0xff] %vm498_vm0, %v6417_v4  ;;  %550 = vst.msk [vmem:[#allocation6 + $0x198] sm:$0xff] %vm498_vm0, %v6417_v4 }
  0x54   : > { %551 = vst.msk [vmem:[#allocation6 + $0x1a0] sm:$0xff] %vm498_vm0, %v6417_v4  ;;  %552 = vst.msk [vmem:[#allocation6 + $0x1a8] sm:$0xff] %vm498_vm0, %v6417_v4 }
  0x55   : > { %553 = vst.msk [vmem:[#allocation6 + $0x1b0] sm:$0xff] %vm498_vm0, %v6417_v4  ;;  %554 = vst.msk [vmem:[#allocation6 + $0x1b8] sm:$0xff] %vm498_vm0, %v6417_v4 }
  0x56   : > { %555 = vst.msk [vmem:[#allocation6 + $0x1c0] sm:$0xff] %vm498_vm0, %v6417_v4  ;;  %556 = vst.msk [vmem:[#allocation6 + $0x1c8] sm:$0xff] %vm498_vm0, %v6417_v4 }
  0x57   : > { %557 = vst.msk [vmem:[#allocation6 + $0x1d0] sm:$0xff] %vm498_vm0, %v6417_v4  ;;  %558 = vst.msk [vmem:[#allocation6 + $0x1d8] sm:$0xff] %vm498_vm0, %v6417_v4 }
  0x58   : > { %559 = vst.msk [vmem:[#allocation6 + $0x1e0] sm:$0xff] %vm498_vm0, %v6417_v4  ;;  %560 = vst.msk [vmem:[#allocation6 + $0x1e8] sm:$0xff] %vm498_vm0, %v6417_v4 }
  0x59   : > { %561 = vst.msk [vmem:[#allocation6 + $0x1f0] sm:$0xff] %vm498_vm0, %v6417_v4  ;;  %562 = vst.msk [vmem:[#allocation6 + $0x1f8] sm:$0xff] %vm498_vm0, %v6417_v4 }
  0x5a   : > { %434 = vst.msk [vmem:[#allocation5] sm:$0xff] %vm433_vm2, %v6417_v4  ;;  %435 = vst.msk [vmem:[#allocation5 + $0x8] sm:$0xff] %vm433_vm2, %v6417_v4 }
  0x5b   : > { %436 = vst.msk [vmem:[#allocation5 + $0x10] sm:$0xff] %vm433_vm2, %v6417_v4  ;;  %437 = vst.msk [vmem:[#allocation5 + $0x18] sm:$0xff] %vm433_vm2, %v6417_v4 }
  0x5c   : > { %438 = vst.msk [vmem:[#allocation5 + $0x20] sm:$0xff] %vm433_vm2, %v6417_v4  ;;  %439 = vst.msk [vmem:[#allocation5 + $0x28] sm:$0xff] %vm433_vm2, %v6417_v4 }
  0x5d   : > { %440 = vst.msk [vmem:[#allocation5 + $0x30] sm:$0xff] %vm433_vm2, %v6417_v4  ;;  %441 = vst.msk [vmem:[#allocation5 + $0x38] sm:$0xff] %vm433_vm2, %v6417_v4 }
  0x5e   : > { %442 = vst.msk [vmem:[#allocation5 + $0x40] sm:$0xff] %vm433_vm2, %v6417_v4  ;;  %443 = vst.msk [vmem:[#allocation5 + $0x48] sm:$0xff] %vm433_vm2, %v6417_v4 }
  0x5f   : > { %444 = vst.msk [vmem:[#allocation5 + $0x50] sm:$0xff] %vm433_vm2, %v6417_v4  ;;  %445 = vst.msk [vmem:[#allocation5 + $0x58] sm:$0xff] %vm433_vm2, %v6417_v4 }
  0x60   : > { %446 = vst.msk [vmem:[#allocation5 + $0x60] sm:$0xff] %vm433_vm2, %v6417_v4  ;;  %447 = vst.msk [vmem:[#allocation5 + $0x68] sm:$0xff] %vm433_vm2, %v6417_v4 }
  0x61   : > { %448 = vst.msk [vmem:[#allocation5 + $0x70] sm:$0xff] %vm433_vm2, %v6417_v4  ;;  %449 = vst.msk [vmem:[#allocation5 + $0x78] sm:$0xff] %vm433_vm2, %v6417_v4 }
  0x62   : > { %450 = vst.msk [vmem:[#allocation5 + $0x80] sm:$0xff] %vm433_vm2, %v6417_v4  ;;  %451 = vst.msk [vmem:[#allocation5 + $0x88] sm:$0xff] %vm433_vm2, %v6417_v4 }
  0x63   : > { %452 = vst.msk [vmem:[#allocation5 + $0x90] sm:$0xff] %vm433_vm2, %v6417_v4  ;;  %453 = vst.msk [vmem:[#allocation5 + $0x98] sm:$0xff] %vm433_vm2, %v6417_v4 }
  0x64   : > { %454 = vst.msk [vmem:[#allocation5 + $0xa0] sm:$0xff] %vm433_vm2, %v6417_v4  ;;  %455 = vst.msk [vmem:[#allocation5 + $0xa8] sm:$0xff] %vm433_vm2, %v6417_v4 }
  0x65   : > { %456 = vst.msk [vmem:[#allocation5 + $0xb0] sm:$0xff] %vm433_vm2, %v6417_v4  ;;  %457 = vst.msk [vmem:[#allocation5 + $0xb8] sm:$0xff] %vm433_vm2, %v6417_v4 }
  0x66   : > { %458 = vst.msk [vmem:[#allocation5 + $0xc0] sm:$0xff] %vm433_vm2, %v6417_v4  ;;  %459 = vst.msk [vmem:[#allocation5 + $0xc8] sm:$0xff] %vm433_vm2, %v6417_v4 }
  0x67   : > { %460 = vst.msk [vmem:[#allocation5 + $0xd0] sm:$0xff] %vm433_vm2, %v6417_v4  ;;  %461 = vst.msk [vmem:[#allocation5 + $0xd8] sm:$0xff] %vm433_vm2, %v6417_v4 }
  0x68   : > { %462 = vst.msk [vmem:[#allocation5 + $0xe0] sm:$0xff] %vm433_vm2, %v6417_v4  ;;  %463 = vst.msk [vmem:[#allocation5 + $0xe8] sm:$0xff] %vm433_vm2, %v6417_v4 }
  0x69   : > { %464 = vst.msk [vmem:[#allocation5 + $0xf0] sm:$0xff] %vm433_vm2, %v6417_v4  ;;  %465 = vst.msk [vmem:[#allocation5 + $0xf8] sm:$0xff] %vm433_vm2, %v6417_v4 }
  0x6a   : > { %466 = vst.msk [vmem:[#allocation5 + $0x100] sm:$0xff] %vm433_vm2, %v6417_v4  ;;  %467 = vst.msk [vmem:[#allocation5 + $0x108] sm:$0xff] %vm433_vm2, %v6417_v4 }
  0x6b   : > { %468 = vst.msk [vmem:[#allocation5 + $0x110] sm:$0xff] %vm433_vm2, %v6417_v4  ;;  %469 = vst.msk [vmem:[#allocation5 + $0x118] sm:$0xff] %vm433_vm2, %v6417_v4 }
  0x6c   : > { %470 = vst.msk [vmem:[#allocation5 + $0x120] sm:$0xff] %vm433_vm2, %v6417_v4  ;;  %471 = vst.msk [vmem:[#allocation5 + $0x128] sm:$0xff] %vm433_vm2, %v6417_v4 }
  0x6d   : > { %472 = vst.msk [vmem:[#allocation5 + $0x130] sm:$0xff] %vm433_vm2, %v6417_v4  ;;  %473 = vst.msk [vmem:[#allocation5 + $0x138] sm:$0xff] %vm433_vm2, %v6417_v4 }
  0x6e   : > { %474 = vst.msk [vmem:[#allocation5 + $0x140] sm:$0xff] %vm433_vm2, %v6417_v4  ;;  %475 = vst.msk [vmem:[#allocation5 + $0x148] sm:$0xff] %vm433_vm2, %v6417_v4 }
  0x6f   : > { %476 = vst.msk [vmem:[#allocation5 + $0x150] sm:$0xff] %vm433_vm2, %v6417_v4  ;;  %477 = vst.msk [vmem:[#allocation5 + $0x158] sm:$0xff] %vm433_vm2, %v6417_v4 }
  0x70   : > { %478 = vst.msk [vmem:[#allocation5 + $0x160] sm:$0xff] %vm433_vm2, %v6417_v4  ;;  %479 = vst.msk [vmem:[#allocation5 + $0x168] sm:$0xff] %vm433_vm2, %v6417_v4 }
  0x71   : > { %480 = vst.msk [vmem:[#allocation5 + $0x170] sm:$0xff] %vm433_vm2, %v6417_v4  ;;  %481 = vst.msk [vmem:[#allocation5 + $0x178] sm:$0xff] %vm433_vm2, %v6417_v4 }
  0x72   : > { %482 = vst.msk [vmem:[#allocation5 + $0x180] sm:$0xff] %vm433_vm2, %v6417_v4  ;;  %483 = vst.msk [vmem:[#allocation5 + $0x188] sm:$0xff] %vm433_vm2, %v6417_v4 }
  0x73   : > { %484 = vst.msk [vmem:[#allocation5 + $0x190] sm:$0xff] %vm433_vm2, %v6417_v4  ;;  %485 = vst.msk [vmem:[#allocation5 + $0x198] sm:$0xff] %vm433_vm2, %v6417_v4 }
  0x74   : > { %486 = vst.msk [vmem:[#allocation5 + $0x1a0] sm:$0xff] %vm433_vm2, %v6417_v4  ;;  %487 = vst.msk [vmem:[#allocation5 + $0x1a8] sm:$0xff] %vm433_vm2, %v6417_v4 }
  0x75   : > { %488 = vst.msk [vmem:[#allocation5 + $0x1b0] sm:$0xff] %vm433_vm2, %v6417_v4  ;;  %489 = vst.msk [vmem:[#allocation5 + $0x1b8] sm:$0xff] %vm433_vm2, %v6417_v4 }
  0x76   : > { %490 = vst.msk [vmem:[#allocation5 + $0x1c0] sm:$0xff] %vm433_vm2, %v6417_v4  ;;  %491 = vst.msk [vmem:[#allocation5 + $0x1c8] sm:$0xff] %vm433_vm2, %v6417_v4 }
  0x77   : > { %492 = vst.msk [vmem:[#allocation5 + $0x1d0] sm:$0xff] %vm433_vm2, %v6417_v4  ;;  %493 = vst.msk [vmem:[#allocation5 + $0x1d8] sm:$0xff] %vm433_vm2, %v6417_v4 }
  0x78   : > { %494 = vst.msk [vmem:[#allocation5 + $0x1e0] sm:$0xff] %vm433_vm2, %v6417_v4  ;;  %495 = vst.msk [vmem:[#allocation5 + $0x1e8] sm:$0xff] %vm433_vm2, %v6417_v4 }
  0x79   : > { %496 = vst.msk [vmem:[#allocation5 + $0x1f0] sm:$0xff] %vm433_vm2, %v6417_v4  ;;  %497 = vst.msk [vmem:[#allocation5 + $0x1f8] sm:$0xff] %vm433_vm2, %v6417_v4 }
 0x115   : > { %v5541_v31 = vpop.f32.mrb[0].mxu0 }
 0x116   : > { %v5549_v32 = vpop.f32.mrb[0].mxu1  ;;  %v662_v33 = vpop.f32.mrb[1].mxu0 }
 0x117   : > { %v694_v34 = vpop.f32.mrb[1].mxu1  ;;  %v5542_v35 = vpop.f32.mrb[2].mxu0 }
 0x118   : > { %v5550_v36 = vpop.f32.mrb[2].mxu1  ;;  %v726_v37 = vpack.c.bf16 %v5542_v35, %v5541_v31  ;;  %v665_v39 = vpop.f32.mrb[3].mxu0 }
 0x119   : > { %v730_v38 = vpack.c.bf16 %v5550_v36, %v5549_v32  ;;  %v697_v40 = vpop.f32.mrb[3].mxu1  ;;  %v725_v41 = vpack.c.bf16 %v665_v39, %v662_v33 }
 0x11a   : > { %v729_v42 = vpack.c.bf16 %v697_v40, %v694_v34  ;;  %734 = vst.msk [vmem:[#allocation2 + $0x8] sm:$0xff] %vm433_vm2, %v726_v37  ;;  %751 = vrot.lane.b32.xlu0 %v726_v37, %s6418_s21 }
 0x11b   : > { %738 = vst.msk [vmem:[#allocation2 + $0x28] sm:$0xff] %vm433_vm2, %v730_v38  ;;  %759 = vrot.lane.b32.xlu1 %v730_v38, %s6418_s21  ;;  %733 = vst.msk [vmem:[#allocation2] sm:$0xff] %vm433_vm2, %v725_v41 }
 0x11c   : > { %737 = vst.msk [vmem:[#allocation2 + $0x20] sm:$0xff] %vm433_vm2, %v729_v42 }
 0x11d   : > { %v5545_v43 = vpop.f32.mrb[4].mxu0 }
 0x11e   : > { %v5553_v44 = vpop.f32.mrb[4].mxu1  ;;  %749 = vrot.lane.b32.xlu0 %v725_v41, %s6418_s21  ;;  %v678_v45 = vpop.f32.mrb[5].mxu0 }
 0x11f   : > { %784 = vrot.lane.b32.xlu1 %v726_v37, %s6419_s16  ;;  %v710_v46 = vpop.f32.mrb[5].mxu1  ;;  %v5546_v47 = vpop.f32.mrb[6].mxu0 }
 0x120   : > { %v5554_v48 = vpop.f32.mrb[6].mxu1  ;;  %v728_v49 = vpack.c.bf16 %v5546_v47, %v5545_v43  ;;  %v681_v50 = vpop.f32.mrb[7].mxu0 }
 0x121   : > { %v732_v51 = vpack.c.bf16 %v5554_v48, %v5553_v44  ;;  %v713_v52 = vpop.f32.mrb[7].mxu1  ;;  %v727_v53 = vpack.c.bf16 %v681_v50, %v678_v45 }
 0x122   : > { %v731_v54 = vpack.c.bf16 %v713_v52, %v710_v46  ;;  %757 = vrot.lane.b32.xlu0 %v729_v42, %s6418_s21  ;;  %736 = vst.msk [vmem:[#allocation2 + $0x18] sm:$0xff] %vm433_vm2, %v728_v49 }
 0x123   : > { %792 = vrot.lane.b32.xlu1 %v730_v38, %s6419_s16  ;;  %740 = vst.msk [vmem:[#allocation2 + $0x38] sm:$0xff] %vm433_vm2, %v732_v51  ;;  %735 = vst.msk [vmem:[#allocation2 + $0x10] sm:$0xff] %vm433_vm2, %v727_v53 }
 0x124   : > { %739 = vst.msk [vmem:[#allocation2 + $0x30] sm:$0xff] %vm433_vm2, %v731_v54 }
 0x126   : > { %782 = vrot.lane.b32.xlu0 %v725_v41, %s6419_s16 }
 0x127   : > { %817 = vrot.lane.b32.xlu1 %v726_v37, %s6420_s20 }
 0x12a   : > { %790 = vrot.lane.b32.xlu0 %v729_v42, %s6419_s16 }
 0x12b   : > { %825 = vrot.lane.b32.xlu1 %v730_v38, %s6420_s20 }
 0x12e   : > { %815 = vrot.lane.b32.xlu0 %v725_v41, %s6420_s20 }
 0x12f   : > { %755 = vrot.lane.b32.xlu1 %v728_v49, %s6418_s21 }
 0x132   : > { %823 = vrot.lane.b32.xlu0 %v729_v42, %s6420_s20 }
 0x133   : > { %763 = vrot.lane.b32.xlu1 %v732_v51, %s6418_s21 }
 0x136   : > { %761 = vrot.lane.b32.xlu0 %v731_v54, %s6418_s21 }
 0x137   : > { %788 = vrot.lane.b32.xlu1 %v728_v49, %s6419_s16 }
 0x13a   : > { %786 = vrot.lane.b32.xlu0 %v727_v53, %s6419_s16 }
 0x13b   : > { %796 = vrot.lane.b32.xlu1 %v732_v51, %s6419_s16 }
 0x13e   : > { %794 = vrot.lane.b32.xlu0 %v731_v54, %s6419_s16 }
 0x13f   : > { %821 = vrot.lane.b32.xlu1 %v728_v49, %s6420_s20 }
 0x142   : > { %819 = vrot.lane.b32.xlu0 %v727_v53, %s6420_s20 }
 0x143   : > { %753 = vrot.lane.b32.xlu1 %v727_v53, %s6418_s21 }
 0x146   : > { %827 = vrot.lane.b32.xlu0 %v731_v54, %s6420_s20 }
 0x147   : > { %829 = vrot.lane.b32.xlu1 %v732_v51, %s6420_s20 }
 0x18c   : > { %v752_v56 = vpop.permute.xlu0 %751 }
 0x18d   : > { %v760_v55 = vpop.permute.xlu1 %759  ;;  %775 = vst.msk [vmem:[#allocation2 + $0x48] sm:$0xff] %vm433_vm2, %v752_v56 }
 0x18e   : > { %779 = vst.msk [vmem:[#allocation2 + $0x68] sm:$0xff] %vm433_vm2, %v760_v55 }
 0x190   : > { %v750_v58 = vpop.permute.xlu0 %749 }
 0x191   : > { %v785_v57 = vpop.permute.xlu1 %784  ;;  %774 = vst.msk [vmem:[#allocation2 + $0x40] sm:$0xff] %vm433_vm2, %v750_v58 }
 0x192   : > { %808 = vst.msk [vmem:[#allocation2 + $0x88] sm:$0xff] %vm433_vm2, %v785_v57 }
 0x194   : > { %v758_v60 = vpop.permute.xlu0 %757 }
 0x195   : > { %v793_v59 = vpop.permute.xlu1 %792  ;;  %778 = vst.msk [vmem:[#allocation2 + $0x60] sm:$0xff] %vm433_vm2, %v758_v60 }
 0x196   : > { %812 = vst.msk [vmem:[#allocation2 + $0xa8] sm:$0xff] %vm433_vm2, %v793_v59 }
 0x198   : > { %v783_v62 = vpop.permute.xlu0 %782 }
 0x199   : > { %v818_v61 = vpop.permute.xlu1 %817  ;;  %807 = vst.msk [vmem:[#allocation2 + $0x80] sm:$0xff] %vm433_vm2, %v783_v62 }
 0x19a   : > { %841 = vst.msk [vmem:[#allocation2 + $0xc8] sm:$0xff] %vm433_vm2, %v818_v61 }
 0x19c   : > { %v791_v0 = vpop.permute.xlu0 %790 }
 0x19d   : > { %v826_v63 = vpop.permute.xlu1 %825  ;;  %811 = vst.msk [vmem:[#allocation2 + $0xa0] sm:$0xff] %vm433_vm2, %v791_v0 }
 0x19e   : > { %845 = vst.msk [vmem:[#allocation2 + $0xe8] sm:$0xff] %vm433_vm2, %v826_v63 }
 0x1a0   : > { %v816_v1 = vpop.permute.xlu0 %815 }
 0x1a1   : > { %v756_v2 = vpop.permute.xlu1 %755  ;;  %840 = vst.msk [vmem:[#allocation2 + $0xc0] sm:$0xff] %vm433_vm2, %v816_v1 }
 0x1a2   : > { %777 = vst.msk [vmem:[#allocation2 + $0x58] sm:$0xff] %vm433_vm2, %v756_v2 }
 0x1a4   : > { %v824_v3 = vpop.permute.xlu0 %823 }
 0x1a5   : > { %v764_v4 = vpop.permute.xlu1 %763  ;;  %844 = vst.msk [vmem:[#allocation2 + $0xe0] sm:$0xff] %vm433_vm2, %v824_v3 }
 0x1a6   : > { %781 = vst.msk [vmem:[#allocation2 + $0x78] sm:$0xff] %vm433_vm2, %v764_v4 }
 0x1a8   : > { %v762_v5 = vpop.permute.xlu0 %761 }
 0x1a9   : > { %v789_v6 = vpop.permute.xlu1 %788  ;;  %780 = vst.msk [vmem:[#allocation2 + $0x70] sm:$0xff] %vm433_vm2, %v762_v5 }
 0x1aa   : > { %810 = vst.msk [vmem:[#allocation2 + $0x98] sm:$0xff] %vm433_vm2, %v789_v6 }
 0x1ac   : > { %v787_v8 = vpop.permute.xlu0 %786 }
 0x1ad   : > { %v797_v7 = vpop.permute.xlu1 %796  ;;  %809 = vst.msk [vmem:[#allocation2 + $0x90] sm:$0xff] %vm433_vm2, %v787_v8 }
 0x1ae   : > { %814 = vst.msk [vmem:[#allocation2 + $0xb8] sm:$0xff] %vm433_vm2, %v797_v7 }
 0x1b0   : > { %v795_v10 = vpop.permute.xlu0 %794 }
 0x1b1   : > { %v822_v9 = vpop.permute.xlu1 %821  ;;  %813 = vst.msk [vmem:[#allocation2 + $0xb0] sm:$0xff] %vm433_vm2, %v795_v10 }
 0x1b2   : > { %843 = vst.msk [vmem:[#allocation2 + $0xd8] sm:$0xff] %vm433_vm2, %v822_v9 }
 0x1b4   : > { %v820_v11 = vpop.permute.xlu0 %819 }
 0x1b5   : > { %v754_v12 = vpop.permute.xlu1 %753  ;;  %842 = vst.msk [vmem:[#allocation2 + $0xd0] sm:$0xff] %vm433_vm2, %v820_v11 }
 0x1b6   : > { %776 = vst.msk [vmem:[#allocation2 + $0x50] sm:$0xff] %vm433_vm2, %v754_v12 }
 0x1b8   : > { %v828_v13 = vpop.permute.xlu0 %827 }
 0x1b9   : > { %v830_v14 = vpop.permute.xlu1 %829  ;;  %846 = vst.msk [vmem:[#allocation2 + $0xf0] sm:$0xff] %vm433_vm2, %v828_v13 }
 0x1ba   : > { %847 = vst.msk [vmem:[#allocation2 + $0xf8] sm:$0xff] %vm433_vm2, %v830_v14 }
 0x1bb PF: > { %v6045_v15 = vld [vmem:[%s8259_s4] sm:$0xff]   ;;  %v6046_v16 = vld [vmem:[%s8259_s4 + $0x8] sm:$0xff]   ;;  %vm8272_vm3 = vcmask 261120   ;;  %v850_v20 = vld [vmem:[%s6593_s27 + $0x10] sm:$0xff]  ;;  %vm8273_vm4 = vcmask 64512   ;;  %s6422_s2 = smov 104  }
 0x1bc   : > { %5555 = vmatprep.subr.bf16.mxu0 %v6045_v15  ;;  %v848_v17 = vld [vmem:[%s6593_s27] sm:$0xff]  ;;  %v849_v18 = vld [vmem:[%s6593_s27 + $0x8] sm:$0xff]  ;;  %v851_v21 = vld [vmem:[%s6593_s27 + $0x18] sm:$0xff]  ;;  %s6423_s12 = smov 112   ;;  %s6424_s13 = smov 88  }
 0x1bd   : > { %5556 = vmatpush3.bf16.msra.mxu0 %v6045_v15  ;;  %v864_v19 = vpack.c.bf16 %v849_v18, %v848_v17  ;;  %v852_v22 = vld [vmem:[%s6593_s27 + $0x20] sm:$0xff]  ;;  %v853_v23 = vld [vmem:[%s6593_s27 + $0x28] sm:$0xff]  ;;  %v865_v24 = vpack.c.bf16 %v851_v21, %v850_v20  ;;  %v854_v26 = vld [vmem:[%s6593_s27 + $0x30] sm:$0xff]  ;;  %s6425_s18 = smov 96   ;;  %s6426_s21 = smov 72  }
 0x1be   : > { %5557 = vmatprep.subr.bf16.mxu0 %v6046_v16  ;;  %v866_v25 = vpack.c.bf16 %v853_v23, %v852_v22  ;;  %v855_v27 = vld [vmem:[%s6593_s27 + $0x38] sm:$0xff]  ;;  %v856_v28 = vld [vmem:[%s6593_s27 + $0x40] sm:$0xff]  ;;  %v857_v29 = vld [vmem:[%s6593_s27 + $0x48] sm:$0xff]  ;;  %s6427_s16 = smov 80   ;;  %p5312_p6 = scmp.ne.s32.totalorder %s6399_s10, 1 }
 0x1bf   : > { %5559 = vmatprep.mubr.msk.bf16.mxu0 %vm8272_vm3, %v864_v19  ;;  %v867_v30 = vpack.c.bf16 %v855_v27, %v854_v26  ;;  %v868_v31 = vpack.c.bf16 %v857_v29, %v856_v28  ;;  %v858_v32 = vld [vmem:[%s6593_s27 + $0x50] sm:$0xff]  ;;  %v859_v33 = vld [vmem:[%s6593_s27 + $0x58] sm:$0xff]  ;;  %v860_v34 = vld [vmem:[%s6593_s27 + $0x60] sm:$0xff] }
 0x1c0   : > { %v861_v35 = vld [vmem:[%s6593_s27 + $0x68] sm:$0xff]  ;;  %v869_v36 = vpack.c.bf16 %v859_v33, %v858_v32  ;;  %v862_v38 = vld [vmem:[%s6593_s27 + $0x70] sm:$0xff]  ;;  %v863_v39 = vld [vmem:[%s6593_s27 + $0x78] sm:$0xff]  ;;  %s6421_s27 = smov 120  }
 0x1c1   : > { %5558 = vmatpush3.bf16.msra.mxu0 %v6046_v16  ;;  %v870_v37 = vpack.c.bf16 %v861_v35, %v860_v34  ;;  %v871_v40 = vpack.c.bf16 %v863_v39, %v862_v38  ;;  %v1265_v41 = vld [vmem:[#allocation2] sm:$0xff]  ;;  %v1266_v19 = vld [vmem:[#allocation2 + $0x8] sm:$0xff]  ;;  %v1267_v20 = vld [vmem:[#allocation2 + $0x10] sm:$0xff] }
 0x1c2   : > { %5591 = vmatprep.mubr.msk.bf16.mxu1 %vm8273_vm4, %v1265_v41  ;;  %v1273_v17 = vld [vmem:[#allocation2 + $0x40] sm:$0xff]  ;;  %v1268_v21 = vld [vmem:[#allocation2 + $0x18] sm:$0xff]  ;;  %v1270_v23 = vld [vmem:[#allocation2 + $0x28] sm:$0xff] }
 0x1c3   : > { %v1269_v22 = vld [vmem:[#allocation2 + $0x20] sm:$0xff] }
 0x1c4   : > { %5560 = vmatmul.mubr.msk.bf16.vlgmr.msra.gmra.mrb[0].mxu0 %vm8272_vm3, %v865_v24  ;;  %v1271_v24 = vld [vmem:[#allocation2 + $0x30] sm:$0xff]  ;;  %v1281_v26 = vld [vmem:[#allocation2 + $0x80] sm:$0xff] }
 0x1c5   : > { %5563 = vmatprep.mubr.msk.bf16.mxu0 %vm8272_vm3, %v866_v25  ;;  %v1272_v25 = vld [vmem:[#allocation2 + $0x38] sm:$0xff] }
 0x1cc   : > { %5564 = vmatmul.mubr.msk.bf16.gmra.mrb[4].mxu0 %vm8272_vm3, %v867_v30 }
 0x1cd   : > { %5567 = vmatprep.mubr.msk.bf16.mxu0 %vm8272_vm3, %v868_v31 }
 0x1d4   : > { %5568 = vmatmul.mubr.msk.bf16.gmra.mrb[8].mxu0 %vm8272_vm3, %v869_v36 }
 0x1d5   : > { %5571 = vmatprep.mubr.msk.bf16.mxu0 %vm8272_vm3, %v870_v37 }
 0x1dc   : > { %5572 = vmatmul.mubr.msk.bf16.gmra.mrb[12].mxu0 %vm8272_vm3, %v871_v40 }
 0x1dd   : > { %5623 = vmatprep.mubr.msk.bf16.mxu0 %vm8273_vm4, %v1273_v17 }
 0x297   : > { %v5561_v42 = vpop.f32.mrb[0].mxu0 }
 0x298   : > { %v947_v43 = vpop.f32.mrb[1].mxu0 }
 0x299   : > { %v5562_v44 = vpop.f32.mrb[2].mxu0 }
 0x29a   : > { %v6969_v45 = vpack.c.bf16 %v5562_v44, %v5561_v42  ;;  %v950_v46 = vpop.f32.mrb[3].mxu0 }
 0x29b   : > { %v6971_v47 = vpack.c.bf16 %v950_v46, %v947_v43 }
 0x29c   : > { %1020 = vst.msk [vmem:[#allocation3 + $0x8] sm:$0xff] %vm8273_vm4, %v6969_v45 }
 0x29d   : > { %1019 = vst.msk [vmem:[#allocation3] sm:$0xff] %vm8273_vm4, %v6971_v47  ;;  %1067 = vrot.lane.b32.xlu0 %v6971_v47, %s6421_s27 }
 0x29f   : > { %v5565_v48 = vpop.f32.mrb[4].mxu0 }
 0x2a0   : > { %v963_v49 = vpop.f32.mrb[5].mxu0 }
 0x2a1   : > { %1069 = vrot.lane.b32.xlu0 %v6969_v45, %s6421_s27  ;;  %v5566_v50 = vpop.f32.mrb[6].mxu0 }
 0x2a2   : > { %v6981_v51 = vpack.c.bf16 %v5566_v50, %v5565_v48  ;;  %v966_v52 = vpop.f32.mrb[7].mxu0 }
 0x2a3   : > { %v6983_v53 = vpack.c.bf16 %v966_v52, %v963_v49  ;;  %v1298_v56 = vld [vmem:[#allocation3 + $0x8] sm:$0xff] }
 0x2a4   : > { %1022 = vst.msk [vmem:[#allocation3 + $0x18] sm:$0xff] %vm8273_vm4, %v6981_v51  ;;  %v1297_v54 = vld [vmem:[#allocation3] sm:$0xff]  ;;  %v1357_v0 = vsel %vm8273_vm4, %v1298_v56, 0 }
 0x2a5   : > { %1021 = vst.msk [vmem:[#allocation3 + $0x10] sm:$0xff] %vm8273_vm4, %v6983_v53  ;;  %5907 = vmatprep.subr.msk.bf16.mxu1 %vm8273_vm4, %v1297_v54  ;;  %v1354_v55 = vsel %vm8273_vm4, %v1297_v54, 0  ;;  %1071 = vrot.lane.b32.xlu1 %v6983_v53, %s6421_s27 }
 0x2a6   : > { %5576 = vmatpush3.bf16.xpose.msra.mxu1 %v1354_v55 }
 0x2a7   : > { %5908 = vmatprep.subr.msk.bf16.mxu1 %vm8273_vm4, %v1298_v56  ;;  %v5569_v57 = vpop.f32.mrb[8].mxu0 }
 0x2a8   : > { %v979_v58 = vpop.f32.mrb[9].mxu0 }
 0x2a9   : > { %1073 = vrot.lane.b32.xlu1 %v6981_v51, %s6421_s27  ;;  %v5570_v59 = vpop.f32.mrb[10].mxu0 }
 0x2aa   : > { %v6996_v60 = vpack.c.bf16 %v5570_v59, %v5569_v57  ;;  %v982_v61 = vpop.f32.mrb[11].mxu0 }
 0x2ab   : > { %v6998_v62 = vpack.c.bf16 %v982_v61, %v979_v58  ;;  %v1300_v8 = vld [vmem:[#allocation3 + $0x18] sm:$0xff] }
 0x2ac   : > { %1024 = vst.msk [vmem:[#allocation3 + $0x28] sm:$0xff] %vm8273_vm4, %v6996_v60  ;;  %v1299_v63 = vld [vmem:[#allocation3 + $0x10] sm:$0xff]  ;;  %v1363_v10 = vsel %vm8273_vm4, %v1300_v8, 0 }
 0x2ad   : > { %1023 = vst.msk [vmem:[#allocation3 + $0x20] sm:$0xff] %vm8273_vm4, %v6998_v62  ;;  %1077 = vrot.lane.b32.xlu1 %v6996_v60, %s6421_s27  ;;  %1075 = vrot.lane.b32.xlu0 %v6998_v62, %s6421_s27  ;;  %v1360_v7 = vsel %vm8273_vm4, %v1299_v63, 0 }
 0x2ae   : > { %5578 = vmatpush3.bf16.xpose.msra.mxu1 %v1357_v0 }
 0x2af   : > { %v5573_v1 = vpop.f32.mrb[12].mxu0  ;;  %5909 = vmatprep.subr.msk.bf16.mxu1 %vm8273_vm4, %v1299_v63 }
 0x2b0   : > { %v995_v2 = vpop.f32.mrb[13].mxu0 }
 0x2b1   : > { %v5574_v3 = vpop.f32.mrb[14].mxu0 }
 0x2b2   : > { %v7010_v4 = vpack.c.bf16 %v5574_v3, %v5573_v1  ;;  %v998_v5 = vpop.f32.mrb[15].mxu0 }
 0x2b3   : > { %v7012_v6 = vpack.c.bf16 %v998_v5, %v995_v2  ;;  %v1302_v12 = vld [vmem:[#allocation3 + $0x28] sm:$0xff] }
 0x2b4   : > { %1026 = vst.msk [vmem:[#allocation3 + $0x38] sm:$0xff] %vm8273_vm4, %v7010_v4  ;;  %1081 = vrot.lane.b32.xlu1 %v7010_v4, %s6421_s27  ;;  %v1301_v9 = vld [vmem:[#allocation3 + $0x20] sm:$0xff]  ;;  %v1369_v14 = vsel %vm8273_vm4, %v1302_v12, 0 }
 0x2b5   : > { %1025 = vst.msk [vmem:[#allocation3 + $0x30] sm:$0xff] %vm8273_vm4, %v7012_v6  ;;  %1079 = vrot.lane.b32.xlu0 %v7012_v6, %s6421_s27  ;;  %v1366_v11 = vsel %vm8273_vm4, %v1301_v9, 0 }
 0x2b6   : > { %5580 = vmatpush3.bf16.xpose.msra.mxu1 %v1360_v7 }
 0x2b7   : > { %5910 = vmatprep.subr.msk.bf16.mxu1 %vm8273_vm4, %v1300_v8 }
 0x2b8   : > { %1199 = vrot.lane.b32.xlu1 %v6971_v47, %s6422_s2 }
 0x2b9   : > { %1133 = vrot.lane.b32.xlu0 %v6971_v47, %s6423_s12 }
 0x2bb   : > { %v1304_v16 = vld [vmem:[#allocation3 + $0x38] sm:$0xff] }
 0x2bc   : > { %1201 = vrot.lane.b32.xlu1 %v6969_v45, %s6422_s2  ;;  %v1303_v13 = vld [vmem:[#allocation3 + $0x30] sm:$0xff]  ;;  %v1375_v18 = vsel %vm8273_vm4, %v1304_v16, 0 }
 0x2bd   : > { %1135 = vrot.lane.b32.xlu0 %v6969_v45, %s6423_s12  ;;  %v1372_v15 = vsel %vm8273_vm4, %v1303_v13, 0 }
 0x2be   : > { %5582 = vmatpush3.bf16.xpose.msra.mxu1 %v1363_v10 }
 0x2bf   : > { %5911 = vmatprep.subr.msk.bf16.mxu1 %vm8273_vm4, %v1301_v9 }
 0x2c0   : > { %1203 = vrot.lane.b32.xlu1 %v6983_v53, %s6422_s2 }
 0x2c1   : > { %1137 = vrot.lane.b32.xlu0 %v6983_v53, %s6423_s12 }
 0x2c4   : > { %1205 = vrot.lane.b32.xlu1 %v6981_v51, %s6422_s2 }
 0x2c5   : > { %1139 = vrot.lane.b32.xlu0 %v6981_v51, %s6423_s12 }
 0x2c6   : > { %5584 = vmatpush3.bf16.xpose.msra.mxu1 %v1366_v11 }
 0x2c7   : > { %5912 = vmatprep.subr.msk.bf16.mxu1 %vm8273_vm4, %v1302_v12 }
 0x2c8   : > { %1207 = vrot.lane.b32.xlu1 %v6998_v62, %s6422_s2 }
 0x2c9   : > { %1141 = vrot.lane.b32.xlu0 %v6998_v62, %s6423_s12 }
 0x2cc   : > { %1209 = vrot.lane.b32.xlu1 %v6996_v60, %s6422_s2 }
 0x2cd   : > { %1143 = vrot.lane.b32.xlu0 %v6996_v60, %s6423_s12 }
 0x2ce   : > { %5586 = vmatpush3.bf16.xpose.msra.mxu1 %v1369_v14 }
 0x2cf   : > { %5913 = vmatprep.subr.msk.bf16.mxu1 %vm8273_vm4, %v1303_v13 }
 0x2d0   : > { %1211 = vrot.lane.b32.xlu1 %v7012_v6, %s6422_s2 }
 0x2d1   : > { %1145 = vrot.lane.b32.xlu0 %v7012_v6, %s6423_s12 }
 0x2d4   : > { %1213 = vrot.lane.b32.xlu1 %v7010_v4, %s6422_s2 }
 0x2d5   : > { %1147 = vrot.lane.b32.xlu0 %v7010_v4, %s6423_s12 }
 0x2d6   : > { %5588 = vmatpush3.bf16.xpose.msra.mxu1 %v1372_v15 }
 0x2d7   : > { %5914 = vmatprep.subr.msk.bf16.mxu1 %vm8273_vm4, %v1304_v16 }
 0x2d8   : > { %1100 = vrot.lane.b32.xlu1 %v6971_v47, %s6424_s13 }
 0x2d9   : > { %1035 = vrot.lane.b32.xlu0 %v6971_v47, %s6425_s18 }
 0x2dc   : > { %1102 = vrot.lane.b32.xlu1 %v6969_v45, %s6424_s13 }
 0x2dd   : > { %1037 = vrot.lane.b32.xlu0 %v6969_v45, %s6425_s18 }
 0x2de   : > { %5590 = vmatpush3.bf16.xpose.msra.mxu1 %v1375_v18 }
 0x2e0   : > { %1104 = vrot.lane.b32.xlu1 %v6983_v53, %s6424_s13 }
 0x2e1   : > { %1039 = vrot.lane.b32.xlu0 %v6983_v53, %s6425_s18 }
 0x2e4   : > { %1106 = vrot.lane.b32.xlu1 %v6981_v51, %s6424_s13 }
 0x2e5   : > { %1041 = vrot.lane.b32.xlu0 %v6981_v51, %s6425_s18  ;;  %5592 = vmatmul.mubr.msk.bf16.vlgmr.msra.gmra.mrb[0].mxu1 %vm8273_vm4, %v1266_v19 }
 0x2e6   : > { %5595 = vmatprep.mubr.msk.bf16.mxu1 %vm8273_vm4, %v1267_v20 }
 0x2e8   : > { %1108 = vrot.lane.b32.xlu1 %v6998_v62, %s6424_s13 }
 0x2e9   : > { %1043 = vrot.lane.b32.xlu0 %v6998_v62, %s6425_s18 }
 0x2ec   : > { %1110 = vrot.lane.b32.xlu1 %v6996_v60, %s6424_s13 }
 0x2ed   : > { %1045 = vrot.lane.b32.xlu0 %v6996_v60, %s6425_s18  ;;  %5596 = vmatmul.mubr.msk.bf16.gmra.mrb[4].mxu1 %vm8273_vm4, %v1268_v21  ;;  %v1274_v21 = vld [vmem:[#allocation2 + $0x48] sm:$0xff] }
 0x2ee   : > { %5599 = vmatprep.mubr.msk.bf16.mxu1 %vm8273_vm4, %v1269_v22 }
 0x2f0   : > { %1112 = vrot.lane.b32.xlu1 %v7012_v6, %s6424_s13 }
 0x2f1   : > { %1047 = vrot.lane.b32.xlu0 %v7012_v6, %s6425_s18 }
 0x2f4   : > { %1114 = vrot.lane.b32.xlu1 %v7010_v4, %s6424_s13 }
 0x2f5   : > { %1049 = vrot.lane.b32.xlu0 %v7010_v4, %s6425_s18  ;;  %5600 = vmatmul.mubr.msk.bf16.gmra.mrb[8].mxu1 %vm8273_vm4, %v1270_v23  ;;  %v1275_v23 = vld [vmem:[#allocation2 + $0x50] sm:$0xff] }
 0x2f6   : > { %5603 = vmatprep.mubr.msk.bf16.mxu1 %vm8273_vm4, %v1271_v24 }
 0x2f8   : > { %1232 = vrot.lane.b32.xlu1 %v6971_v47, %s6426_s21 }
 0x2f9   : > { %1166 = vrot.lane.b32.xlu0 %v6971_v47, %s6427_s16 }
 0x2fc   : > { %1234 = vrot.lane.b32.xlu1 %v6969_v45, %s6426_s21 }
 0x2fd   : > { %1168 = vrot.lane.b32.xlu0 %v6969_v45, %s6427_s16  ;;  %5604 = vmatmul.mubr.msk.bf16.gmra.mrb[12].mxu1 %vm8273_vm4, %v1272_v25 }
 0x2fe   : > { %5655 = vmatprep.mubr.msk.bf16.mxu1 %vm8273_vm4, %v1281_v26 }
 0x300   : > { %1236 = vrot.lane.b32.xlu1 %v6983_v53, %s6426_s21 }
 0x301   : > { %1170 = vrot.lane.b32.xlu0 %v6983_v53, %s6427_s16 }
 0x304   : > { %1238 = vrot.lane.b32.xlu1 %v6981_v51, %s6426_s21 }
 0x305   : > { %1172 = vrot.lane.b32.xlu0 %v6981_v51, %s6427_s16 }
 0x308   : > { %1240 = vrot.lane.b32.xlu1 %v6998_v62, %s6426_s21 }
 0x309   : > { %1174 = vrot.lane.b32.xlu0 %v6998_v62, %s6427_s16 }
 0x30c   : > { %1242 = vrot.lane.b32.xlu1 %v6996_v60, %s6426_s21 }
 0x30d   : > { %1176 = vrot.lane.b32.xlu0 %v6996_v60, %s6427_s16 }
 0x30f   : > { %v1068_v27 = vpop.permute.xlu0 %1067 }
 0x310   : > { %1092 = vst.msk [vmem:[#allocation3 + $0x40] sm:$0xff] %vm8273_vm4, %v1068_v27  ;;  %1244 = vrot.lane.b32.xlu1 %v7012_v6, %s6426_s21 }
 0x311   : > { %1178 = vrot.lane.b32.xlu0 %v7012_v6, %s6427_s16 }
 0x313   : > { %v1070_v28 = vpop.permute.xlu0 %1069 }
 0x314   : > { %1093 = vst.msk [vmem:[#allocation3 + $0x48] sm:$0xff] %vm8273_vm4, %v1070_v28  ;;  %1246 = vrot.lane.b32.xlu1 %v7010_v4, %s6426_s21 }
 0x315   : > { %1180 = vrot.lane.b32.xlu0 %v7010_v4, %s6427_s16 }
 0x317   : > { %v1305_v29 = vld [vmem:[#allocation3 + $0x40] sm:$0xff]  ;;  %v1072_v30 = vpop.permute.xlu1 %1071 }
 0x318   : > { %5915 = vmatprep.subr.msk.bf16.mxu0 %vm8273_vm4, %v1305_v29  ;;  %1094 = vst.msk [vmem:[#allocation3 + $0x50] sm:$0xff] %vm8273_vm4, %v1072_v30  ;;  %v1499_v31 = vsel %vm8273_vm4, %v1305_v29, 0 }
 0x319   : > { %5608 = vmatpush3.bf16.xpose.msra.mxu0 %v1499_v31  ;;  %v1276_v31 = vld [vmem:[#allocation2 + $0x58] sm:$0xff] }
 0x31b   : > { %v1306_v32 = vld [vmem:[#allocation3 + $0x48] sm:$0xff]  ;;  %v1074_v33 = vpop.permute.xlu1 %1073 }
 0x31c   : > { %5916 = vmatprep.subr.msk.bf16.mxu0 %vm8273_vm4, %v1306_v32  ;;  %1095 = vst.msk [vmem:[#allocation3 + $0x58] sm:$0xff] %vm8273_vm4, %v1074_v33  ;;  %v1502_v37 = vsel %vm8273_vm4, %v1306_v32, 0  ;;  %v1277_v33 = vld [vmem:[#allocation2 + $0x60] sm:$0xff] }
 0x31f   : > { %v1078_v34 = vpop.permute.xlu1 %1077  ;;  %v1076_v35 = vpop.permute.xlu0 %1075  ;;  %v1307_v36 = vld [vmem:[#allocation3 + $0x50] sm:$0xff] }
 0x320   : > { %1097 = vst.msk [vmem:[#allocation3 + $0x68] sm:$0xff] %vm8273_vm4, %v1078_v34  ;;  %1096 = vst.msk [vmem:[#allocation3 + $0x60] sm:$0xff] %vm8273_vm4, %v1076_v35  ;;  %v1505_v40 = vsel %vm8273_vm4, %v1307_v36, 0 }
 0x321   : > { %5610 = vmatpush3.bf16.xpose.msra.mxu0 %v1502_v37 }
 0x322   : > { %5917 = vmatprep.subr.msk.bf16.mxu0 %vm8273_vm4, %v1307_v36 }
 0x323   : > { %v1308_v41 = vld [vmem:[#allocation3 + $0x58] sm:$0xff] }
 0x324   : > { %v1508_v47 = vsel %vm8273_vm4, %v1308_v41, 0 }
 0x326   : > { %v1082_v38 = vpop.permute.xlu1 %1081 }
 0x327   : > { %1099 = vst.msk [vmem:[#allocation3 + $0x78] sm:$0xff] %vm8273_vm4, %v1082_v38  ;;  %v1080_v39 = vpop.permute.xlu0 %1079  ;;  %v1309_v46 = vld [vmem:[#allocation3 + $0x60] sm:$0xff]  ;;  %v1310_v56 = vld [vmem:[#allocation3 + $0x68] sm:$0xff] }
 0x328   : > { %1098 = vst.msk [vmem:[#allocation3 + $0x70] sm:$0xff] %vm8273_vm4, %v1080_v39  ;;  %v1511_v55 = vsel %vm8273_vm4, %v1309_v46, 0  ;;  %v1514_v0 = vsel %vm8273_vm4, %v1310_v56, 0 }
 0x329   : > { %5612 = vmatpush3.bf16.xpose.msra.mxu0 %v1505_v40 }
 0x32a   : > { %5918 = vmatprep.subr.msk.bf16.mxu0 %vm8273_vm4, %v1308_v41  ;;  %v1200_v42 = vpop.permute.xlu1 %1199  ;;  %v1278_v41 = vld [vmem:[#allocation2 + $0x68] sm:$0xff] }
 0x32b   : > { %1224 = vst.msk [vmem:[#allocation3 + $0xc0] sm:$0xff] %vm8273_vm4, %v1200_v42  ;;  %v1134_v43 = vpop.permute.xlu0 %1133 }
 0x32c   : > { %1158 = vst.msk [vmem:[#allocation3 + $0x80] sm:$0xff] %vm8273_vm4, %v1134_v43  ;;  %v1279_v43 = vld [vmem:[#allocation2 + $0x70] sm:$0xff] }
 0x32e   : > { %v1202_v44 = vpop.permute.xlu1 %1201  ;;  %v1312_v8 = vld [vmem:[#allocation3 + $0x78] sm:$0xff] }
 0x32f   : > { %1225 = vst.msk [vmem:[#allocation3 + $0xc8] sm:$0xff] %vm8273_vm4, %v1202_v44  ;;  %v1136_v45 = vpop.permute.xlu0 %1135  ;;  %v1311_v63 = vld [vmem:[#allocation3 + $0x70] sm:$0xff]  ;;  %v1520_v15 = vsel %vm8273_vm4, %v1312_v8, 0 }
 0x330   : > { %1159 = vst.msk [vmem:[#allocation3 + $0x88] sm:$0xff] %vm8273_vm4, %v1136_v45  ;;  %v1517_v7 = vsel %vm8273_vm4, %v1311_v63, 0 }
 0x331   : > { %5614 = vmatpush3.bf16.xpose.msra.mxu0 %v1508_v47 }
 0x332   : > { %v1204_v48 = vpop.permute.xlu1 %1203  ;;  %5919 = vmatprep.subr.msk.bf16.mxu0 %vm8273_vm4, %v1309_v46  ;;  %v1321_v16 = vld [vmem:[#allocation3 + $0xc0] sm:$0xff] }
 0x333   : > { %1226 = vst.msk [vmem:[#allocation3 + $0xd0] sm:$0xff] %vm8273_vm4, %v1204_v48  ;;  %v1138_v49 = vpop.permute.xlu0 %1137  ;;  %v1313_v50 = vld [vmem:[#allocation3 + $0x80] sm:$0xff]  ;;  %v1789_v25 = vsel %vm8273_vm4, %v1321_v16, 0 }
 0x334   : > { %1160 = vst.msk [vmem:[#allocation3 + $0x90] sm:$0xff] %vm8273_vm4, %v1138_v49  ;;  %5923 = vmatprep.subr.msk.bf16.mxu1 %vm8273_vm4, %v1313_v50  ;;  %v1644_v51 = vsel %vm8273_vm4, %v1313_v50, 0 }
 0x335   : > { %5640 = vmatpush3.bf16.xpose.msra.mxu1 %v1644_v51  ;;  %v1280_v51 = vld [vmem:[#allocation2 + $0x78] sm:$0xff] }
 0x336   : > { %v1206_v52 = vpop.permute.xlu1 %1205  ;;  %v1322_v26 = vld [vmem:[#allocation3 + $0xc8] sm:$0xff] }
 0x337   : > { %1227 = vst.msk [vmem:[#allocation3 + $0xd8] sm:$0xff] %vm8273_vm4, %v1206_v52  ;;  %v1140_v53 = vpop.permute.xlu0 %1139  ;;  %v1314_v54 = vld [vmem:[#allocation3 + $0x88] sm:$0xff]  ;;  %v1792_v35 = vsel %vm8273_vm4, %v1322_v26, 0 }
 0x338   : > { %1161 = vst.msk [vmem:[#allocation3 + $0x98] sm:$0xff] %vm8273_vm4, %v1140_v53  ;;  %5924 = vmatprep.subr.msk.bf16.mxu1 %vm8273_vm4, %v1314_v54  ;;  %v1647_v59 = vsel %vm8273_vm4, %v1314_v54, 0  ;;  %v1289_v53 = vld [vmem:[#allocation2 + $0xc0] sm:$0xff] }
 0x339   : > { %5616 = vmatpush3.bf16.xpose.msra.mxu0 %v1511_v55 }
 0x33a   : > { %5920 = vmatprep.subr.msk.bf16.mxu0 %vm8273_vm4, %v1310_v56  ;;  %v1208_v57 = vpop.permute.xlu1 %1207  ;;  %v1323_v36 = vld [vmem:[#allocation3 + $0xd0] sm:$0xff] }
 0x33b   : > { %1228 = vst.msk [vmem:[#allocation3 + $0xe0] sm:$0xff] %vm8273_vm4, %v1208_v57  ;;  %v1142_v58 = vpop.permute.xlu0 %1141  ;;  %v1315_v60 = vld [vmem:[#allocation3 + $0x90] sm:$0xff]  ;;  %v1795_v45 = vsel %vm8273_vm4, %v1323_v36, 0  ;;  %v1282_v57 = vld [vmem:[#allocation2 + $0x88] sm:$0xff] }
 0x33c   : > { %1162 = vst.msk [vmem:[#allocation3 + $0xa0] sm:$0xff] %vm8273_vm4, %v1142_v58  ;;  %v1650_v3 = vsel %vm8273_vm4, %v1315_v60, 0 }
 0x33d   : > { %5642 = vmatpush3.bf16.xpose.msra.mxu1 %v1647_v59  ;;  %v1283_v59 = vld [vmem:[#allocation2 + $0x90] sm:$0xff] }
 0x33e   : > { %v1210_v61 = vpop.permute.xlu1 %1209  ;;  %5925 = vmatprep.subr.msk.bf16.mxu1 %vm8273_vm4, %v1315_v60  ;;  %v1324_v46 = vld [vmem:[#allocation3 + $0xd8] sm:$0xff] }
 0x33f   : > { %1229 = vst.msk [vmem:[#allocation3 + $0xe8] sm:$0xff] %vm8273_vm4, %v1210_v61  ;;  %v1144_v62 = vpop.permute.xlu0 %1143  ;;  %v1316_v4 = vld [vmem:[#allocation3 + $0x98] sm:$0xff]  ;;  %v1798_v55 = vsel %vm8273_vm4, %v1324_v46, 0 }
 0x340   : > { %1163 = vst.msk [vmem:[#allocation3 + $0xa8] sm:$0xff] %vm8273_vm4, %v1144_v62  ;;  %v1653_v11 = vsel %vm8273_vm4, %v1316_v4, 0 }
 0x341   : > { %5618 = vmatpush3.bf16.xpose.msra.mxu0 %v1514_v0 }
 0x342   : > { %v1212_v1 = vpop.permute.xlu1 %1211  ;;  %5921 = vmatprep.subr.msk.bf16.mxu0 %vm8273_vm4, %v1311_v63  ;;  %v1325_v56 = vld [vmem:[#allocation3 + $0xe0] sm:$0xff] }
 0x343   : > { %1230 = vst.msk [vmem:[#allocation3 + $0xf0] sm:$0xff] %vm8273_vm4, %v1212_v1  ;;  %v1146_v2 = vpop.permute.xlu0 %1145  ;;  %v1317_v12 = vld [vmem:[#allocation3 + $0xa0] sm:$0xff]  ;;  %v1801_v0 = vsel %vm8273_vm4, %v1325_v56, 0 }
 0x344   : > { %1164 = vst.msk [vmem:[#allocation3 + $0xb0] sm:$0xff] %vm8273_vm4, %v1146_v2  ;;  %v1656_v19 = vsel %vm8273_vm4, %v1317_v12, 0 }
 0x345   : > { %5644 = vmatpush3.bf16.xpose.msra.mxu1 %v1650_v3  ;;  %v1284_v3 = vld [vmem:[#allocation2 + $0x98] sm:$0xff] }
 0x346   : > { %v1214_v5 = vpop.permute.xlu1 %1213  ;;  %5926 = vmatprep.subr.msk.bf16.mxu1 %vm8273_vm4, %v1316_v4  ;;  %v1326_v1 = vld [vmem:[#allocation3 + $0xe8] sm:$0xff] }
 0x347   : > { %1231 = vst.msk [vmem:[#allocation3 + $0xf8] sm:$0xff] %vm8273_vm4, %v1214_v5  ;;  %v1148_v6 = vpop.permute.xlu0 %1147  ;;  %v1318_v20 = vld [vmem:[#allocation3 + $0xa8] sm:$0xff]  ;;  %v1285_v5 = vld [vmem:[#allocation2 + $0xa0] sm:$0xff] }
 0x348   : > { %1165 = vst.msk [vmem:[#allocation3 + $0xb8] sm:$0xff] %vm8273_vm4, %v1148_v6  ;;  %v1659_v29 = vsel %vm8273_vm4, %v1318_v20, 0 }
 0x349   : > { %5620 = vmatpush3.bf16.xpose.msra.mxu0 %v1517_v7 }
 0x34a   : > { %v1101_v9 = vpop.permute.xlu1 %1100  ;;  %5922 = vmatprep.subr.msk.bf16.mxu0 %vm8273_vm4, %v1312_v8 }
 0x34b   : > { %1125 = vst.msk [vmem:[#allocation4 + $0x40] sm:$0xff] %vm8273_vm4, %v1101_v9  ;;  %v1036_v10 = vpop.permute.xlu0 %1035  ;;  %v1319_v30 = vld [vmem:[#allocation3 + $0xb0] sm:$0xff] }
 0x34c   : > { %1059 = vst.msk [vmem:[#allocation4] sm:$0xff] %vm8273_vm4, %v1036_v10  ;;  %v1662_v39 = vsel %vm8273_vm4, %v1319_v30, 0  ;;  %v1804_v10 = vsel %vm8273_vm4, %v1326_v1, 0 }
 0x34d   : > { %5646 = vmatpush3.bf16.xpose.msra.mxu1 %v1653_v11  ;;  %v1327_v11 = vld [vmem:[#allocation3 + $0xf0] sm:$0xff] }
 0x34e   : > { %v1103_v13 = vpop.permute.xlu1 %1102  ;;  %5927 = vmatprep.subr.msk.bf16.mxu1 %vm8273_vm4, %v1317_v12 }
 0x34f   : > { %1126 = vst.msk [vmem:[#allocation4 + $0x48] sm:$0xff] %vm8273_vm4, %v1103_v13  ;;  %v1038_v14 = vpop.permute.xlu0 %1037  ;;  %v1320_v40 = vld [vmem:[#allocation3 + $0xb8] sm:$0xff]  ;;  %v1286_v13 = vld [vmem:[#allocation2 + $0xa8] sm:$0xff] }
 0x350   : > { %1060 = vst.msk [vmem:[#allocation4 + $0x8] sm:$0xff] %vm8273_vm4, %v1038_v14  ;;  %v1665_v49 = vsel %vm8273_vm4, %v1320_v40, 0 }
 0x351   : > { %5622 = vmatpush3.bf16.xpose.msra.mxu0 %v1520_v15  ;;  %v1287_v15 = vld [vmem:[#allocation2 + $0xb0] sm:$0xff] }
 0x352   : > { %v1105_v17 = vpop.permute.xlu1 %1104  ;;  %5931 = vmatprep.subr.msk.bf16.mxu0 %vm8273_vm4, %v1321_v16 }
 0x353   : > { %1127 = vst.msk [vmem:[#allocation4 + $0x50] sm:$0xff] %vm8273_vm4, %v1105_v17  ;;  %v1040_v18 = vpop.permute.xlu0 %1039  ;;  %v2866_v50 = vld [vmem:[#allocation4] sm:$0xff] }
 0x354   : > { %1061 = vst.msk [vmem:[#allocation4 + $0x10] sm:$0xff] %vm8273_vm4, %v1040_v18 }
 0x355   : > { %5648 = vmatpush3.bf16.xpose.msra.mxu1 %v1656_v19 }
 0x356   : > { %v1107_v22 = vpop.permute.xlu1 %1106  ;;  %5928 = vmatprep.subr.msk.bf16.mxu1 %vm8273_vm4, %v1318_v20  ;;  %v1807_v20 = vsel %vm8273_vm4, %v1327_v11, 0 }
 0x357   : > { %1128 = vst.msk [vmem:[#allocation4 + $0x58] sm:$0xff] %vm8273_vm4, %v1107_v22  ;;  %v1042_v24 = vpop.permute.xlu0 %1041  ;;  %v2867_v61 = vld [vmem:[#allocation4 + $0x8] sm:$0xff] }
 0x358   : > { %1062 = vst.msk [vmem:[#allocation4 + $0x18] sm:$0xff] %vm8273_vm4, %v1042_v24  ;;  %5624 = vmatmul.mubr.msk.bf16.vlgmr.msra.gmra.mrb[16].mxu0 %vm8273_vm4, %v1274_v21  ;;  %v1328_v21 = vld [vmem:[#allocation3 + $0xf8] sm:$0xff] }
 0x359   : > { %5672 = vmatpush3.bf16.xpose.msra.mxu0 %v1789_v25  ;;  %5627 = vmatprep.mubr.msk.bf16.mxu0 %vm8273_vm4, %v1275_v23  ;;  %v1288_v23 = vld [vmem:[#allocation2 + $0xb8] sm:$0xff]  ;;  %v1810_v25 = vsel %vm8273_vm4, %v1328_v21, 0 }
 0x35a   : > { %v1109_v27 = vpop.permute.xlu1 %1108  ;;  %5932 = vmatprep.subr.msk.bf16.mxu0 %vm8273_vm4, %v1322_v26  ;;  %v2874_v26 = vld [vmem:[#allocation4 + $0x40] sm:$0xff] }
 0x35b   : > { %1129 = vst.msk [vmem:[#allocation4 + $0x60] sm:$0xff] %vm8273_vm4, %v1109_v27  ;;  %v1044_v28 = vpop.permute.xlu0 %1043  ;;  %v2868_v2 = vld [vmem:[#allocation4 + $0x10] sm:$0xff] }
 0x35c   : > { %1063 = vst.msk [vmem:[#allocation4 + $0x20] sm:$0xff] %vm8273_vm4, %v1044_v28  ;;  %v1290_v28 = vld [vmem:[#allocation2 + $0xc8] sm:$0xff] }
 0x35d   : > { %5650 = vmatpush3.bf16.xpose.msra.mxu1 %v1659_v29  ;;  %v1291_v29 = vld [vmem:[#allocation2 + $0xd0] sm:$0xff] }
 0x35e   : > { %v1111_v32 = vpop.permute.xlu1 %1110  ;;  %5929 = vmatprep.subr.msk.bf16.mxu1 %vm8273_vm4, %v1319_v30  ;;  %v2875_v30 = vld [vmem:[#allocation4 + $0x48] sm:$0xff] }
 0x35f   : > { %1130 = vst.msk [vmem:[#allocation4 + $0x68] sm:$0xff] %vm8273_vm4, %v1111_v32  ;;  %v1046_v34 = vpop.permute.xlu0 %1045  ;;  %v2869_v7 = vld [vmem:[#allocation4 + $0x18] sm:$0xff]  ;;  %v2876_v32 = vld [vmem:[#allocation4 + $0x50] sm:$0xff] }
 0x360   : > { %1064 = vst.msk [vmem:[#allocation4 + $0x28] sm:$0xff] %vm8273_vm4, %v1046_v34  ;;  %5628 = vmatmul.mubr.msk.bf16.gmra.mrb[20].mxu0 %vm8273_vm4, %v1276_v31  ;;  %v2229_v31 = vld [vmem:[%s6600_s9] sm:$0xff] }
 0x361   : > { %5674 = vmatpush3.bf16.xpose.msra.mxu0 %v1792_v35  ;;  %5631 = vmatprep.mubr.msk.bf16.mxu0 %vm8273_vm4, %v1277_v33  ;;  %v1292_v33 = vld [vmem:[#allocation2 + $0xd8] sm:$0xff]  ;;  %v1293_v34 = vld [vmem:[#allocation2 + $0xe0] sm:$0xff]  ;;  %vm2233_vm5 = vnez %v2229_v31 }
 0x362   : > { %v1113_v37 = vpop.permute.xlu1 %1112  ;;  %5933 = vmatprep.subr.msk.bf16.mxu0 %vm8273_vm4, %v1323_v36  ;;  %v2877_v35 = vld [vmem:[#allocation4 + $0x58] sm:$0xff]  ;;  %v6428_v36 = vmov 0  }
 0x363   : > { %1131 = vst.msk [vmem:[#allocation4 + $0x70] sm:$0xff] %vm8273_vm4, %v1113_v37  ;;  %v1048_v38 = vpop.permute.xlu0 %1047  ;;  %v2870_v12 = vld [vmem:[#allocation4 + $0x20] sm:$0xff]  ;;  %v2237_v37 = vsel %vm2233_vm5, 16843009, %v6428_v36 }
 0x364   : > { %1065 = vst.msk [vmem:[#allocation4 + $0x30] sm:$0xff] %vm8273_vm4, %v1048_v38  ;;  %v2230_v38 = vld [vmem:[%s6600_s9 + $0x8] sm:$0xff] }
 0x365   : > { %5652 = vmatpush3.bf16.xpose.msra.mxu1 %v1662_v39  ;;  %v2878_v39 = vld [vmem:[#allocation4 + $0x60] sm:$0xff]  ;;  %vm2234_vm6 = vnez %v2230_v38 }
 0x366   : > { %v1115_v42 = vpop.permute.xlu1 %1114  ;;  %5930 = vmatprep.subr.msk.bf16.mxu1 %vm8273_vm4, %v1320_v40  ;;  %v1294_v40 = vld [vmem:[#allocation2 + $0xe8] sm:$0xff] }
 0x367   : > { %1132 = vst.msk [vmem:[#allocation4 + $0x78] sm:$0xff] %vm8273_vm4, %v1115_v42  ;;  %v1050_v44 = vpop.permute.xlu0 %1049  ;;  %v2871_v17 = vld [vmem:[#allocation4 + $0x28] sm:$0xff]  ;;  %v1295_v42 = vld [vmem:[#allocation2 + $0xf0] sm:$0xff] }
 0x368   : > { %1066 = vst.msk [vmem:[#allocation4 + $0x38] sm:$0xff] %vm8273_vm4, %v1050_v44  ;;  %5632 = vmatmul.mubr.msk.bf16.gmra.mrb[24].mxu0 %vm8273_vm4, %v1278_v41  ;;  %v2241_v41 = vunpack.c.0.s8 %v2237_v37  ;;  %v2243_v44 = vunpack.c.2.s8 %v2237_v37 }
 0x369   : > { %5676 = vmatpush3.bf16.xpose.msra.mxu0 %v1795_v45  ;;  %5635 = vmatprep.mubr.msk.bf16.mxu0 %vm8273_vm4, %v1279_v43  ;;  %v2242_v43 = vunpack.c.1.s8 %v2237_v37  ;;  %v2879_v45 = vld [vmem:[#allocation4 + $0x68] sm:$0xff] }
 0x36a   : > { %v1233_v47 = vpop.permute.xlu1 %1232  ;;  %5934 = vmatprep.subr.msk.bf16.mxu0 %vm8273_vm4, %v1324_v46  ;;  %v2257_v46 = vpack.c.b16 %v2241_v41, %v2241_v41 }
 0x36b   : > { %1257 = vst.msk [vmem:[#allocation4 + $0xc0] sm:$0xff] %vm8273_vm4, %v1233_v47  ;;  %v1167_v48 = vpop.permute.xlu0 %1166  ;;  %v2872_v22 = vld [vmem:[#allocation4 + $0x30] sm:$0xff]  ;;  %v2244_v47 = vunpack.c.3.s8 %v2237_v37 }
 0x36c   : > { %1191 = vst.msk [vmem:[#allocation4 + $0x80] sm:$0xff] %vm8273_vm4, %v1167_v48  ;;  %v2238_v48 = vsel %vm2234_vm6, 16843009, %v6428_v36 }
 0x36d   : > { %5654 = vmatpush3.bf16.xpose.msra.mxu1 %v1665_v49  ;;  %v2259_v49 = vpack.c.b16 %v2242_v43, %v2242_v43 }
 0x36e   : > { %v1235_v52 = vpop.permute.xlu1 %1234  ;;  %5703 = vmatprep.subr.bf16.mxu1 %v2866_v50 }
 0x36f   : > { %1258 = vst.msk [vmem:[#allocation4 + $0xc8] sm:$0xff] %vm8273_vm4, %v1235_v52  ;;  %v1169_v54 = vpop.permute.xlu0 %1168  ;;  %v2873_v24 = vld [vmem:[#allocation4 + $0x38] sm:$0xff]  ;;  %v2231_v52 = vld [vmem:[%s6600_s9 + $0x10] sm:$0xff] }
 0x370   : > { %1192 = vst.msk [vmem:[#allocation4 + $0x88] sm:$0xff] %vm8273_vm4, %v1169_v54  ;;  %5636 = vmatmul.mubr.msk.bf16.gmra.mrb[28].mxu0 %vm8273_vm4, %v1280_v51  ;;  %v2247_v51 = vunpack.c.2.s8 %v2238_v48  ;;  %v1296_v54 = vld [vmem:[#allocation2 + $0xf8] sm:$0xff]  ;;  %vm2235_vm7 = vnez %v2231_v52  ;;  %v8321_v52 = vmov 0 }
 0x371   : > { %5678 = vmatpush3.bf16.xpose.msra.mxu0 %v1798_v55  ;;  %5687 = vmatprep.mubr.msk.bf16.mxu0 %vm8273_vm4, %v1289_v53  ;;  %v2880_v53 = vld [vmem:[#allocation4 + $0x70] sm:$0xff]  ;;  %v2258_v55 = vpack.c.b8 %v2257_v46, %v2257_v46 }
 0x372   : > { %v1237_v58 = vpop.permute.xlu1 %1236  ;;  %5935 = vmatprep.subr.msk.bf16.mxu0 %vm8273_vm4, %v1325_v56  ;;  %v2263_v56 = vpack.c.b16 %v2244_v47, %v2244_v47 }
 0x373   : > { %1259 = vst.msk [vmem:[#allocation4 + $0xd0] sm:$0xff] %vm8273_vm4, %v1237_v58  ;;  %v1171_v60 = vpop.permute.xlu0 %1170  ;;  %v7209_v27 = vld [vmem:[#allocation4 + $0x80] sm:$0xff]  ;;  %v2260_v58 = vpack.c.b8 %v2259_v49, %v2259_v49  ;;  %vm2289_vm8 = vnez %v2258_v55 }
 0x374   : > { %1193 = vst.msk [vmem:[#allocation4 + $0x90] sm:$0xff] %vm8273_vm4, %v1171_v60  ;;  %5656 = vmatmul.mubr.msk.bf16.vlgmr.msra.gmra.mrb[16].mxu1 %vm8273_vm4, %v1282_v57  ;;  %v2248_v57 = vunpack.c.3.s8 %v2238_v48  ;;  %v2269_v60 = vpack.c.b16 %v2247_v51, %v2247_v51  ;;  %v8319_v51 = vmov 0 }
 0x375   : > { %5704 = vmatpush3.bf16.msra.mxu1 %v2866_v50  ;;  %5659 = vmatprep.mubr.msk.bf16.mxu1 %vm8273_vm4, %v1283_v59  ;;  %v2261_v50 = vpack.c.b16 %v2243_v44, %v2243_v44  ;;  %vm2290_vm9 = vnez %v2260_v58  ;;  %v8327_v58 = vmov 0 }
 0x376   : > { %v1239_v62 = vpop.permute.xlu1 %1238  ;;  %5705 = vmatprep.subr.bf16.mxu1 %v2867_v61 }
 0x377   : > { %1260 = vst.msk [vmem:[#allocation4 + $0xd8] sm:$0xff] %vm8273_vm4, %v1239_v62  ;;  %v1173_v63 = vpop.permute.xlu0 %1172  ;;  %v2262_v59 = vpack.c.b8 %v2261_v50, %v2261_v50  ;;  %v2881_v62 = vld [vmem:[#allocation4 + $0x78] sm:$0xff] }
 0x378   : > { %1194 = vst.msk [vmem:[#allocation4 + $0x98] sm:$0xff] %vm8273_vm4, %v1173_v63  ;;  %v2264_v63 = vpack.c.b8 %v2263_v56, %v2263_v56 }
 0x379   : > { %5680 = vmatpush3.bf16.xpose.msra.mxu0 %v1801_v0  ;;  %5706 = vmatpush3.bf16.msra.mxu1 %v2867_v61  ;;  %v2245_v61 = vunpack.c.0.s8 %v2238_v48  ;;  %v2271_v0 = vpack.c.b16 %v2248_v57, %v2248_v57  ;;  %vm2291_vm10 = vnez %v2262_v59 }
 0x37a   : > { %v1241_v4 = vpop.permute.xlu1 %1240  ;;  %5936 = vmatprep.subr.msk.bf16.mxu0 %vm8273_vm4, %v1326_v1  ;;  %5707 = vmatprep.subr.bf16.mxu1 %v2868_v2  ;;  %v2246_v1 = vunpack.c.1.s8 %v2238_v48  ;;  %vm2292_vm11 = vnez %v2264_v63 }
 0x37b   : > { %1261 = vst.msk [vmem:[#allocation4 + $0xe0] sm:$0xff] %vm8273_vm4, %v1241_v4  ;;  %v1175_v6 = vpop.permute.xlu0 %1174  ;;  %v2270_v4 = vpack.c.b8 %v2269_v60, %v2269_v60 }
 0x37c   : > { %1195 = vst.msk [vmem:[#allocation4 + $0xa0] sm:$0xff] %vm8273_vm4, %v1175_v6  ;;  %5660 = vmatmul.mubr.msk.bf16.gmra.mrb[20].mxu1 %vm8273_vm4, %v1284_v3  ;;  %v2305_v3 = vsel %vm2289_vm8, 16843009, %v6428_v36  ;;  %v7228_v6 = vld [vmem:[#allocation4 + $0xc0] sm:$0xff] }
 0x37d   : > { %5708 = vmatpush3.bf16.msra.mxu1 %v2868_v2  ;;  %5663 = vmatprep.mubr.msk.bf16.mxu1 %vm8273_vm4, %v1285_v5  ;;  %v7225_v2 = vsel %vm2235_vm7, 16843009, %v6428_v36  ;;  %v2265_v5 = vpack.c.b16 %v2245_v61, %v2245_v61  ;;  %vm7236_vm12 = vnez %v2270_v4 }
 0x37e   : > { %v1243_v8 = vpop.permute.xlu1 %1242  ;;  %5709 = vmatprep.subr.bf16.mxu1 %v2869_v7  ;;  %v2249_v44 = vunpack.c.0.s8 %v7225_v2  ;;  %v2250_v57 = vunpack.c.1.s8 %v7225_v2 }
 0x37f   : > { %1262 = vst.msk [vmem:[#allocation4 + $0xe8] sm:$0xff] %vm8273_vm4, %v1243_v8  ;;  %v1177_v9 = vpop.permute.xlu0 %1176  ;;  %v2267_v8 = vpack.c.b16 %v2246_v1, %v2246_v1 }
 0x380   : > { %1196 = vst.msk [vmem:[#allocation4 + $0xa8] sm:$0xff] %vm8273_vm4, %v1177_v9  ;;  %v2251_v9 = vunpack.c.2.s8 %v7225_v2  ;;  %v2273_v61 = vpack.c.b16 %v2249_v44, %v2249_v44 }
 0x381   : > { %5682 = vmatpush3.bf16.xpose.msra.mxu0 %v1804_v10  ;;  %5710 = vmatpush3.bf16.msra.mxu1 %v2869_v7  ;;  %v2272_v7 = vpack.c.b8 %v2271_v0, %v2271_v0  ;;  %v2252_v10 = vunpack.c.3.s8 %v7225_v2 }
 0x382   : > { %v1245_v14 = vpop.permute.xlu1 %1244  ;;  %5937 = vmatprep.subr.msk.bf16.mxu0 %vm8273_vm4, %v1327_v11  ;;  %5711 = vmatprep.subr.bf16.mxu1 %v2870_v12  ;;  %v2306_v11 = vsel %vm2290_vm9, 16843009, %v6428_v36 }
 0x383   : > { %1263 = vst.msk [vmem:[#allocation4 + $0xf0] sm:$0xff] %vm8273_vm4, %v1245_v14  ;;  %v1179_v16 = vpop.permute.xlu0 %1178  ;;  %v2321_v14 = vunpack.c.0.s8 %v2305_v3  ;;  %vm2296_vm13 = vnez %v2272_v7 }
 0x384   : > { %1197 = vst.msk [vmem:[#allocation4 + $0xb0] sm:$0xff] %vm8273_vm4, %v1179_v16  ;;  %5664 = vmatmul.mubr.msk.bf16.gmra.mrb[24].mxu1 %vm8273_vm4, %v1286_v13 }
 0x385   : > { %5712 = vmatpush3.bf16.msra.mxu1 %v2870_v12  ;;  %5667 = vmatprep.mubr.msk.bf16.mxu1 %vm8273_vm4, %v1287_v15  ;;  %v2307_v12 = vsel %vm2291_vm10, 16843009, %v6428_v36  ;;  %v2308_v15 = vsel %vm2292_vm11, 16843009, %v6428_v36  ;;  %vm7252_vm1 = vcmp.ne.s32.totalorder %v2321_v14, 0  ;;  %v2274_v14 = vpack.c.b8 %v2273_v61, %v2273_v61 }
 0x386   : > { %v1247_v18 = vpop.permute.xlu1 %1246  ;;  %5713 = vmatprep.subr.bf16.mxu1 %v2871_v17  ;;  %v2324_v31 = vunpack.c.0.s8 %v2308_v15  ;;  %v8320_v51 = vsel %vm7252_vm1, 4294967295, %v8319_v51 }
 0x387   : > { %1264 = vst.msk [vmem:[#allocation4 + $0xf8] sm:$0xff] %vm8273_vm4, %v1247_v18  ;;  %v1181_v19 = vpop.permute.xlu0 %1180 }
 0x388   : > { %1198 = vst.msk [vmem:[#allocation4 + $0xb8] sm:$0xff] %vm8273_vm4, %v1181_v19  ;;  %vm7269_vm7 = vcmp.ne.s32.totalorder %v2324_v31, 0 }
 0x389   : > { %5684 = vmatpush3.bf16.xpose.msra.mxu0 %v1807_v20  ;;  %5714 = vmatpush3.bf16.msra.mxu1 %v2871_v17  ;;  %v2266_v17 = vpack.c.b8 %v2265_v5, %v2265_v5  ;;  %v2268_v20 = vpack.c.b8 %v2267_v8, %v2267_v8  ;;  %v8328_v58 = vsel %vm7269_vm7, 4294967295, %v8327_v58 }
 0x38a   : > { %5938 = vmatprep.subr.msk.bf16.mxu0 %vm8273_vm4, %v1328_v21  ;;  %5715 = vmatprep.subr.bf16.mxu1 %v2872_v22  ;;  %v2277_v21 = vpack.c.b16 %v2251_v9, %v2251_v9 }
 0x38b   : > { %vm2293_vm14 = vnez %v2266_v17  ;;  %vm2294_vm15 = vnez %v2268_v20  ;;  %v8329_v17 = vmov 0 }
 0x38c   : > { %5668 = vmatmul.mubr.msk.bf16.gmra.mrb[28].mxu1 %vm8273_vm4, %v1288_v23  ;;  %v2309_v47 = vsel %vm2293_vm14, 16843009, %v6428_v36  ;;  %v7250_v50 = vsel %vm2294_vm15, 16843009, %v6428_v36 }
 0x38d   : > { %5716 = vmatpush3.bf16.msra.mxu1 %v2872_v22  ;;  %v2325_v5 = vunpack.c.0.s8 %v2309_v47 }
 0x38e   : > { %5717 = vmatprep.subr.bf16.mxu1 %v2873_v24 }
 0x38f   : > { %vm7297_vm11 = vcmp.ne.s32.totalorder %v2325_v5, 0 }
 0x391   : > { %5686 = vmatpush3.bf16.xpose.msra.mxu0 %v1810_v25  ;;  %5718 = vmatpush3.bf16.msra.mxu1 %v2873_v24  ;;  %v2322_v24 = vunpack.c.0.s8 %v2306_v11  ;;  %v2323_v25 = vunpack.c.0.s8 %v2307_v12  ;;  %v7284_v11 = vpack.c.b16 %v2250_v57, %v2250_v57  ;;  %v8341_v57 = vmov 0 }
 0x392   : > { %5735 = vmatprep.subr.bf16.mxu0 %v2874_v26  ;;  %5767 = vmatprep.subr.bf16.mxu1 %v7209_v27 }
 0x393   : > { %vm7256_vm2 = vcmp.ne.s32.totalorder %v2322_v24, 0  ;;  %vm7260_vm5 = vcmp.ne.s32.totalorder %v2323_v25, 0 }
 0x394   : > { %v8322_v52 = vsel %vm7256_vm2, 4294967295, %v8321_v52  ;;  %vm7327_vm14 = vmpackc.low %vm7269_vm7, %vm7260_vm5 }
 0x398   : > { %5688 = vmatmul.mubr.msk.bf16.vlgmr.msra.gmra.mrb[32].mxu0 %vm8273_vm4, %v1290_v28 }
 0x399   : > { %5736 = vmatpush3.bf16.msra.mxu0 %v2874_v26  ;;  %5691 = vmatprep.mubr.msk.bf16.mxu0 %vm8273_vm4, %v1291_v29  ;;  %v2279_v26 = vpack.c.b16 %v2252_v10, %v2252_v10 }
 0x39a   : > { %5737 = vmatprep.subr.bf16.mxu0 %v2875_v30 }
 0x39b   : > { %v2280_v43 = vpack.c.b8 %v2279_v26, %v2279_v26  ;;  %v8331_v26 = vmov 0 }
 0x39d   : > { %5738 = vmatpush3.bf16.msra.mxu0 %v2875_v30  ;;  %vm2300_vm8 = vnez %v2280_v43 }
 0x39e   : > { %5739 = vmatprep.subr.bf16.mxu0 %v2876_v32  ;;  %v7282_v10 = vsel %vm2300_vm8, 16843009, %v6428_v36 }
 0x3a0   : > { %5692 = vmatmul.mubr.msk.bf16.gmra.mrb[36].mxu0 %vm8273_vm4, %v1292_v33 }
 0x3a1   : > { %5740 = vmatpush3.bf16.msra.mxu0 %v2876_v32  ;;  %5695 = vmatprep.mubr.msk.bf16.mxu0 %vm8273_vm4, %v1293_v34  ;;  %v2311_v32 = vsel %vm7236_vm12, 16843009, %v6428_v36  ;;  %vm7306_vm12 = vnez %v2274_v14 }
 0x3a2   : > { %5741 = vmatprep.subr.bf16.mxu0 %v2877_v35  ;;  %v2327_v46 = vunpack.c.0.s8 %v2311_v32  ;;  %v2313_v5 = vsel %vm7306_vm12, 16843009, %v6428_v36 }
 0x3a4   : > { %vm7287_vm9 = vcmp.ne.s32.totalorder %v2327_v46, 0 }
 0x3a5   : > { %5742 = vmatpush3.bf16.msra.mxu0 %v2877_v35  ;;  %v7244_v35 = vsel %vm2296_vm13, 16843009, %v6428_v36  ;;  %v8330_v17 = vsel %vm7287_vm9, 4294967295, %v8329_v17  ;;  %vm7317_vm13 = vmpackc.low %vm7256_vm2, %vm7252_vm1 }
 0x3a6   : > { %5743 = vmatprep.subr.bf16.mxu0 %v2878_v39  ;;  %v2328_v1 = vunpack.c.0.s8 %v7244_v35 }
 0x3a8   : > { %5696 = vmatmul.mubr.msk.bf16.gmra.mrb[40].mxu0 %vm8273_vm4, %v1294_v40  ;;  %v2232_v40 = vld [vmem:[%s6600_s9 + $0x18] sm:$0xff]  ;;  %vm7293_vm10 = vcmp.ne.s32.totalorder %v2328_v1, 0 }
 0x3a9   : > { %5744 = vmatpush3.bf16.msra.mxu0 %v2878_v39  ;;  %5699 = vmatprep.mubr.msk.bf16.mxu0 %vm8273_vm4, %v1295_v42  ;;  %v2278_v39 = vpack.c.b8 %v2277_v21, %v2277_v21  ;;  %vm2236_vm0 = vnez %v2232_v40  ;;  %v8332_v26 = vsel %vm7293_vm10, 4294967295, %v8331_v26 }
 0x3aa   : > { %5745 = vmatprep.subr.bf16.mxu0 %v2879_v45  ;;  %v7276_v3 = vsel %vm2236_vm0, 16843009, %v6428_v36 }
 0x3ab   : > { %vm7264_vm6 = vnez %v2278_v39  ;;  %v2255_v15 = vunpack.c.2.s8 %v7276_v3 }
 0x3ac   : > { %v2315_v7 = vsel %vm7264_vm6, 16843009, %v6428_v36 }
 0x3ad   : > { %5746 = vmatpush3.bf16.msra.mxu0 %v2879_v45  ;;  %v2331_v21 = vunpack.c.0.s8 %v2315_v7 }
 0x3ae   : > { %5747 = vmatprep.subr.bf16.mxu0 %v2880_v53 }
 0x3af   : > { %vm7340_vm0 = vcmp.ne.s32.totalorder %v2331_v21, 0 }
 0x3b0   : > { %5700 = vmatmul.mubr.msk.bf16.gmra.mrb[44].mxu0 %vm8273_vm4, %v1296_v54 }
 0x3b1   : > { %5748 = vmatpush3.bf16.msra.mxu0 %v2880_v53  ;;  %v8323_v53 = vmov 0 }
 0x3b2   : > { %5749 = vmatprep.subr.bf16.mxu0 %v2881_v62  ;;  %v8324_v53 = vsel %vm7260_vm5, 4294967295, %v8323_v53 }
 0x3b5   : > { %5750 = vmatpush3.bf16.msra.mxu0 %v2881_v62 }
 0x3b6   : > { %5799 = vmatprep.subr.bf16.mxu0 %v7228_v6 }
 0x3b8   : > { %v5593_v13 = vpop.f32.mrb[0].mxu1 }
 0x3b9   : > { %v1911_v18 = vmul.f32 0.35355338, %v5593_v13  ;;  %v1411_v19 = vpop.f32.mrb[1].mxu1 }
 0x3ba   : > { %v1909_v22 = vmul.f32 0.35355338, %v1411_v19  ;;  %v5594_v23 = vpop.f32.mrb[2].mxu1 }
 0x3bb   : > { %v5154_v28 = vclamps-f32 %v1911_v18, 5.0  ;;  %v1912_v29 = vmul.f32 0.35355338, %v5594_v23  ;;  %v1414_v30 = vpop.f32.mrb[3].mxu1  ;;  %v2326_v18 = vunpack.c.0.s8 %v7250_v50  ;;  %v8339_v50 = vmov 0 }
 0x3bc   : > { %v5152_v33 = vclamps-f32 %v1909_v22, 5.0  ;;  %v1910_v34 = vmul.f32 0.35355338, %v1414_v30  ;;  %v2332_v22 = vunpack.c.0.s8 %v7282_v10  ;;  %v2256_v30 = vunpack.c.3.s8 %v7276_v3 }
 0x3bd   : > { %v2105_v37 = vmul.f32 1.442695, %v5154_v28  ;;  %v5155_v38 = vclamps-f32 %v1912_v29, 5.0  ;;  %v8333_v28 = vmov 0  ;;  %v2276_v29 = vpack.c.b8 %v7284_v11, %v7284_v11 }
 0x3be   : > { %v2101_v41 = vmul.f32 1.442695, %v5152_v33  ;;  %v5153_v42 = vclamps-f32 %v1910_v34, 5.0  ;;  %v8334_v28 = vsel %vm7297_vm11, 4294967295, %v8333_v28  ;;  %v8340_v50 = vsel %vm7327_vm14, 4294967295, %v8339_v50 }
 0x3bf   : > { %6047 = vpow2.f32 %v2105_v37  ;;  %v2107_v45 = vmul.f32 1.442695, %v5155_v38  ;;  %v7310_v37 = vpack.c.b16 %v2255_v15, %v2255_v15  ;;  %vm7333_vm15 = vcmp.ne.s32.totalorder %v2326_v18, 0 }
 0x3c0   : > { %6049 = vpow2.f32 %v2101_v41  ;;  %v2103_v48 = vmul.f32 1.442695, %v5153_v42  ;;  %v5597_v49 = vpop.f32.mrb[4].mxu1  ;;  %v2253_v42 = vunpack.c.0.s8 %v7276_v3  ;;  %v8342_v57 = vsel %vm7333_vm15, 4294967295, %v8341_v57 }
 0x3c1   : > { %6051 = vpow2.f32 %v2107_v45  ;;  %v1915_v54 = vmul.f32 0.35355338, %v5597_v49  ;;  %v1427_v55 = vpop.f32.mrb[5].mxu1  ;;  %v2287_v61 = vpack.c.b16 %v2256_v30, %v2256_v30  ;;  %vm7354_vm6 = vnez %v2276_v29 }
 0x3c2   : > { %6053 = vpow2.f32 %v2103_v48  ;;  %v1913_v59 = vmul.f32 0.35355338, %v1427_v55  ;;  %v5598_v60 = vpop.f32.mrb[6].mxu1  ;;  %v2281_v1 = vpack.c.b16 %v2253_v42, %v2253_v42 }
 0x3c3   : > { %v5158_v62 = vclamps-f32 %v1915_v54, 5.0  ;;  %v1916_v63 = vmul.f32 0.35355338, %v5598_v60  ;;  %v1430_v0 = vpop.f32.mrb[7].mxu1  ;;  %v2288_v18 = vpack.c.b8 %v2287_v61, %v2287_v61 }
 0x3c4   : > { %v5156_v4 = vclamps-f32 %v1913_v59, 5.0  ;;  %v1914_v2 = vmul.f32 0.35355338, %v1430_v0 }
 0x3c5   : > { %v2113_v8 = vmul.f32 1.442695, %v5158_v62  ;;  %v5159_v9 = vclamps-f32 %v1916_v63, 5.0  ;;  %v2254_v62 = vunpack.c.1.s8 %v7276_v3  ;;  %vm7378_vm12 = vnez %v2288_v18 }
 0x3c6   : > { %v2109_v12 = vmul.f32 1.442695, %v5156_v4  ;;  %v5157_v13 = vclamps-f32 %v1914_v2, 5.0  ;;  %v8359_v18 = vmov 0 }
 0x3c7   : > { %6055 = vpow2.f32 %v2113_v8  ;;  %v2115_v16 = vmul.f32 1.442695, %v5159_v9  ;;  %v2883_v8 = vld [vmem:[#allocation4 + $0x88] sm:$0xff] }
 0x3c8   : > { %6057 = vpow2.f32 %v2109_v12  ;;  %v2111_v19 = vmul.f32 1.442695, %v5157_v13  ;;  %v5601_v20 = vpop.f32.mrb[8].mxu1  ;;  %v2286_v13 = vpack.c.b8 %v7310_v37, %v7310_v37 }
 0x3c9   : > { %v6048_v23 = vpop.eup %6047  ;;  %6059 = vpow2.f32 %v2115_v16  ;;  %v1919_v24 = vmul.f32 0.35355338, %v5601_v20  ;;  %v1443_v25 = vpop.f32.mrb[9].mxu1 }
 0x3ca   : > { %v6050_v31 = vpop.eup %6049  ;;  %v2387_v32 = vsel %vm7260_vm5, %v6048_v23, 0.0  ;;  %v1917_v33 = vmul.f32 0.35355338, %v1443_v25  ;;  %v5602_v34 = vpop.f32.mrb[10].mxu1  ;;  %6061 = vpow2.f32 %v2111_v19  ;;  %v2283_v19 = vpack.c.b16 %v2254_v62, %v2254_v62 }
 0x3cb   : > { %v6052_v38 = vpop.eup %6051  ;;  %v5162_v39 = vclamps-f32 %v1919_v24, 5.0  ;;  %2517 = vadd.xlane.f32.xlu0 %v2387_v32  ;;  %v1920_v40 = vmul.f32 0.35355338, %v5602_v34  ;;  %v1446_v41 = vpop.f32.mrb[11].mxu1  ;;  %v2385_v47 = vsel %vm7252_vm1, %v6050_v31, 0.0  ;;  %v2282_v25 = vpack.c.b8 %v2281_v1, %v2281_v1  ;;  %v2884_v34 = vld [vmem:[#allocation4 + $0x90] sm:$0xff] }
 0x3cc   : > { %v6054_v43 = vpop.eup %6053  ;;  %v5220_v44 = vpack.c.bf16 %v6052_v38, %v6048_v23  ;;  %v5160_v46 = vclamps-f32 %v1917_v33, 5.0  ;;  %v1918_v48 = vmul.f32 0.35355338, %v1446_v41  ;;  %v2388_v3 = vsel %vm7269_vm7, %v6052_v38, 0.0 }
 0x3cd   : > { %v5217_v49 = vpack.c.bf16 %v6054_v43, %v6050_v31  ;;  %v2121_v54 = vmul.f32 1.442695, %v5162_v39  ;;  %v5163_v55 = vclamps-f32 %v1920_v40, 5.0  ;;  %v2386_v56 = vsel %vm7256_vm2, %v6054_v43, 0.0 }
 0x3ce   : > { %v2117_v59 = vmul.f32 1.442695, %v5160_v46  ;;  %v5161_v60 = vclamps-f32 %v1918_v48, 5.0  ;;  %2515 = vadd.xlane.f32.xlu1 %v2386_v56  ;;  %v2329_v38 = vunpack.c.0.s8 %v2313_v5  ;;  %vm2303_vm8 = vnez %v2286_v13  ;;  %v2886_v5 = vld [vmem:[#allocation4 + $0xa0] sm:$0xff] }
 0x3cf   : > { %5719 = vmatprep.mubr.msk.bf16.mxu1 %vm7317_vm13, %v5217_v49  ;;  %6063 = vpow2.f32 %v2121_v54  ;;  %v2123_v63 = vmul.f32 1.442695, %v5163_v55  ;;  %2513 = vadd.xlane.f32.xlu0 %v2385_v47  ;;  %v2314_v41 = vsel %vm7354_vm6, 16843009, %v6428_v36  ;;  %vm7382_vm3 = vnez %v2282_v25  ;;  %v2885_v55 = vld [vmem:[#allocation4 + $0x98] sm:$0xff] }
 0x3d0   : > { %5720 = vmatmul.mubr.msk.bf16.vlgmr.msra.gmra.mrb[32].mxu1 %vm7327_vm14, %v5220_v44  ;;  %6065 = vpow2.f32 %v2117_v59  ;;  %v2119_v4 = vmul.f32 1.442695, %v5161_v60  ;;  %v5605_v2 = vpop.f32.mrb[12].mxu1  ;;  %v2284_v46 = vpack.c.b8 %v2283_v19, %v2283_v19  ;;  %v2319_v49 = vsel %vm2303_vm8, 16843009, %v6428_v36  ;;  %vm7452_vm14 = vmpackc.low %vm7293_vm10, %vm7287_vm9  ;;  %v2772_v44 = vld [vmem:[#allocation5 + $0x10] sm:$0xff] }
 0x3d1   : > { %v7351_v7 = vpop.eup %6055  ;;  %5768 = vmatpush3.bf16.msra.mxu1 %v7209_v27  ;;  %6067 = vpow2.f32 %v2123_v63  ;;  %v1923_v9 = vmul.f32 0.35355338, %v5605_v2  ;;  %v1459_v11 = vpop.f32.mrb[13].mxu1  ;;  %vm7394_vm6 = vcmp.ne.s32.totalorder %v2332_v22, 0  ;;  %vm7398_vm4 = vcmp.ne.s32.totalorder %v2329_v38, 0 }
 0x3d2   : > { %v7360_v14 = vpop.eup %6057  ;;  %5769 = vmatprep.subr.bf16.mxu1 %v2883_v8  ;;  %v1921_v15 = vmul.f32 0.35355338, %v1459_v11  ;;  %v5606_v16 = vpop.f32.mrb[14].mxu1  ;;  %v2391_v27 = vsel %vm7287_vm9, %v7351_v7, 0.0  ;;  %6069 = vpow2.f32 %v2119_v4  ;;  %v8353_v59 = vmov 0 }
 0x3d3   : > { %v7365_v20 = vpop.eup %6059  ;;  %v5166_v21 = vclamps-f32 %v1923_v9, 5.0  ;;  %2519 = vadd.xlane.f32.xlu0 %v2388_v3  ;;  %v1924_v23 = vmul.f32 0.35355338, %v5606_v16  ;;  %2525 = vadd.xlane.f32.xlu1 %v2391_v27  ;;  %v1462_v24 = vpop.f32.mrb[15].mxu1  ;;  %v2389_v32 = vsel %vm7297_vm11, %v7360_v14, 0.0  ;;  %v8354_v59 = vsel %vm7398_vm4, 4294967295, %v8353_v59 }
 0x3d4   : > { %v5164_v29 = vclamps-f32 %v1921_v15, 5.0  ;;  %v2392_v30 = vsel %vm7293_vm10, %v7365_v20, 0.0  ;;  %v1922_v31 = vmul.f32 0.35355338, %v1462_v24  ;;  %v7373_v33 = vpop.eup %6061  ;;  %v2330_v60 = vunpack.c.0.s8 %v2314_v41  ;;  %v2887_v27 = vld [vmem:[#allocation4 + $0xa8] sm:$0xff]  ;;  %vm7485_vm10 = vmpackc.low %vm7394_vm6, %vm7340_vm0 }
 0x3d5   : > { %5770 = vmatpush3.bf16.msra.mxu1 %v2883_v8  ;;  %v2129_v35 = vmul.f32 1.442695, %v5166_v21  ;;  %v5167_v37 = vclamps-f32 %v1924_v23, 5.0  ;;  %v2390_v48 = vsel %vm7333_vm15, %v7373_v33, 0.0  ;;  %v2320_v63 = vsel %vm7378_vm12, 16843009, %v6428_v36 }
 0x3d6   : > { %5771 = vmatprep.subr.bf16.mxu1 %v2884_v34  ;;  %v2125_v39 = vmul.f32 1.442695, %v5164_v29  ;;  %v5165_v40 = vclamps-f32 %v1922_v31, 5.0  ;;  %v2317_v10 = vsel %vm7382_vm3, 16843009, %v6428_v36  ;;  %v2335_v1 = vunpack.c.0.s8 %v2319_v49 }
 0x3d7   : > { %6071 = vpow2.f32 %v2129_v35  ;;  %v2131_v43 = vmul.f32 1.442695, %v5167_v37  ;;  %2527 = vadd.xlane.f32.xlu0 %v2392_v30  ;;  %2521 = vadd.xlane.f32.xlu1 %v2389_v32  ;;  %vm2302_vm8 = vnez %v2284_v46  ;;  %vm7415_vm12 = vcmp.ne.s32.totalorder %v2330_v60, 0  ;;  %v2889_v35 = vld [vmem:[#allocation4 + $0xb8] sm:$0xff] }
 0x3d8   : > { %6073 = vpow2.f32 %v2125_v39  ;;  %v2127_v47 = vmul.f32 1.442695, %v5165_v40  ;;  %v8355_v8 = vmov 0  ;;  %v2336_v9 = vunpack.c.0.s8 %v2320_v63 }
 0x3d9   : > { %v7390_v54 = vpop.eup %6063  ;;  %5772 = vmatpush3.bf16.msra.mxu1 %v2884_v34  ;;  %6075 = vpow2.f32 %v2131_v43  ;;  %v8356_v8 = vsel %vm7415_vm12, 4294967295, %v8355_v8  ;;  %v2333_v11 = vunpack.c.0.s8 %v2317_v10  ;;  %v2318_v12 = vsel %vm2302_vm8, 16843009, %v6428_v36  ;;  %vm7440_vm8 = vmpackc.low %vm7333_vm15, %vm7297_vm11 }
 0x3da   : > { %v6066_v61 = vpop.eup %6065  ;;  %5773 = vmatprep.subr.bf16.mxu1 %v2885_v55  ;;  %v2395_v62 = vsel %vm7340_vm0, %v7390_v54, 0.0  ;;  %6077 = vpow2.f32 %v2127_v47  ;;  %vm7420_vm3 = vcmp.ne.s32.totalorder %v2335_v1, 0  ;;  %vm7426_vm2 = vcmp.ne.s32.totalorder %v2336_v9, 0  ;;  %vm7474_vm11 = vmpackc.low %vm7415_vm12, %vm7398_vm4 }
 0x3db   : > { %v6068_v22 = vpop.eup %6067  ;;  %2523 = vadd.xlane.f32.xlu0 %v2390_v48  ;;  %2533 = vadd.xlane.f32.xlu1 %v2395_v62  ;;  %v2393_v2 = vsel %vm7398_vm4, %v6066_v61, 0.0  ;;  %v8360_v18 = vsel %vm7426_vm2, 4294967295, %v8359_v18  ;;  %vm7430_vm1 = vcmp.ne.s32.totalorder %v2333_v11, 0  ;;  %v8361_v19 = vmov 0  ;;  %vm7505_vm4 = vmpackc.low %vm7426_vm2, %vm7420_vm3 }
 0x3dc   : > { %v2396_v4 = vsel %vm7394_vm6, %v6068_v22, 0.0  ;;  %v6070_v3 = vpop.eup %6069  ;;  %v8362_v19 = vsel %vm7430_vm1, 4294967295, %v8361_v19  ;;  %v2334_v36 = vunpack.c.0.s8 %v2318_v12  ;;  %v5223_v25 = vpack.c.bf16 %v7373_v33, %v7360_v14 }
 0x3dd   : > { %5774 = vmatpush3.bf16.msra.mxu1 %v2885_v55  ;;  %v2394_v15 = vsel %vm7415_vm12, %v6070_v3, 0.0  ;;  %v5226_v29 = vpack.c.bf16 %v7365_v20, %v7351_v7  ;;  %v2888_v20 = vld [vmem:[#allocation4 + $0xb0] sm:$0xff]  ;;  %v8367_v33 = vmov 0  ;;  %v5229_v37 = vpack.c.bf16 %v6070_v3, %v6066_v61 }
 0x3de   : > { %5775 = vmatprep.subr.bf16.mxu1 %v2886_v5  ;;  %5723 = vmatprep.mubr.msk.bf16.mxu1 %vm7440_vm8, %v5223_v25  ;;  %vm7462_vm15 = vcmp.ne.s32.totalorder %v2334_v36, 0  ;;  %v5232_v39 = vpack.c.bf16 %v6068_v22, %v7390_v54 }
 0x3df   : > { %2535 = vadd.xlane.f32.xlu0 %v2396_v4  ;;  %2529 = vadd.xlane.f32.xlu1 %v2393_v2  ;;  %v8368_v33 = vsel %vm7462_vm15, 4294967295, %v8367_v33  ;;  %vm7495_vm12 = vmpackc.low %vm7462_vm15, %vm7430_vm1 }
 0x3e0   : > { %5724 = vmatmul.mubr.msk.bf16.gmra.mrb[36].mxu1 %vm7452_vm14, %v5226_v29 }
 0x3e1   : > { %v6072_v16 = vpop.eup %6071  ;;  %5776 = vmatpush3.bf16.msra.mxu1 %v2886_v5  ;;  %5727 = vmatprep.mubr.msk.bf16.mxu1 %vm7474_vm11, %v5229_v37 }
 0x3e2   : > { %v6074_v21 = vpop.eup %6073  ;;  %5777 = vmatprep.subr.bf16.mxu1 %v2887_v27  ;;  %v2399_v23 = vsel %vm7420_vm3, %v6072_v16, 0.0 }
 0x3e3   : > { %v6076_v30 = vpop.eup %6075  ;;  %2531 = vadd.xlane.f32.xlu0 %v2394_v15  ;;  %2541 = vadd.xlane.f32.xlu1 %v2399_v23  ;;  %v2397_v14 = vsel %vm7430_vm1, %v6074_v21, 0.0  ;;  %vm8295_vm1 = vcmask 7168  }
 0x3e4   : > { %v2400_v32 = vsel %vm7426_vm2, %v6076_v30, 0.0  ;;  %v6078_v7 = vpop.eup %6077  ;;  %v5238_v43 = vpack.c.bf16 %v6076_v30, %v6072_v16 }
 0x3e5   : > { %5778 = vmatpush3.bf16.msra.mxu1 %v2887_v27  ;;  %v2398_v34 = vsel %vm7462_vm15, %v6078_v7, 0.0  ;;  %v5235_v41 = vpack.c.bf16 %v6078_v7, %v6074_v21  ;;  %vm8377_vm15 = vnez %v8340_v50 }
 0x3e6   : > { %5779 = vmatprep.subr.bf16.mxu1 %v2888_v20 }
 0x3e7   : > { %2543 = vadd.xlane.f32.xlu0 %v2400_v32  ;;  %2537 = vadd.xlane.f32.xlu1 %v2397_v14 }
 0x3e8   : > { %5728 = vmatmul.mubr.msk.bf16.gmra.mrb[40].mxu1 %vm7485_vm10, %v5232_v39 }
 0x3e9   : > { %5780 = vmatpush3.bf16.msra.mxu1 %v2888_v20  ;;  %5731 = vmatprep.mubr.msk.bf16.mxu1 %vm7495_vm12, %v5235_v41 }
 0x3ea   : > { %5781 = vmatprep.subr.bf16.mxu1 %v2889_v35 }
 0x3eb   : > { %2539 = vadd.xlane.f32.xlu0 %v2398_v34 }
 0x3ed   : > { %5782 = vmatpush3.bf16.msra.mxu1 %v2889_v35 }
 0x3f0   : > { %5732 = vmatmul.mubr.msk.bf16.gmra.mrb[44].mxu1 %vm7505_vm4, %v5238_v43 }
 0x42b   : > { %v5625_v46 = vpop.f32.mrb[16].mxu0 }
 0x42c   : > { %v1927_v47 = vmul.f32 0.35355338, %v5625_v46  ;;  %v1556_v48 = vpop.f32.mrb[17].mxu0 }
 0x42d   : > { %v1925_v49 = vmul.f32 0.35355338, %v1556_v48  ;;  %v5626_v54 = vpop.f32.mrb[18].mxu0 }
 0x42e   : > { %v5170_v55 = vclamps-f32 %v1927_v47, 5.0  ;;  %v1928_v60 = vmul.f32 0.35355338, %v5626_v54  ;;  %v1559_v61 = vpop.f32.mrb[19].mxu0 }
 0x42f   : > { %v5168_v62 = vclamps-f32 %v1925_v49, 5.0  ;;  %v1926_v63 = vmul.f32 0.35355338, %v1559_v61 }
 0x430   : > { %v2137_v10 = vmul.f32 1.442695, %v5170_v55  ;;  %v5171_v22 = vclamps-f32 %v1928_v60, 5.0 }
 0x431   : > { %v2133_v1 = vmul.f32 1.442695, %v5168_v62  ;;  %v5169_v4 = vclamps-f32 %v1926_v63, 5.0 }
 0x432   : > { %6079 = vpow2.f32 %v2137_v10  ;;  %v2139_v2 = vmul.f32 1.442695, %v5171_v22 }
 0x433   : > { %6081 = vpow2.f32 %v2133_v1  ;;  %v2135_v3 = vmul.f32 1.442695, %v5169_v4  ;;  %v5629_v5 = vpop.f32.mrb[20].mxu0 }
 0x434   : > { %6083 = vpow2.f32 %v2139_v2  ;;  %v1931_v9 = vmul.f32 0.35355338, %v5629_v5  ;;  %v1572_v11 = vpop.f32.mrb[21].mxu0 }
 0x435   : > { %6085 = vpow2.f32 %v2135_v3  ;;  %v1929_v12 = vmul.f32 0.35355338, %v1572_v11  ;;  %v5630_v15 = vpop.f32.mrb[22].mxu0 }
 0x436   : > { %v5174_v16 = vclamps-f32 %v1931_v9, 5.0  ;;  %v1932_v27 = vmul.f32 0.35355338, %v5630_v15  ;;  %v1575_v36 = vpop.f32.mrb[23].mxu0 }
 0x437   : > { %v5172_v21 = vclamps-f32 %v1929_v12, 5.0  ;;  %v1930_v23 = vmul.f32 0.35355338, %v1575_v36  ;;  %v2891_v12 = vld [vmem:[#allocation4 + $0xc8] sm:$0xff] }
 0x438   : > { %v2145_v25 = vmul.f32 1.442695, %v5174_v16  ;;  %v5175_v29 = vclamps-f32 %v1932_v27, 5.0 }
 0x439   : > { %v2141_v30 = vmul.f32 1.442695, %v5172_v21  ;;  %v5173_v32 = vclamps-f32 %v1930_v23, 5.0 }
 0x43a   : > { %6087 = vpow2.f32 %v2145_v25  ;;  %v2147_v14 = vmul.f32 1.442695, %v5175_v29 }
 0x43b   : > { %6089 = vpow2.f32 %v2141_v30  ;;  %v2143_v7 = vmul.f32 1.442695, %v5173_v32  ;;  %v5633_v20 = vpop.f32.mrb[24].mxu0 }
 0x43c   : > { %v6080_v34 = vpop.eup %6079  ;;  %6091 = vpow2.f32 %v2147_v14  ;;  %v1935_v35 = vmul.f32 0.35355338, %v5633_v20  ;;  %v1588_v37 = vpop.f32.mrb[25].mxu0 }
 0x43d   : > { %v7511_v39 = vpop.eup %6081  ;;  %v2403_v41 = vsel %vm7260_vm5, %v6080_v34, 0.0  ;;  %6093 = vpow2.f32 %v2143_v7  ;;  %v1933_v43 = vmul.f32 0.35355338, %v1588_v37  ;;  %v5634_v46 = vpop.f32.mrb[26].mxu0  ;;  %v2892_v7 = vld [vmem:[#allocation4 + $0xd0] sm:$0xff] }
 0x43e   : > { %v6084_v47 = vpop.eup %6083  ;;  %2549 = vadd.xlane.f32.xlu1 %v2403_v41  ;;  %v5178_v48 = vclamps-f32 %v1935_v35, 5.0  ;;  %v1936_v49 = vmul.f32 0.35355338, %v5634_v46  ;;  %v1591_v54 = vpop.f32.mrb[27].mxu0 }
 0x43f   : > { %v7515_v55 = vpop.eup %6085  ;;  %v5244_v60 = vpack.c.bf16 %v6084_v47, %v6080_v34  ;;  %v2404_v61 = vsel %vm7269_vm7, %v6084_v47, 0.0  ;;  %v5176_v62 = vclamps-f32 %v1933_v43, 5.0  ;;  %v1934_v63 = vmul.f32 0.35355338, %v1591_v54 }
 0x440   : > { %2551 = vadd.xlane.f32.xlu0 %v2404_v61  ;;  %v5241_v10 = vpack.c.bf16 %v7515_v55, %v7511_v39  ;;  %v2153_v22 = vmul.f32 1.442695, %v5178_v48  ;;  %v5179_v1 = vclamps-f32 %v1936_v49, 5.0 }
 0x441   : > { %v2149_v4 = vmul.f32 1.442695, %v5176_v62  ;;  %v5177_v2 = vclamps-f32 %v1934_v63, 5.0 }
 0x442   : > { %5751 = vmatprep.mubr.msk.bf16.mxu0 %vm7317_vm13, %v5241_v10  ;;  %6095 = vpow2.f32 %v2153_v22  ;;  %v2155_v3 = vmul.f32 1.442695, %v5179_v1 }
 0x443   : > { %5752 = vmatmul.mubr.msk.bf16.vlgmr.msra.gmra.mrb[48].mxu0 %vm8377_vm15, %v5244_v60  ;;  %6097 = vpow2.f32 %v2149_v4  ;;  %v2151_v5 = vmul.f32 1.442695, %v5177_v2  ;;  %v5637_v9 = vpop.f32.mrb[28].mxu0 }
 0x444   : > { %v7525_v11 = vpop.eup %6087  ;;  %5800 = vmatpush3.bf16.msra.mxu0 %v7228_v6  ;;  %6099 = vpow2.f32 %v2155_v3  ;;  %v1939_v15 = vmul.f32 0.35355338, %v5637_v9  ;;  %v1604_v16 = vpop.f32.mrb[29].mxu0 }
 0x445   : > { %v7528_v27 = vpop.eup %6089  ;;  %5801 = vmatprep.subr.bf16.mxu0 %v2891_v12  ;;  %6101 = vpow2.f32 %v2151_v5  ;;  %v1937_v36 = vmul.f32 0.35355338, %v1604_v16  ;;  %v5638_v21 = vpop.f32.mrb[30].mxu0  ;;  %v2893_v5 = vld [vmem:[#allocation4 + $0xd8] sm:$0xff] }
 0x446   : > { %v7530_v23 = vpop.eup %6091  ;;  %v5182_v25 = vclamps-f32 %v1939_v15, 5.0  ;;  %v1940_v29 = vmul.f32 0.35355338, %v5638_v21  ;;  %v1607_v30 = vpop.f32.mrb[31].mxu0 }
 0x447   : > { %v7532_v32 = vpop.eup %6093  ;;  %v5657_v14 = vpop.f32.mrb[16].mxu1  ;;  %v5180_v6 = vclamps-f32 %v1937_v36, 5.0  ;;  %v1938_v20 = vmul.f32 0.35355338, %v1607_v30  ;;  %v5250_v34 = vpack.c.bf16 %v7530_v23, %v7525_v11 }
 0x448   : > { %v1943_v35 = vmul.f32 0.35355338, %v5657_v14  ;;  %5802 = vmatpush3.bf16.msra.mxu0 %v2891_v12  ;;  %v1701_v37 = vpop.f32.mrb[17].mxu1  ;;  %v2161_v41 = vmul.f32 1.442695, %v5182_v25  ;;  %v5183_v43 = vclamps-f32 %v1940_v29, 5.0  ;;  %v5247_v46 = vpack.c.bf16 %v7532_v32, %v7528_v27 }
 0x449   : > { %v1941_v47 = vmul.f32 0.35355338, %v1701_v37  ;;  %5803 = vmatprep.subr.bf16.mxu0 %v2892_v7  ;;  %v5658_v48 = vpop.f32.mrb[18].mxu1  ;;  %v2157_v49 = vmul.f32 1.442695, %v5180_v6  ;;  %v5181_v54 = vclamps-f32 %v1938_v20, 5.0 }
 0x44a   : > { %v5186_v60 = vclamps-f32 %v1943_v35, 5.0  ;;  %v1944_v61 = vmul.f32 0.35355338, %v5658_v48  ;;  %v1704_v62 = vpop.f32.mrb[19].mxu1  ;;  %6103 = vpow2.f32 %v2161_v41  ;;  %v2163_v63 = vmul.f32 1.442695, %v5183_v43  ;;  %5755 = vmatprep.mubr.msk.bf16.mxu0 %vm7440_vm8, %v5247_v46 }
 0x44b   : > { %v5184_v10 = vclamps-f32 %v1941_v47, 5.0  ;;  %v1942_v22 = vmul.f32 0.35355338, %v1704_v62  ;;  %6105 = vpow2.f32 %v2157_v49  ;;  %v2159_v1 = vmul.f32 1.442695, %v5181_v54  ;;  %5756 = vmatmul.mubr.msk.bf16.gmra.mrb[52].mxu0 %vm7452_vm14, %v5250_v34  ;;  %v2894_v14 = vld [vmem:[#allocation4 + $0xe0] sm:$0xff] }
 0x44c   : > { %v7542_v4 = vpop.eup %6095  ;;  %v2169_v2 = vmul.f32 1.442695, %v5186_v60  ;;  %v5187_v3 = vclamps-f32 %v1944_v61, 5.0  ;;  %5804 = vmatpush3.bf16.msra.mxu0 %v2892_v7  ;;  %6107 = vpow2.f32 %v2163_v63  ;;  %v2895_v49 = vld [vmem:[#allocation4 + $0xe8] sm:$0xff] }
 0x44d   : > { %v7544_v9 = vpop.eup %6097  ;;  %v2165_v12 = vmul.f32 1.442695, %v5184_v10  ;;  %5805 = vmatprep.subr.bf16.mxu0 %v2893_v5  ;;  %v5185_v15 = vclamps-f32 %v1942_v22, 5.0  ;;  %6109 = vpow2.f32 %v2159_v1  ;;  %v2451_v1 = vld [vmem:[#allocation6 + $0x10] sm:$0xff] }
 0x44e   : > { %v7546_v16 = vpop.eup %6099  ;;  %6111 = vpow2.f32 %v2169_v2  ;;  %v2171_v36 = vmul.f32 1.442695, %v5187_v3 }
 0x44f   : > { %v7548_v21 = vpop.eup %6101  ;;  %6113 = vpow2.f32 %v2165_v12  ;;  %v2167_v25 = vmul.f32 1.442695, %v5185_v15  ;;  %v5661_v29 = vpop.f32.mrb[20].mxu1  ;;  %v5256_v30 = vpack.c.bf16 %v7546_v16, %v7542_v4 }
 0x450   : > { %6115 = vpow2.f32 %v2171_v36  ;;  %5806 = vmatpush3.bf16.msra.mxu0 %v2893_v5  ;;  %v1947_v7 = vmul.f32 0.35355338, %v5661_v29  ;;  %v1717_v6 = vpop.f32.mrb[21].mxu1  ;;  %v5253_v20 = vpack.c.bf16 %v7548_v21, %v7544_v9  ;;  %v2896_v36 = vld [vmem:[#allocation4 + $0xf0] sm:$0xff] }
 0x451   : > { %5807 = vmatprep.subr.bf16.mxu0 %v2894_v14  ;;  %6117 = vpow2.f32 %v2167_v25  ;;  %v1945_v34 = vmul.f32 0.35355338, %v1717_v6  ;;  %v5662_v35 = vpop.f32.mrb[22].mxu1 }
 0x452   : > { %v5190_v37 = vclamps-f32 %v1947_v7, 5.0  ;;  %v1948_v41 = vmul.f32 0.35355338, %v5662_v35  ;;  %v1720_v43 = vpop.f32.mrb[23].mxu1  ;;  %5759 = vmatprep.mubr.msk.bf16.mxu0 %vm7474_vm11, %v5253_v20 }
 0x453   : > { %v5188_v46 = vclamps-f32 %v1945_v34, 5.0  ;;  %v1946_v47 = vmul.f32 0.35355338, %v1720_v43  ;;  %5760 = vmatmul.mubr.msk.bf16.gmra.mrb[56].mxu0 %vm7485_vm10, %v5256_v30 }
 0x454   : > { %v7558_v48 = vpop.eup %6103  ;;  %5808 = vmatpush3.bf16.msra.mxu0 %v2894_v14  ;;  %v2177_v54 = vmul.f32 1.442695, %v5190_v37  ;;  %v5191_v60 = vclamps-f32 %v1948_v41, 5.0 }
 0x455   : > { %v7560_v61 = vpop.eup %6105  ;;  %5809 = vmatprep.subr.bf16.mxu0 %v2895_v49  ;;  %v2173_v62 = vmul.f32 1.442695, %v5188_v46  ;;  %v5189_v63 = vclamps-f32 %v1946_v47, 5.0  ;;  %v2449_v47 = vld [vmem:[#allocation6] sm:$0xff]  ;;  %v2415_v45 = vsel %vm7420_vm3, %v7558_v48, 0.0 }
 0x456   : > { %v7562_v10 = vpop.eup %6107  ;;  %6119 = vpow2.f32 %v2177_v54  ;;  %v2179_v22 = vmul.f32 1.442695, %v5191_v60 }
 0x457   : > { %v7564_v2 = vpop.eup %6109  ;;  %6121 = vpow2.f32 %v2173_v62  ;;  %v2175_v3 = vmul.f32 1.442695, %v5189_v63  ;;  %v5665_v5 = vpop.f32.mrb[24].mxu1  ;;  %v5262_v12 = vpack.c.bf16 %v7562_v10, %v7558_v48 }
 0x458   : > { %v6112_v15 = vpop.eup %6111  ;;  %5810 = vmatpush3.bf16.msra.mxu0 %v2895_v49  ;;  %6123 = vpow2.f32 %v2179_v22  ;;  %v1951_v25 = vmul.f32 0.35355338, %v5665_v5  ;;  %v1733_v29 = vpop.f32.mrb[25].mxu1  ;;  %v5259_v30 = vpack.c.bf16 %v7564_v2, %v7560_v61  ;;  %v2450_v49 = vld [vmem:[#allocation6 + $0x8] sm:$0xff] }
 0x459   : > { %v2518_v14 = vpop.xlane.xlu0 %2517  ;;  %v7570_v7 = vpop.eup %6113  ;;  %5811 = vmatprep.subr.bf16.mxu0 %v2896_v36  ;;  %v2419_v6 = vsel %vm7260_vm5, %v6112_v15, 0.0  ;;  %6125 = vpow2.f32 %v2175_v3  ;;  %v1949_v20 = vmul.f32 0.35355338, %v1733_v29  ;;  %v2897_v3 = vld [vmem:[#allocation4 + $0xf8] sm:$0xff]  ;;  %vm8378_vm5 = vnez %v8320_v51 }
 0x45a   : > { %v5666_v34 = vpop.f32.mrb[26].mxu1  ;;  %v2643_v35 = vadd.f32 %v2518_v14, %v2451_v1  ;;  %v6116_v37 = vpop.eup %6115  ;;  %2581 = vadd.xlane.f32.xlu1 %v2419_v6  ;;  %v5194_v41 = vclamps-f32 %v1951_v25, 5.0  ;;  %5763 = vmatprep.mubr.msk.bf16.mxu0 %vm7495_vm12, %v5259_v30  ;;  %v2401_v5 = vsel %vm8378_vm5, %v7511_v39, 0.0 }
 0x45b   : > { %v1952_v43 = vmul.f32 0.35355338, %v5666_v34  ;;  %v1736_v46 = vpop.f32.mrb[27].mxu1  ;;  %v7576_v54 = vpop.eup %6117  ;;  %v5268_v60 = vpack.c.bf16 %v6116_v37, %v6112_v15  ;;  %v2420_v62 = vsel %vm7269_vm7, %v6116_v37, 0.0  ;;  %v5192_v63 = vclamps-f32 %v1949_v20, 5.0  ;;  %5764 = vmatmul.mubr.msk.bf16.gmra.mrb[60].mxu0 %vm7505_vm4, %v5262_v12  ;;  %v2452_v34 = vld [vmem:[#allocation6 + $0x18] sm:$0xff] }
 0x45c   : > { %v1950_v22 = vmul.f32 0.35355338, %v1736_v46  ;;  %2708 = vst.msk [vmem:[#allocation6 + $0x10] sm:$0xff] %vm8295_vm1, %v2643_v35  ;;  %v2516_v1 = vpop.xlane.xlu1 %2515  ;;  %5812 = vmatpush3.bf16.msra.mxu0 %v2896_v36  ;;  %2583 = vadd.xlane.f32.xlu0 %v2420_v62  ;;  %v2185_v25 = vmul.f32 1.442695, %v5194_v41  ;;  %v5265_v29 = vpack.c.bf16 %v7576_v54, %v7570_v7  ;;  %vm8379_vm1 = vnez %v8322_v52 }
 0x45d   : > { %v5195_v15 = vclamps-f32 %v1952_v43, 5.0  ;;  %v2514_v30 = vpop.xlane.xlu0 %2513  ;;  %5813 = vmatprep.subr.bf16.mxu0 %v2897_v3  ;;  %v2181_v14 = vmul.f32 1.442695, %v5192_v63  ;;  %v2642_v20 = vadd.f32 %v2516_v1, %v2450_v49  ;;  %v2402_v39 = vsel %vm8379_vm1, %v7515_v55, 0.0  ;;  %v2455_v43 = vld [vmem:[#allocation6 + $0x30] sm:$0xff] }
 0x45e   : > { %v5193_v6 = vclamps-f32 %v1950_v22, 5.0  ;;  %v2641_v12 = vadd.f32 %v2514_v30, %v2449_v47  ;;  %2545 = vadd.xlane.f32.xlu1 %v2401_v5  ;;  %6127 = vpow2.f32 %v2185_v25  ;;  %5783 = vmatprep.mubr.msk.bf16.mxu1 %vm7317_vm13, %v5265_v29  ;;  %v2417_v35 = vsel %vm8378_vm5, %v7570_v7, 0.0  ;;  %v2456_v30 = vld [vmem:[#allocation6 + $0x38] sm:$0xff] }
 0x45f   : > { %v2187_v36 = vmul.f32 1.442695, %v5195_v15  ;;  %6129 = vpow2.f32 %v2181_v14  ;;  %v5669_v41 = vpop.f32.mrb[28].mxu1  ;;  %5784 = vmatmul.mubr.msk.bf16.vlgmr.msra.gmra.mrb[48].mxu1 %vm8377_vm15, %v5268_v60  ;;  %vm8380_vm7 = vcmask 7168   ;;  %v2418_v7 = vsel %vm8379_vm1, %v7576_v54, 0.0 }
 0x460   : > { %v2183_v37 = vmul.f32 1.442695, %v5193_v6  ;;  %2706 = vst.msk [vmem:[#allocation6] sm:$0xff] %vm8380_vm7, %v2641_v12  ;;  %vm8381_vm2 = vmmov %vm8380_vm7  ;;  %v6120_v46 = vpop.eup %6119  ;;  %5814 = vmatpush3.bf16.msra.mxu0 %v2897_v3  ;;  %2547 = vadd.xlane.f32.xlu0 %v2402_v39  ;;  %v1955_v55 = vmul.f32 0.35355338, %v5669_v41  ;;  %v2526_v1 = vpop.xlane.xlu1 %2525  ;;  %v2407_v6 = vsel %vm7287_vm9, %v7525_v11, 0.0 }
 0x461   : > { %2707 = vst.msk [vmem:[#allocation6 + $0x8] sm:$0xff] %vm8381_vm2, %v2642_v20  ;;  %6131 = vpow2.f32 %v2187_v36  ;;  %v1749_v47 = vpop.f32.mrb[29].mxu1  ;;  %v2520_v49 = vpop.xlane.xlu0 %2519  ;;  %v2647_v29 = vadd.f32 %v2526_v1, %v2455_v43  ;;  %v2453_v36 = vld [vmem:[#allocation6 + $0x20] sm:$0xff]  ;;  %vm8382_vm7 = vmmov %vm8381_vm2  ;;  %v2459_v1 = vld [vmem:[#allocation6 + $0x50] sm:$0xff] }
 0x462   : > { %v7600_v62 = vpop.eup %6121  ;;  %6133 = vpow2.f32 %v2183_v37  ;;  %v1953_v60 = vmul.f32 0.35355338, %v1749_v47  ;;  %v5670_v63 = vpop.f32.mrb[30].mxu1  ;;  %v2644_v22 = vadd.f32 %v2520_v49, %v2452_v34  ;;  %2577 = vadd.xlane.f32.xlu1 %v2417_v35  ;;  %v5198_v25 = vclamps-f32 %v1955_v55, 5.0  ;;  %vm8384_vm1 = vmmov %vm8382_vm7 }
 0x463   : > { %v6124_v5 = vpop.eup %6123  ;;  %v1956_v3 = vmul.f32 0.35355338, %v5670_v63  ;;  %v1752_v15 = vpop.f32.mrb[31].mxu1  ;;  %2712 = vst.msk [vmem:[#allocation6 + $0x30] sm:$0xff] %vm8382_vm7, %v2647_v29  ;;  %v2423_v63 = vsel %vm7287_vm9, %v6120_v46, 0.0 }
 0x464   : > { %v7605_v14 = vpop.eup %6125  ;;  %v5196_v12 = vclamps-f32 %v1953_v60, 5.0  ;;  %v1954_v54 = vmul.f32 0.35355338, %v1752_v15  ;;  %v5274_v20 = vpack.c.bf16 %v6124_v5, %v6120_v46  ;;  %2709 = vst.msk [vmem:[#allocation6 + $0x18] sm:$0xff] %vm8381_vm2, %v2644_v22  ;;  %2579 = vadd.xlane.f32.xlu0 %v2418_v7  ;;  %v2193_v34 = vmul.f32 1.442695, %v5198_v25  ;;  %v2522_v47 = vpop.xlane.xlu1 %2521 }
 0x465   : > { %v5199_v39 = vclamps-f32 %v1956_v3, 5.0  ;;  %v5271_v35 = vpack.c.bf16 %v7605_v14, %v7600_v62  ;;  %v2528_v37 = vpop.xlane.xlu0 %2527  ;;  %v2645_v49 = vadd.f32 %v2522_v47, %v2453_v36  ;;  %v2454_v7 = vld [vmem:[#allocation6 + $0x28] sm:$0xff]  ;;  %vm8383_vm2 = vnez %v8332_v26 }
 0x466   : > { %v2189_v41 = vmul.f32 1.442695, %v5196_v12  ;;  %v5197_v43 = vclamps-f32 %v1954_v54, 5.0  ;;  %v2648_v55 = vadd.f32 %v2528_v37, %v2456_v30  ;;  %2557 = vadd.xlane.f32.xlu1 %v2407_v6  ;;  %6135 = vpow2.f32 %v2193_v34  ;;  %v2460_v12 = vld [vmem:[#allocation6 + $0x58] sm:$0xff]  ;;  %v2457_v34 = vld [vmem:[#allocation6 + $0x40] sm:$0xff] }
 0x467   : > { %v2195_v11 = vmul.f32 1.442695, %v5199_v39  ;;  %5787 = vmatprep.mubr.msk.bf16.mxu1 %vm7440_vm8, %v5271_v35  ;;  %v2408_v60 = vsel %vm8383_vm2, %v7530_v23, 0.0  ;;  %2710 = vst.msk [vmem:[#allocation6 + $0x20] sm:$0xff] %vm8384_vm1, %v2645_v49  ;;  %v2424_v23 = vsel %vm8383_vm2, %v6124_v5, 0.0  ;;  %vm8386_vm2 = vnez %v8334_v28 }
 0x468   : > { %6137 = vpow2.f32 %v2189_v41  ;;  %v2191_v22 = vmul.f32 1.442695, %v5197_v43  ;;  %5788 = vmatmul.mubr.msk.bf16.gmra.mrb[52].mxu1 %vm7452_vm14, %v5274_v20  ;;  %2713 = vst.msk [vmem:[#allocation6 + $0x38] sm:$0xff] %vm8382_vm7, %v2648_v55  ;;  %v7624_v25 = vpop.eup %6127  ;;  %2559 = vadd.xlane.f32.xlu0 %v2408_v60  ;;  %v2534_v29 = vpop.xlane.xlu1 %2533  ;;  %vm8385_vm7 = vmmov %vm8384_vm1  ;;  %v2405_v55 = vsel %vm8386_vm2, %v7528_v27, 0.0  ;;  %v2421_v27 = vsel %vm8386_vm2, %v7600_v62, 0.0 }
 0x469   : > { %6139 = vpow2.f32 %v2195_v11  ;;  %v2524_v3 = vpop.xlane.xlu0 %2523  ;;  %v7627_v15 = vpop.eup %6129  ;;  %v2651_v6 = vadd.f32 %v2534_v29, %v2459_v1  ;;  %vm8388_vm9 = vmmov %vm8385_vm7 }
 0x46a   : > { %6141 = vpow2.f32 %v2191_v22  ;;  %v2646_v46 = vadd.f32 %v2524_v3, %v2454_v7  ;;  %2589 = vadd.xlane.f32.xlu1 %v2423_v63  ;;  %v2458_v22 = vld [vmem:[#allocation6 + $0x48] sm:$0xff] }
 0x46b   : > { %v7631_v30 = vpop.eup %6131  ;;  %v5689_v20 = vpop.f32.mrb[32].mxu0  ;;  %2716 = vst.msk [vmem:[#allocation6 + $0x50] sm:$0xff] %vm8385_vm7, %v2651_v6 }
 0x46c   : > { %v7633_v54 = vpop.eup %6133  ;;  %v5280_v36 = vpack.c.bf16 %v7631_v30, %v7624_v25  ;;  %2711 = vst.msk [vmem:[#allocation6 + $0x28] sm:$0xff] %vm8384_vm1, %v2646_v46  ;;  %v1959_v39 = vmul.f32 0.35355338, %v5689_v20  ;;  %v1846_v35 = vpop.f32.mrb[33].mxu0  ;;  %2591 = vadd.xlane.f32.xlu0 %v2424_v23  ;;  %vm8387_vm1 = vnez %v8342_v57  ;;  %v2463_v46 = vld [vmem:[#allocation6 + $0x70] sm:$0xff] }
 0x46d   : > { %v5277_v5 = vpack.c.bf16 %v7633_v54, %v7627_v15  ;;  %v2536_v37 = vpop.xlane.xlu0 %2535  ;;  %v1957_v41 = vmul.f32 0.35355338, %v1846_v35  ;;  %v5690_v43 = vpop.f32.mrb[34].mxu0  ;;  %v2406_v23 = vsel %vm8387_vm1, %v7532_v32, 0.0  ;;  %v2422_v62 = vsel %vm8387_vm1, %v7605_v14, 0.0  ;;  %v2461_v14 = vld [vmem:[#allocation6 + $0x60] sm:$0xff] }
 0x46e   : > { %v2652_v47 = vadd.f32 %v2536_v37, %v2460_v12  ;;  %v2530_v11 = vpop.xlane.xlu1 %2529  ;;  %v5202_v49 = vclamps-f32 %v1959_v39, 5.0  ;;  %v1960_v7 = vmul.f32 0.35355338, %v5690_v43  ;;  %v1849_v60 = vpop.f32.mrb[35].mxu0  ;;  %2553 = vadd.xlane.f32.xlu1 %v2405_v55  ;;  %v2464_v43 = vld [vmem:[#allocation6 + $0x78] sm:$0xff] }
 0x46f   : > { %5791 = vmatprep.mubr.msk.bf16.mxu1 %vm7474_vm11, %v5277_v5  ;;  %v2649_v63 = vadd.f32 %v2530_v11, %v2457_v34  ;;  %v5200_v1 = vclamps-f32 %v1957_v41, 5.0  ;;  %v1958_v3 = vmul.f32 0.35355338, %v1849_v60 }
 0x470   : > { %5792 = vmatmul.mubr.msk.bf16.gmra.mrb[56].mxu1 %vm7485_vm10, %v5280_v36  ;;  %2717 = vst.msk [vmem:[#allocation6 + $0x58] sm:$0xff] %vm8385_vm7, %v2652_v47  ;;  %v7655_v29 = vpop.eup %6135  ;;  %v2201_v6 = vmul.f32 1.442695, %v5202_v49  ;;  %v5203_v12 = vclamps-f32 %v1960_v7, 5.0  ;;  %2555 = vadd.xlane.f32.xlu0 %v2406_v23  ;;  %v2411_v23 = vsel %vm7340_vm0, %v7542_v4, 0.0  ;;  %v2427_v4 = vsel %vm7340_vm0, %v7624_v25, 0.0 }
 0x471   : > { %2714 = vst.msk [vmem:[#allocation6 + $0x40] sm:$0xff] %vm8388_vm9, %v2649_v63  ;;  %v2532_v20 = vpop.xlane.xlu0 %2531  ;;  %v2197_v32 = vmul.f32 1.442695, %v5200_v1  ;;  %v5201_v39 = vclamps-f32 %v1958_v3, 5.0  ;;  %vm8389_vm9 = vmmov %vm8385_vm7 }
 0x472   : > { %v7658_v34 = vpop.eup %6137  ;;  %v2650_v36 = vadd.f32 %v2532_v20, %v2458_v22  ;;  %v2542_v35 = vpop.xlane.xlu1 %2541  ;;  %6143 = vpow2.f32 %v2201_v6  ;;  %v2203_v37 = vmul.f32 1.442695, %v5203_v12  ;;  %2585 = vadd.xlane.f32.xlu1 %v2421_v27 }
 0x473   : > { %v7663_v5 = vpop.eup %6139  ;;  %v2655_v41 = vadd.f32 %v2542_v35, %v2463_v46  ;;  %6145 = vpow2.f32 %v2197_v32  ;;  %v2199_v47 = vmul.f32 1.442695, %v5201_v39  ;;  %v5693_v11 = vpop.f32.mrb[36].mxu0  ;;  %v2462_v39 = vld [vmem:[#allocation6 + $0x68] sm:$0xff]  ;;  %v2412_v35 = vsel %vm7394_vm6, %v7546_v16, 0.0 }
 0x474   : > { %v7665_v55 = vpop.eup %6141  ;;  %v5286_v49 = vpack.c.bf16 %v7663_v5, %v7655_v29  ;;  %2715 = vst.msk [vmem:[#allocation6 + $0x48] sm:$0xff] %vm8389_vm9, %v2650_v36  ;;  %6147 = vpow2.f32 %v2203_v37  ;;  %v1963_v7 = vmul.f32 0.35355338, %v5693_v11  ;;  %v1862_v60 = vpop.f32.mrb[37].mxu0  ;;  %2587 = vadd.xlane.f32.xlu0 %v2422_v62  ;;  %vm8390_vm9 = vmmov %vm8385_vm7  ;;  %v2428_v16 = vsel %vm7394_vm6, %v7631_v30, 0.0 }
 0x475   : > { %v5283_v63 = vpack.c.bf16 %v7665_v55, %v7658_v34  ;;  %2720 = vst.msk [vmem:[#allocation6 + $0x70] sm:$0xff] %vm8385_vm7, %v2655_v41  ;;  %v2544_v22 = vpop.xlane.xlu0 %2543  ;;  %6149 = vpow2.f32 %v2199_v47  ;;  %v1961_v1 = vmul.f32 0.35355338, %v1862_v60  ;;  %v5694_v3 = vpop.f32.mrb[38].mxu0 }
 0x476   : > { %v2656_v27 = vadd.f32 %v2544_v22, %v2464_v43  ;;  %v2538_v46 = vpop.xlane.xlu1 %2537  ;;  %v5206_v6 = vclamps-f32 %v1963_v7, 5.0  ;;  %v1964_v12 = vmul.f32 0.35355338, %v5694_v3  ;;  %v1865_v20 = vpop.f32.mrb[39].mxu0  ;;  %2565 = vadd.xlane.f32.xlu1 %v2411_v23 }
 0x477   : > { %5795 = vmatprep.mubr.msk.bf16.mxu1 %vm7495_vm12, %v5283_v63  ;;  %v2653_v32 = vadd.f32 %v2538_v46, %v2461_v14  ;;  %v5204_v62 = vclamps-f32 %v1961_v1, 5.0  ;;  %v1962_v36 = vmul.f32 0.35355338, %v1865_v20 }
 0x478   : > { %5796 = vmatmul.mubr.msk.bf16.gmra.mrb[60].mxu1 %vm7505_vm4, %v5286_v49  ;;  %2721 = vst.msk [vmem:[#allocation6 + $0x78] sm:$0xff] %vm8390_vm9, %v2656_v27  ;;  %v2209_v37 = vmul.f32 1.442695, %v5206_v6  ;;  %v5207_v41 = vclamps-f32 %v1964_v12, 5.0  ;;  %2567 = vadd.xlane.f32.xlu0 %v2412_v35  ;;  %vm8391_vm9 = vmmov %vm8385_vm7 }
 0x479   : > { %2718 = vst.msk [vmem:[#allocation6 + $0x60] sm:$0xff] %vm8385_vm7, %v2653_v32  ;;  %v2540_v43 = vpop.xlane.xlu0 %2539  ;;  %v2205_v47 = vmul.f32 1.442695, %v5204_v62  ;;  %v5205_v11 = vclamps-f32 %v1962_v36, 5.0  ;;  %vm8392_vm7 = vnez %v8354_v59 }
 0x47a   : > { %v2654_v14 = vadd.f32 %v2540_v43, %v2462_v39  ;;  %6151 = vpow2.f32 %v2209_v37  ;;  %v2211_v25 = vmul.f32 1.442695, %v5207_v41  ;;  %2597 = vadd.xlane.f32.xlu1 %v2427_v4  ;;  %v2409_v23 = vsel %vm8392_vm7, %v7544_v9, 0.0 }
 0x47b   : > { %6153 = vpow2.f32 %v2205_v47  ;;  %v2207_v49 = vmul.f32 1.442695, %v5205_v11  ;;  %v5697_v7 = vpop.f32.mrb[40].mxu0  ;;  %v2425_v9 = vsel %vm8392_vm7, %v7627_v15, 0.0 }
 0x47c   : > { %2719 = vst.msk [vmem:[#allocation6 + $0x68] sm:$0xff] %vm8391_vm9, %v2654_v14  ;;  %v7692_v60 = vpop.eup %6143  ;;  %6155 = vpow2.f32 %v2211_v25  ;;  %v1967_v63 = vmul.f32 0.35355338, %v5697_v7  ;;  %v1878_v22 = vpop.f32.mrb[41].mxu0  ;;  %2599 = vadd.xlane.f32.xlu0 %v2428_v16  ;;  %vm8393_vm9 = vnez %v8356_v8  ;;  %v2776_v8 = vld [vmem:[#allocation5 + $0x30] sm:$0xff] }
 0x47d   : > { %v7694_v1 = vpop.eup %6145  ;;  %6157 = vpow2.f32 %v2207_v49  ;;  %v1965_v3 = vmul.f32 0.35355338, %v1878_v22  ;;  %v5698_v30 = vpop.f32.mrb[42].mxu0  ;;  %v2410_v20 = vsel %vm8393_vm9, %v7548_v21, 0.0  ;;  %v2426_v21 = vsel %vm8393_vm9, %v7633_v54, 0.0 }
 0x47e   : > { %v7699_v27 = vpop.eup %6147  ;;  %v5210_v46 = vclamps-f32 %v1967_v63, 5.0  ;;  %v1968_v6 = vmul.f32 0.35355338, %v5698_v30  ;;  %v1881_v12 = vpop.f32.mrb[43].mxu0  ;;  %2561 = vadd.xlane.f32.xlu1 %v2409_v23  ;;  %v2433_v40 = vsel %vm8378_vm5, %v7694_v1, 0.0  ;;  %vm8401_vm5 = vnez %v8332_v26 }
 0x47f   : > { %v7704_v32 = vpop.eup %6149  ;;  %v5292_v39 = vpack.c.bf16 %v7699_v27, %v7692_v60  ;;  %v5208_v62 = vclamps-f32 %v1965_v3, 5.0  ;;  %v1966_v36 = vmul.f32 0.35355338, %v1881_v12  ;;  %v2431_v12 = vsel %vm7420_vm3, %v7655_v29, 0.0 }
 0x480   : > { %v2217_v35 = vmul.f32 1.442695, %v5210_v46  ;;  %v5211_v4 = vclamps-f32 %v1968_v6, 5.0  ;;  %2563 = vadd.xlane.f32.xlu0 %v2410_v20  ;;  %v5289_v37 = vpack.c.bf16 %v7704_v32, %v7694_v1 }
 0x481   : > { %v2213_v41 = vmul.f32 1.442695, %v5208_v62  ;;  %v5209_v43 = vclamps-f32 %v1966_v36, 5.0 }
 0x482   : > { %6159 = vpow2.f32 %v2217_v35  ;;  %v2219_v47 = vmul.f32 1.442695, %v5211_v4  ;;  %5815 = vmatprep.mubr.msk.bf16.mxu0 %vm7317_vm13, %v5289_v37  ;;  %2593 = vadd.xlane.f32.xlu1 %v2425_v9  ;;  %vm8394_vm13 = vnez %v8360_v18 }
 0x483   : > { %6161 = vpow2.f32 %v2213_v41  ;;  %v2215_v15 = vmul.f32 1.442695, %v5209_v43  ;;  %v5701_v11 = vpop.f32.mrb[44].mxu0  ;;  %5816 = vmatmul.mubr.msk.bf16.vlgmr.msra.gmra.mrb[64].mxu0 %vm8377_vm15, %v5292_v39  ;;  %v2416_v30 = vsel %vm8394_vm13, %v7562_v10, 0.0  ;;  %v2432_v10 = vsel %vm8394_vm13, %v7663_v5, 0.0 }
 0x484   : > { %v7720_v16 = vpop.eup %6151  ;;  %6163 = vpow2.f32 %v2219_v47  ;;  %v1971_v14 = vmul.f32 0.35355338, %v5701_v11  ;;  %v1894_v25 = vpop.f32.mrb[45].mxu0  ;;  %2595 = vadd.xlane.f32.xlu0 %v2426_v21  ;;  %vm8395_vm15 = vnez %v8362_v19  ;;  %vm8398_vm13 = vnez %v8328_v58 }
 0x485   : > { %v7722_v49 = vpop.eup %6153  ;;  %6165 = vpow2.f32 %v2215_v15  ;;  %v1969_v54 = vmul.f32 0.35355338, %v1894_v25  ;;  %v5702_v7 = vpop.f32.mrb[46].mxu0  ;;  %v2413_v5 = vsel %vm8395_vm15, %v7560_v61, 0.0  ;;  %v2429_v31 = vsel %vm8395_vm15, %v7658_v34, 0.0 }
 0x486   : > { %v7727_v63 = vpop.eup %6155  ;;  %v5214_v22 = vclamps-f32 %v1971_v14, 5.0  ;;  %v1972_v50 = vmul.f32 0.35355338, %v5702_v7  ;;  %v1897_v3 = vpop.f32.mrb[47].mxu0  ;;  %2573 = vadd.xlane.f32.xlu1 %v2415_v45  ;;  %v2437_v42 = vsel %vm8386_vm2, %v7722_v49, 0.0 }
 0x487   : > { %v7732_v23 = vpop.eup %6157  ;;  %v5212_v46 = vclamps-f32 %v1969_v54, 5.0  ;;  %v1970_v6 = vmul.f32 0.35355338, %v1897_v3  ;;  %v5298_v48 = vpack.c.bf16 %v7727_v63, %v7720_v16  ;;  %v2440_v51 = vsel %vm8401_vm5, %v7727_v63, 0.0 }
 0x488   : > { %v2225_v20 = vmul.f32 1.442695, %v5214_v22  ;;  %v5215_v39 = vclamps-f32 %v1972_v50, 5.0  ;;  %2575 = vadd.xlane.f32.xlu0 %v2416_v30  ;;  %v5295_v62 = vpack.c.bf16 %v7732_v23, %v7722_v49  ;;  %v2774_v30 = vld [vmem:[#allocation5 + $0x20] sm:$0xff]  ;;  %vm8417_vm5 = vcmask 7168  }
 0x489   : > { %v2221_v36 = vmul.f32 1.442695, %v5212_v46  ;;  %v5213_v9 = vclamps-f32 %v1970_v6, 5.0  ;;  %v2777_v6 = vld [vmem:[#allocation5 + $0x38] sm:$0xff] }
 0x48a   : > { %6167 = vpow2.f32 %v2225_v20  ;;  %v2227_v35 = vmul.f32 1.442695, %v5215_v39  ;;  %5819 = vmatprep.mubr.msk.bf16.mxu0 %vm7440_vm8, %v5295_v62  ;;  %2605 = vadd.xlane.f32.xlu1 %v2431_v12  ;;  %vm8396_vm8 = vnez %v8368_v33  ;;  %v2775_v33 = vld [vmem:[#allocation5 + $0x28] sm:$0xff]  ;;  %v2780_v39 = vld [vmem:[#allocation5 + $0x50] sm:$0xff]  ;;  %v2778_v62 = vld [vmem:[#allocation5 + $0x40] sm:$0xff] }
 0x48b   : > { %6169 = vpow2.f32 %v2221_v36  ;;  %v2223_v29 = vmul.f32 1.442695, %v5213_v9  ;;  %5820 = vmatmul.mubr.msk.bf16.gmra.mrb[68].mxu0 %vm7452_vm14, %v5298_v48  ;;  %v2414_v24 = vsel %vm8396_vm8, %v7564_v2, 0.0  ;;  %v2430_v15 = vsel %vm8396_vm8, %v7665_v55, 0.0 }
 0x48c   : > { %v6160_v4 = vpop.eup %6159  ;;  %6171 = vpow2.f32 %v2227_v35  ;;  %2607 = vadd.xlane.f32.xlu0 %v2432_v10  ;;  %vm8397_vm14 = vnez %v8324_v53  ;;  %v2436_v55 = vsel %vm8398_vm13, %v7699_v27, 0.0  ;;  %v2781_v35 = vld [vmem:[#allocation5 + $0x58] sm:$0xff] }
 0x48d   : > { %v6162_v37 = vpop.eup %6161  ;;  %6173 = vpow2.f32 %v2223_v29  ;;  %v2435_v34 = vsel %vm8397_vm14, %v7692_v60, 0.0  ;;  %v2770_v60 = vld [vmem:[#allocation5] sm:$0xff]  ;;  %v2443_v26 = vsel %vm7340_vm0, %v6160_v4, 0.0 }
 0x48e   : > { %v6164_v41 = vpop.eup %6163  ;;  %2569 = vadd.xlane.f32.xlu1 %v2413_v5  ;;  %v2441_v0 = vsel %vm8392_vm7, %v6162_v37, 0.0 }
 0x48f   : > { %v6166_v43 = vpop.eup %6165  ;;  %v5304_v21 = vpack.c.bf16 %v6164_v41, %v6160_v4  ;;  %v2444_v57 = vsel %vm7394_vm6, %v6164_v41, 0.0  ;;  %vm8406_vm6 = vnez %v8360_v18 }
 0x490   : > { %2571 = vadd.xlane.f32.xlu0 %v2414_v24  ;;  %v5301_v47 = vpack.c.bf16 %v6166_v43, %v6162_v37  ;;  %v2442_v63 = vsel %vm8393_vm9, %v6166_v43, 0.0  ;;  %v2779_v37 = vld [vmem:[#allocation5 + $0x48] sm:$0xff]  ;;  %v2784_v43 = vld [vmem:[#allocation5 + $0x70] sm:$0xff]  ;;  %v2782_v24 = vld [vmem:[#allocation5 + $0x60] sm:$0xff] }
 0x492   : > { %5823 = vmatprep.mubr.msk.bf16.mxu0 %vm7474_vm11, %v5301_v47  ;;  %2601 = vadd.xlane.f32.xlu1 %v2429_v31  ;;  %vm8400_vm11 = vnez %v8330_v17  ;;  %v2773_v17 = vld [vmem:[#allocation5 + $0x18] sm:$0xff]  ;;  %v2467_v31 = vld [vmem:[#allocation6 + $0x90] sm:$0xff] }
 0x493   : > { %5824 = vmatmul.mubr.msk.bf16.gmra.mrb[72].mxu0 %vm7485_vm10, %v5304_v21  ;;  %vm8399_vm10 = vnez %v8322_v52  ;;  %v2439_v58 = vsel %vm8400_vm11, %v7720_v16, 0.0  ;;  %v2438_v52 = vsel %vm8387_vm1, %v7732_v23, 0.0  ;;  %v2771_v16 = vld [vmem:[#allocation5 + $0x8] sm:$0xff]  ;;  %v2785_v47 = vld [vmem:[#allocation5 + $0x78] sm:$0xff] }
 0x494   : > { %v6168_v61 = vpop.eup %6167  ;;  %2603 = vadd.xlane.f32.xlu0 %v2430_v15  ;;  %v2434_v53 = vsel %vm8399_vm10, %v7704_v32, 0.0 }
 0x495   : > { %v6170_v2 = vpop.eup %6169  ;;  %v2447_v50 = vsel %vm7420_vm3, %v6168_v61, 0.0 }
 0x496   : > { %v6172_v11 = vpop.eup %6171  ;;  %2613 = vadd.xlane.f32.xlu1 %v2435_v34  ;;  %v2445_v56 = vsel %vm8395_vm15, %v6170_v2, 0.0 }
 0x497   : > { %v6174_v14 = vpop.eup %6173  ;;  %v5310_v38 = vpack.c.bf16 %v6172_v11, %v6168_v61  ;;  %v2448_v59 = vsel %vm8406_vm6, %v6172_v11, 0.0  ;;  %v2468_v11 = vld [vmem:[#allocation6 + $0x98] sm:$0xff] }
 0x498   : > { %2615 = vadd.xlane.f32.xlu0 %v2436_v55  ;;  %v5307_v25 = vpack.c.bf16 %v6174_v14, %v6170_v2  ;;  %v2446_v22 = vsel %vm8396_vm8, %v6174_v14, 0.0  ;;  %v2783_v2 = vld [vmem:[#allocation5 + $0x68] sm:$0xff] }
 0x49a   : > { %5827 = vmatprep.mubr.msk.bf16.mxu0 %vm7495_vm12, %v5307_v25  ;;  %2609 = vadd.xlane.f32.xlu1 %v2433_v40 }
 0x49b   : > { %5828 = vmatmul.mubr.msk.bf16.gmra.mrb[76].mxu0 %vm7505_vm4, %v5310_v38  ;;  %vm8402_vm4 = vcmask 64512  }
 0x49c   : > { %2611 = vadd.xlane.f32.xlu0 %v2434_v53  ;;  %vm8403_vm12 = vmmov %vm8402_vm4 }
 0x49d   : > { %vm8404_vm2 = vmmov %vm8402_vm4 }
 0x49e   : > { %2621 = vadd.xlane.f32.xlu1 %v2439_v58  ;;  %vm8405_vm0 = vmmov %vm8404_vm2 }
 0x49f   : > { %vm8407_vm1 = vmmov %vm8405_vm0 }
 0x4a0   : > { %2623 = vadd.xlane.f32.xlu0 %v2440_v51  ;;  %vm8408_vm7 = vmmov %vm8405_vm0 }
 0x4a1   : > { %vm8409_vm3 = vmmov %vm8405_vm0 }
 0x4a2   : > { %2617 = vadd.xlane.f32.xlu1 %v2437_v42  ;;  %vm8410_vm9 = vmmov %vm8405_vm0  ;;  %v2483_v42 = vld [vmem:[#allocation6 + $0x110] sm:$0xff] }
 0x4a3   : > { %v5721_v1 = vpop.f32.mrb[32].mxu1  ;;  %vm8411_vm13 = vmmov %vm8405_vm0 }
 0x4a4   : > { %2619 = vadd.xlane.f32.xlu0 %v2438_v52  ;;  %v3288_v27 = vadd.f32 %v5721_v1, %v2772_v44  ;;  %v2932_v32 = vpop.f32.mrb[33].mxu1  ;;  %vm8412_vm15 = vmmov %vm8405_vm0 }
 0x4a5   : > { %v3286_v54 = vadd.f32 %v2932_v32, %v2770_v60  ;;  %v5722_v7 = vpop.f32.mrb[34].mxu1  ;;  %vm8413_vm8 = vmmov %vm8405_vm0  ;;  %v2484_v60 = vld [vmem:[#allocation6 + $0x118] sm:$0xff] }
 0x4a6   : > { %2629 = vadd.xlane.f32.xlu1 %v2443_v26  ;;  %3352 = vst.msk [vmem:[#allocation5 + $0x10] sm:$0xff] %vm8402_vm4, %v3288_v27  ;;  %v3289_v28 = vadd.f32 %v5722_v7, %v2773_v17  ;;  %v2935_v49 = vpop.f32.mrb[35].mxu1  ;;  %vm8414_vm14 = vmmov %vm8405_vm0  ;;  %v2465_v17 = vld [vmem:[#allocation6 + $0x80] sm:$0xff] }
 0x4a7   : > { %3350 = vst.msk [vmem:[#allocation5] sm:$0xff] %vm8403_vm12, %v3286_v54  ;;  %v3287_v45 = vadd.f32 %v2935_v49, %v2771_v16  ;;  %vm8415_vm10 = vmmov %vm8405_vm0  ;;  %v2466_v16 = vld [vmem:[#allocation6 + $0x88] sm:$0xff]  ;;  %v2481_v7 = vld [vmem:[#allocation6 + $0x100] sm:$0xff] }
 0x4a8   : > { %2631 = vadd.xlane.f32.xlu0 %v2444_v57  ;;  %3353 = vst.msk [vmem:[#allocation5 + $0x18] sm:$0xff] %vm8404_vm2, %v3289_v28  ;;  %vm8416_vm11 = vmmov %vm8405_vm0  ;;  %v2482_v57 = vld [vmem:[#allocation6 + $0x108] sm:$0xff] }
 0x4a9   : > { %3351 = vst.msk [vmem:[#allocation5 + $0x8] sm:$0xff] %vm8405_vm0, %v3287_v45  ;;  %vm8418_vm4 = vmmov %vm8405_vm0 }
 0x4aa   : > { %2625 = vadd.xlane.f32.xlu1 %v2441_v0  ;;  %vm8419_vm12 = vmmov %vm8405_vm0 }
 0x4ab   : > { %vm8420_vm2 = vmmov %vm8417_vm5 }
 0x4ac   : > { %2627 = vadd.xlane.f32.xlu0 %v2442_v63  ;;  %vm8421_vm0 = vmmov %vm8420_vm2  ;;  %v2471_v63 = vld [vmem:[#allocation6 + $0xb0] sm:$0xff] }
 0x4ad   : > { %vm8422_vm6 = vmmov %vm8421_vm0 }
 0x4ae   : > { %2633 = vadd.xlane.f32.xlu1 %v2445_v56 }
 0x4b0   : > { %2635 = vadd.xlane.f32.xlu0 %v2446_v22 }
 0x4b2   : > { %2637 = vadd.xlane.f32.xlu1 %v2447_v50  ;;  %v2472_v50 = vld [vmem:[#allocation6 + $0xb8] sm:$0xff] }
 0x4b3   : > { %v5725_v3 = vpop.f32.mrb[36].mxu1 }
 0x4b4   : > { %2639 = vadd.xlane.f32.xlu0 %v2448_v59  ;;  %v2948_v23 = vpop.f32.mrb[37].mxu1  ;;  %v3292_v46 = vadd.f32 %v5725_v3, %v2776_v8  ;;  %v2487_v8 = vld [vmem:[#allocation6 + $0x130] sm:$0xff] }
 0x4b5   : > { %v3290_v19 = vadd.f32 %v2948_v23, %v2774_v30  ;;  %v5726_v12 = vpop.f32.mrb[38].mxu1 }
 0x4b6   : > { %v3293_v48 = vadd.f32 %v5726_v12, %v2777_v6  ;;  %v2951_v20 = vpop.f32.mrb[39].mxu1  ;;  %3356 = vst.msk [vmem:[#allocation5 + $0x30] sm:$0xff] %vm8407_vm1, %v3292_v46  ;;  %vm8423_vm1 = vmmov %vm8421_vm0  ;;  %v2488_v46 = vld [vmem:[#allocation6 + $0x138] sm:$0xff]  ;;  %v2469_v12 = vld [vmem:[#allocation6 + $0xa0] sm:$0xff] }
 0x4b7   : > { %3354 = vst.msk [vmem:[#allocation5 + $0x20] sm:$0xff] %vm8408_vm7, %v3290_v19  ;;  %v3291_v13 = vadd.f32 %v2951_v20, %v2775_v33  ;;  %vm8424_vm7 = vmmov %vm8421_vm0  ;;  %v2470_v20 = vld [vmem:[#allocation6 + $0xa8] sm:$0xff] }
 0x4b8   : > { %3357 = vst.msk [vmem:[#allocation5 + $0x38] sm:$0xff] %vm8409_vm3, %v3293_v48  ;;  %vm8425_vm3 = vmmov %vm8421_vm0 }
 0x4b9   : > { %3355 = vst.msk [vmem:[#allocation5 + $0x28] sm:$0xff] %vm8410_vm9, %v3291_v13  ;;  %vm8426_vm9 = vmmov %vm8421_vm0 }
 0x4bb   : > { %v5729_v18 = vpop.f32.mrb[40].mxu1 }
 0x4bc   : > { %v2964_v36 = vpop.f32.mrb[41].mxu1  ;;  %v3296_v9 = vadd.f32 %v5729_v18, %v2780_v39  ;;  %v2485_v39 = vld [vmem:[#allocation6 + $0x120] sm:$0xff] }
 0x4bd   : > { %v3294_v10 = vadd.f32 %v2964_v36, %v2778_v62  ;;  %v5730_v29 = vpop.f32.mrb[42].mxu1 }
 0x4be   : > { %v3297_v4 = vadd.f32 %v5730_v29, %v2781_v35  ;;  %v2967_v5 = vpop.f32.mrb[43].mxu1  ;;  %3360 = vst.msk [vmem:[#allocation5 + $0x50] sm:$0xff] %vm8411_vm13, %v3296_v9  ;;  %vm8427_vm13 = vmmov %vm8421_vm0  ;;  %v2486_v9 = vld [vmem:[#allocation6 + $0x128] sm:$0xff]  ;;  %v2475_v29 = vld [vmem:[#allocation6 + $0xd0] sm:$0xff] }
 0x4bf   : > { %3358 = vst.msk [vmem:[#allocation5 + $0x40] sm:$0xff] %vm8412_vm15, %v3294_v10  ;;  %v3295_v41 = vadd.f32 %v2967_v5, %v2779_v37  ;;  %vm8428_vm15 = vmmov %vm8421_vm0  ;;  %v2476_v5 = vld [vmem:[#allocation6 + $0xd8] sm:$0xff] }
 0x4c0   : > { %3361 = vst.msk [vmem:[#allocation5 + $0x58] sm:$0xff] %vm8413_vm8, %v3297_v4  ;;  %vm8429_vm8 = vmmov %vm8421_vm0 }
 0x4c1   : > { %3359 = vst.msk [vmem:[#allocation5 + $0x48] sm:$0xff] %vm8414_vm14, %v3295_v41  ;;  %vm8430_vm14 = vmmov %vm8421_vm0 }
 0x4c3   : > { %v5733_v21 = vpop.f32.mrb[44].mxu1 }
 0x4c4   : > { %v3300_v15 = vadd.f32 %v5733_v21, %v2784_v43  ;;  %v2980_v61 = vpop.f32.mrb[45].mxu1 }
 0x4c5   : > { %v3298_v14 = vadd.f32 %v2980_v61, %v2782_v24  ;;  %v5734_v55 = vpop.f32.mrb[46].mxu1  ;;  %v2491_v24 = vld [vmem:[#allocation6 + $0x150] sm:$0xff] }
 0x4c6   : > { %3364 = vst.msk [vmem:[#allocation5 + $0x70] sm:$0xff] %vm8415_vm10, %v3300_v15  ;;  %v3301_v25 = vadd.f32 %v5734_v55, %v2785_v47  ;;  %v2983_v40 = vpop.f32.mrb[47].mxu1  ;;  %vm8431_vm10 = vmmov %vm8421_vm0  ;;  %v2492_v47 = vld [vmem:[#allocation6 + $0x158] sm:$0xff] }
 0x4c7   : > { %3362 = vst.msk [vmem:[#allocation5 + $0x60] sm:$0xff] %vm8416_vm11, %v3298_v14  ;;  %v3299_v58 = vadd.f32 %v2983_v40, %v2783_v2  ;;  %vm8432_vm11 = vmmov %vm8421_vm0  ;;  %v2473_v2 = vld [vmem:[#allocation6 + $0xc0] sm:$0xff]  ;;  %v2474_v14 = vld [vmem:[#allocation6 + $0xc8] sm:$0xff] }
 0x4c8   : > { %3365 = vst.msk [vmem:[#allocation5 + $0x78] sm:$0xff] %vm8418_vm4, %v3301_v25  ;;  %vm8434_vm4 = vmmov %vm8421_vm0  ;;  %v2489_v25 = vld [vmem:[#allocation6 + $0x140] sm:$0xff] }
 0x4c9   : > { %3363 = vst.msk [vmem:[#allocation5 + $0x68] sm:$0xff] %vm8419_vm12, %v3299_v58  ;;  %vm8435_vm12 = vmmov %vm8421_vm0  ;;  %v2490_v58 = vld [vmem:[#allocation6 + $0x148] sm:$0xff] }
 0x4cb   : > { %v2550_v34 = vpop.xlane.xlu1 %2549 }
 0x4cc   : > { %v2659_v38 = vadd.f32 %v2550_v34, %v2467_v31 }
 0x4cd   : > { %v2552_v53 = vpop.xlane.xlu0 %2551 }
 0x4ce   : > { %2724 = vst.msk [vmem:[#allocation6 + $0x90] sm:$0xff] %vm8417_vm5, %v2659_v38  ;;  %v2660_v51 = vadd.f32 %v2552_v53, %v2468_v11  ;;  %vm8433_vm5 = vmmov %vm8421_vm0 }
 0x4d0   : > { %2725 = vst.msk [vmem:[#allocation6 + $0x98] sm:$0xff] %vm8420_vm2, %v2660_v51  ;;  %vm8436_vm2 = vmmov %vm8421_vm0 }
 0x4e7   : > { %v2582_v44 = vpop.xlane.xlu1 %2581 }
 0x4e8   : > { %v2675_v52 = vadd.f32 %v2582_v44, %v2483_v42  ;;  %v2479_v44 = vld [vmem:[#allocation6 + $0xf0] sm:$0xff] }
 0x4e9   : > { %v2584_v1 = vpop.xlane.xlu0 %2583 }
 0x4ea   : > { %2740 = vst.msk [vmem:[#allocation6 + $0x110] sm:$0xff] %vm8421_vm0, %v2675_v52  ;;  %v2676_v27 = vadd.f32 %v2584_v1, %v2484_v60  ;;  %v2480_v1 = vld [vmem:[#allocation6 + $0xf8] sm:$0xff] }
 0x4eb   : > { %v2546_v32 = vpop.xlane.xlu1 %2545 }
 0x4ec   : > { %2741 = vst.msk [vmem:[#allocation6 + $0x118] sm:$0xff] %vm8422_vm6, %v2676_v27  ;;  %v2657_v26 = vadd.f32 %v2546_v32, %v2465_v17  ;;  %vm8437_vm6 = vmmov %vm8421_vm0  ;;  %v2788_v27 = vld [vmem:[#allocation5 + $0x90] sm:$0xff] }
 0x4ed   : > { %v2548_v54 = vpop.xlane.xlu0 %2547 }
 0x4ee   : > { %2722 = vst.msk [vmem:[#allocation6 + $0x80] sm:$0xff] %vm8423_vm1, %v2657_v26  ;;  %v2658_v28 = vadd.f32 %v2548_v54, %v2466_v16  ;;  %vm8438_vm1 = vmmov %vm8421_vm0  ;;  %v2786_v16 = vld [vmem:[#allocation5 + $0x80] sm:$0xff]  ;;  %v2495_v26 = vld [vmem:[#allocation6 + $0x170] sm:$0xff] }
 0x4ef   : > { %v2578_v49 = vpop.xlane.xlu1 %2577 }
 0x4f0   : > { %2723 = vst.msk [vmem:[#allocation6 + $0x88] sm:$0xff] %vm8424_vm7, %v2658_v28  ;;  %v2673_v45 = vadd.f32 %v2578_v49, %v2481_v7  ;;  %vm8439_vm7 = vmmov %vm8421_vm0  ;;  %v2789_v28 = vld [vmem:[#allocation5 + $0x98] sm:$0xff] }
 0x4f1   : > { %v2580_v0 = vpop.xlane.xlu0 %2579 }
 0x4f2   : > { %2738 = vst.msk [vmem:[#allocation6 + $0x100] sm:$0xff] %vm8425_vm3, %v2673_v45  ;;  %v2674_v56 = vadd.f32 %v2580_v0, %v2482_v57  ;;  %vm8440_vm3 = vmmov %vm8421_vm0  ;;  %v2787_v0 = vld [vmem:[#allocation5 + $0x88] sm:$0xff] }
 0x4f3   : > { %v2558_v22 = vpop.xlane.xlu1 %2557 }
 0x4f4   : > { %2739 = vst.msk [vmem:[#allocation6 + $0x108] sm:$0xff] %vm8426_vm9, %v2674_v56  ;;  %v2663_v59 = vadd.f32 %v2558_v22, %v2471_v63  ;;  %vm8441_vm9 = vmmov %vm8421_vm0  ;;  %v2496_v63 = vld [vmem:[#allocation6 + $0x178] sm:$0xff] }
 0x4f5   : > { %v2560_v3 = vpop.xlane.xlu0 %2559 }
 0x4f6   : > { %2728 = vst.msk [vmem:[#allocation6 + $0xb0] sm:$0xff] %vm8427_vm13, %v2663_v59  ;;  %v2664_v30 = vadd.f32 %v2560_v3, %v2472_v50  ;;  %vm8442_vm13 = vmmov %vm8421_vm0 }
 0x4f7   : > { %v2590_v23 = vpop.xlane.xlu1 %2589 }
 0x4f8   : > { %2729 = vst.msk [vmem:[#allocation6 + $0xb8] sm:$0xff] %vm8428_vm15, %v2664_v30  ;;  %v2679_v19 = vadd.f32 %v2590_v23, %v2487_v8  ;;  %vm8443_vm15 = vmmov %vm8421_vm0  ;;  %v2477_v30 = vld [vmem:[#allocation6 + $0xe0] sm:$0xff] }
 0x4f9   : > { %v2592_v6 = vpop.xlane.xlu0 %2591 }
 0x4fa   : > { %2744 = vst.msk [vmem:[#allocation6 + $0x130] sm:$0xff] %vm8429_vm8, %v2679_v19  ;;  %v2680_v48 = vadd.f32 %v2592_v6, %v2488_v46  ;;  %vm8444_vm8 = vcmask 64512   ;;  %v2478_v6 = vld [vmem:[#allocation6 + $0xe8] sm:$0xff] }
 0x4fb   : > { %v2554_v33 = vpop.xlane.xlu1 %2553 }
 0x4fc   : > { %2745 = vst.msk [vmem:[#allocation6 + $0x138] sm:$0xff] %vm8430_vm14, %v2680_v48  ;;  %v2661_v13 = vadd.f32 %v2554_v33, %v2469_v12  ;;  %vm8445_vm14 = vmmov %vm8444_vm8  ;;  %v2792_v48 = vld [vmem:[#allocation5 + $0xb0] sm:$0xff] }
 0x4fd   : > { %v2556_v18 = vpop.xlane.xlu0 %2555 }
 0x4fe   : > { %2726 = vst.msk [vmem:[#allocation6 + $0xa0] sm:$0xff] %vm8431_vm10, %v2661_v13  ;;  %v2662_v62 = vadd.f32 %v2556_v18, %v2470_v20  ;;  %vm8446_vm10 = vmmov %vm8421_vm0  ;;  %v2493_v20 = vld [vmem:[#allocation6 + $0x160] sm:$0xff] }
 0x4ff   : > { %v2586_v36 = vpop.xlane.xlu1 %2585  ;;  %v2790_v13 = vld [vmem:[#allocation5 + $0xa0] sm:$0xff] }
 0x500   : > { %2727 = vst.msk [vmem:[#allocation6 + $0xa8] sm:$0xff] %vm8432_vm11, %v2662_v62  ;;  %v2677_v10 = vadd.f32 %v2586_v36, %v2485_v39  ;;  %vm8447_vm11 = vmmov %vm8444_vm8  ;;  %v2793_v62 = vld [vmem:[#allocation5 + $0xb8] sm:$0xff] }
 0x501   : > { %v2588_v35 = vpop.xlane.xlu0 %2587 }
 0x502   : > { %2742 = vst.msk [vmem:[#allocation6 + $0x120] sm:$0xff] %vm8433_vm5, %v2677_v10  ;;  %v2678_v4 = vadd.f32 %v2588_v35, %v2486_v9  ;;  %vm8448_vm5 = vmmov %vm8444_vm8  ;;  %v2494_v9 = vld [vmem:[#allocation6 + $0x168] sm:$0xff] }
 0x503   : > { %v2566_v37 = vpop.xlane.xlu1 %2565 }
 0x504   : > { %2743 = vst.msk [vmem:[#allocation6 + $0x128] sm:$0xff] %vm8434_vm4, %v2678_v4  ;;  %v2667_v41 = vadd.f32 %v2566_v37, %v2475_v29  ;;  %vm8449_vm4 = vmmov %vm8421_vm0  ;;  %v2791_v29 = vld [vmem:[#allocation5 + $0xa8] sm:$0xff] }
 0x505   : > { %v2568_v43 = vpop.xlane.xlu0 %2567 }
 0x506   : > { %2732 = vst.msk [vmem:[#allocation6 + $0xd0] sm:$0xff] %vm8435_vm12, %v2667_v41  ;;  %v2668_v31 = vadd.f32 %v2568_v43, %v2476_v5  ;;  %vm8450_vm12 = vmmov %vm8421_vm0  ;;  %v2499_v43 = vld [vmem:[#allocation6 + $0x190] sm:$0xff] }
 0x507   : > { %v2598_v21 = vpop.xlane.xlu1 %2597 }
 0x508   : > { %2733 = vst.msk [vmem:[#allocation6 + $0xd8] sm:$0xff] %vm8436_vm2, %v2668_v31  ;;  %v2683_v15 = vadd.f32 %v2598_v21, %v2491_v24  ;;  %vm8451_vm2 = vmmov %vm8421_vm0 }
 0x509   : > { %v2600_v61 = vpop.xlane.xlu0 %2599 }
 0x50a   : > { %2748 = vst.msk [vmem:[#allocation6 + $0x150] sm:$0xff] %vm8421_vm0, %v2683_v15  ;;  %v2684_v34 = vadd.f32 %v2600_v61, %v2492_v47  ;;  %vm8452_vm0 = vmmov %vm8448_vm5  ;;  %v2500_v61 = vld [vmem:[#allocation6 + $0x198] sm:$0xff] }
 0x50b   : > { %v2562_v11 = vpop.xlane.xlu1 %2561 }
 0x50c   : > { %2749 = vst.msk [vmem:[#allocation6 + $0x158] sm:$0xff] %vm8437_vm6, %v2684_v34  ;;  %v2665_v55 = vadd.f32 %v2562_v11, %v2473_v2  ;;  %vm8453_vm6 = vmmov %vm8438_vm1  ;;  %v2796_v34 = vld [vmem:[#allocation5 + $0xd0] sm:$0xff] }
 0x50d   : > { %v2564_v38 = vpop.xlane.xlu0 %2563 }
 0x50e   : > { %2730 = vst.msk [vmem:[#allocation6 + $0xc0] sm:$0xff] %vm8438_vm1, %v2665_v55  ;;  %v2666_v40 = vadd.f32 %v2564_v38, %v2474_v14  ;;  %vm8454_vm1 = vmmov %vm8452_vm0  ;;  %v2497_v14 = vld [vmem:[#allocation6 + $0x180] sm:$0xff] }
 0x50f   : > { %v2594_v53 = vpop.xlane.xlu1 %2593  ;;  %v2794_v55 = vld [vmem:[#allocation5 + $0xc0] sm:$0xff] }
 0x510   : > { %2731 = vst.msk [vmem:[#allocation6 + $0xc8] sm:$0xff] %vm8439_vm7, %v2666_v40  ;;  %v2681_v51 = vadd.f32 %v2594_v53, %v2489_v25  ;;  %vm8455_vm7 = vmmov %vm8452_vm0  ;;  %v2797_v40 = vld [vmem:[#allocation5 + $0xd8] sm:$0xff] }
 0x511   : > { %v2596_v42 = vpop.xlane.xlu0 %2595 }
 0x512   : > { %2746 = vst.msk [vmem:[#allocation6 + $0x140] sm:$0xff] %vm8440_vm3, %v2681_v51  ;;  %v2682_v60 = vadd.f32 %v2596_v42, %v2490_v58  ;;  %vm8456_vm3 = vmmov %vm8451_vm2  ;;  %v2498_v58 = vld [vmem:[#allocation6 + $0x188] sm:$0xff] }
 0x513   : > { %v2574_v52 = vpop.xlane.xlu1 %2573 }
 0x514   : > { %2747 = vst.msk [vmem:[#allocation6 + $0x148] sm:$0xff] %vm8441_vm9, %v2682_v60  ;;  %v2671_v17 = vadd.f32 %v2574_v52, %v2479_v44  ;;  %vm8457_vm9 = vmmov %vm8452_vm0  ;;  %v2795_v44 = vld [vmem:[#allocation5 + $0xc8] sm:$0xff] }
 0x515   : > { %v2576_v32 = vpop.xlane.xlu0 %2575 }
 0x516   : > { %2736 = vst.msk [vmem:[#allocation6 + $0xf0] sm:$0xff] %vm8442_vm13, %v2671_v17  ;;  %v2672_v54 = vadd.f32 %v2576_v32, %v2480_v1  ;;  %v5753_v7 = vpop.f32.mrb[48].mxu0  ;;  %vm8458_vm13 = vmmov %vm8451_vm2 }
 0x517   : > { %v3304_v49 = vadd.f32 %v5753_v7, %v2788_v27  ;;  %v3029_v57 = vpop.f32.mrb[49].mxu0  ;;  %v2606_v45 = vpop.xlane.xlu1 %2605  ;;  %v2503_v27 = vld [vmem:[#allocation6 + $0x1b0] sm:$0xff] }
 0x518   : > { %2737 = vst.msk [vmem:[#allocation6 + $0xf8] sm:$0xff] %vm8443_vm15, %v2672_v54  ;;  %v3302_v56 = vadd.f32 %v3029_v57, %v2786_v16  ;;  %v2687_v22 = vadd.f32 %v2606_v45, %v2495_v26  ;;  %v5754_v50 = vpop.f32.mrb[50].mxu0  ;;  %vm8459_vm15 = vmmov %vm8451_vm2  ;;  %v2800_v57 = vld [vmem:[#allocation5 + $0xf0] sm:$0xff] }
 0x519   : > { %3368 = vst.msk [vmem:[#allocation5 + $0x90] sm:$0xff] %vm8444_vm8, %v3304_v49  ;;  %v3305_v59 = vadd.f32 %v5754_v50, %v2789_v28  ;;  %v3032_v3 = vpop.f32.mrb[51].mxu0  ;;  %v2608_v8 = vpop.xlane.xlu0 %2607  ;;  %vm8460_vm8 = vmmov %vm8452_vm0  ;;  %v2504_v28 = vld [vmem:[#allocation6 + $0x1b8] sm:$0xff] }
 0x51a   : > { %3366 = vst.msk [vmem:[#allocation5 + $0x80] sm:$0xff] %vm8445_vm14, %v3302_v56  ;;  %v3303_v23 = vadd.f32 %v3032_v3, %v2787_v0  ;;  %v2688_v46 = vadd.f32 %v2608_v8, %v2496_v63  ;;  %vm8461_vm14 = vmmov %vm8451_vm2  ;;  %v2501_v0 = vld [vmem:[#allocation6 + $0x1a0] sm:$0xff]  ;;  %v2801_v50 = vld [vmem:[#allocation5 + $0xf8] sm:$0xff] }
 0x51b   : > { %2752 = vst.msk [vmem:[#allocation6 + $0x170] sm:$0xff] %vm8446_vm10, %v2687_v22  ;;  %v2570_v19 = vpop.xlane.xlu1 %2569  ;;  %vm8462_vm10 = vmmov %vm8452_vm0  ;;  %v2798_v63 = vld [vmem:[#allocation5 + $0xe0] sm:$0xff]  ;;  %v2502_v3 = vld [vmem:[#allocation6 + $0x1a8] sm:$0xff] }
 0x51c   : > { %3369 = vst.msk [vmem:[#allocation5 + $0x98] sm:$0xff] %vm8447_vm11, %v3305_v59  ;;  %v2669_v12 = vadd.f32 %v2570_v19, %v2477_v30  ;;  %vm8463_vm11 = vmmov %vm8452_vm0 }
 0x51d   : > { %3367 = vst.msk [vmem:[#allocation5 + $0x88] sm:$0xff] %vm8448_vm5, %v3303_v23  ;;  %v2572_v33 = vpop.xlane.xlu0 %2571  ;;  %vm8464_vm5 = vmmov %vm8451_vm2  ;;  %v2799_v23 = vld [vmem:[#allocation5 + $0xe8] sm:$0xff] }
 0x51e   : > { %2753 = vst.msk [vmem:[#allocation6 + $0x178] sm:$0xff] %vm8449_vm4, %v2688_v46  ;;  %v2670_v18 = vadd.f32 %v2572_v33, %v2478_v6  ;;  %v5757_v39 = vpop.f32.mrb[52].mxu0  ;;  %vm8465_vm4 = vmmov %vm8452_vm0  ;;  %v2507_v33 = vld [vmem:[#allocation6 + $0x1d0] sm:$0xff] }
 0x51f   : > { %2734 = vst.msk [vmem:[#allocation6 + $0xe0] sm:$0xff] %vm8450_vm12, %v2669_v12  ;;  %v2602_v36 = vpop.xlane.xlu1 %2601  ;;  %v3308_v10 = vadd.f32 %v5757_v39, %v2792_v48  ;;  %v3045_v35 = vpop.f32.mrb[53].mxu0  ;;  %vm8466_vm12 = vmmov %vm8451_vm2  ;;  %v2804_v12 = vld [vmem:[#allocation5 + $0x110] sm:$0xff] }
 0x520   : > { %2735 = vst.msk [vmem:[#allocation6 + $0xe8] sm:$0xff] %vm8451_vm2, %v2670_v18  ;;  %v2685_v4 = vadd.f32 %v2602_v36, %v2493_v20  ;;  %v3306_v37 = vadd.f32 %v3045_v35, %v2790_v13  ;;  %v5758_v5 = vpop.f32.mrb[54].mxu0  ;;  %v2802_v18 = vld [vmem:[#allocation5 + $0x100] sm:$0xff]  ;;  %v2508_v35 = vld [vmem:[#allocation6 + $0x1d8] sm:$0xff] }
 0x521   : > { %v2604_v41 = vpop.xlane.xlu0 %2603  ;;  %3372 = vst.msk [vmem:[#allocation5 + $0xb0] sm:$0xff] %vm8452_vm0, %v3308_v10  ;;  %v3309_v24 = vadd.f32 %v5758_v5, %v2793_v62  ;;  %v3048_v31 = vpop.f32.mrb[55].mxu0 }
 0x522   : > { %2750 = vst.msk [vmem:[#allocation6 + $0x160] sm:$0xff] %vm8453_vm6, %v2685_v4  ;;  %v2686_v21 = vadd.f32 %v2604_v41, %v2494_v9  ;;  %v3307_v47 = vadd.f32 %v3048_v31, %v2791_v29  ;;  %vm8467_vm6 = vmmov %vm8451_vm2  ;;  %v2805_v9 = vld [vmem:[#allocation5 + $0x118] sm:$0xff]  ;;  %v2505_v31 = vld [vmem:[#allocation6 + $0x1c0] sm:$0xff] }
 0x523   : > { %3370 = vst.msk [vmem:[#allocation5 + $0xa0] sm:$0xff] %vm8454_vm1, %v3306_v37  ;;  %v2614_v15 = vpop.xlane.xlu1 %2613  ;;  %vm8468_vm1 = vmmov %vm8452_vm0  ;;  %v2803_v37 = vld [vmem:[#allocation5 + $0x108] sm:$0xff] }
 0x524   : > { %3373 = vst.msk [vmem:[#allocation5 + $0xb8] sm:$0xff] %vm8455_vm7, %v3309_v24  ;;  %v2691_v2 = vadd.f32 %v2614_v15, %v2499_v43  ;;  %vm8469_vm7 = vmmov %vm8452_vm0 }
 0x525   : > { %2751 = vst.msk [vmem:[#allocation6 + $0x168] sm:$0xff] %vm8456_vm3, %v2686_v21  ;;  %v2616_v11 = vpop.xlane.xlu0 %2615  ;;  %vm8470_vm3 = vmmov %vm8451_vm2 }
 0x526   : > { %3371 = vst.msk [vmem:[#allocation5 + $0xa8] sm:$0xff] %vm8457_vm9, %v3307_v47  ;;  %v2692_v38 = vadd.f32 %v2616_v11, %v2500_v61  ;;  %v5761_v25 = vpop.f32.mrb[56].mxu0  ;;  %vm8471_vm9 = vmmov %vm8452_vm0 }
 0x527   : > { %2756 = vst.msk [vmem:[#allocation6 + $0x190] sm:$0xff] %vm8458_vm13, %v2691_v2  ;;  %v2610_v53 = vpop.xlane.xlu1 %2609  ;;  %v3312_v51 = vadd.f32 %v5761_v25, %v2796_v34  ;;  %v3061_v42 = vpop.f32.mrb[57].mxu0  ;;  %vm8472_vm13 = vmmov %vm8452_vm0  ;;  %v2506_v34 = vld [vmem:[#allocation6 + $0x1c8] sm:$0xff]  ;;  %v2806_v25 = vld [vmem:[#allocation5 + $0x120] sm:$0xff] }
 0x528   : > { %2757 = vst.msk [vmem:[#allocation6 + $0x198] sm:$0xff] %vm8459_vm15, %v2692_v38  ;;  %v2689_v60 = vadd.f32 %v2610_v53, %v2497_v14  ;;  %v3310_v52 = vadd.f32 %v3061_v42, %v2794_v55  ;;  %v5762_v1 = vpop.f32.mrb[58].mxu0  ;;  %vm8473_vm15 = vmmov %vm8451_vm2  ;;  %v2808_v14 = vld [vmem:[#allocation5 + $0x130] sm:$0xff]  ;;  %v2509_v38 = vld [vmem:[#allocation6 + $0x1e0] sm:$0xff] }
 0x529   : > { %v2612_v17 = vpop.xlane.xlu0 %2611  ;;  %3376 = vst.msk [vmem:[#allocation5 + $0xd0] sm:$0xff] %vm8460_vm8, %v3312_v51  ;;  %v3313_v32 = vadd.f32 %v5762_v1, %v2797_v40  ;;  %v3064_v16 = vpop.f32.mrb[59].mxu0  ;;  %vm8474_vm8 = vmmov %vm8452_vm0  ;;  %v2510_v42 = vld [vmem:[#allocation6 + $0x1e8] sm:$0xff] }
 0x52a   : > { %2754 = vst.msk [vmem:[#allocation6 + $0x180] sm:$0xff] %vm8461_vm14, %v2689_v60  ;;  %v2690_v26 = vadd.f32 %v2612_v17, %v2498_v58  ;;  %v3311_v54 = vadd.f32 %v3064_v16, %v2795_v44  ;;  %vm8475_vm14 = vmmov %vm8452_vm0  ;;  %v2809_v58 = vld [vmem:[#allocation5 + $0x138] sm:$0xff]  ;;  %v2511_v16 = vld [vmem:[#allocation6 + $0x1f0] sm:$0xff] }
 0x52b   : > { %3374 = vst.msk [vmem:[#allocation5 + $0xc0] sm:$0xff] %vm8462_vm10, %v3310_v52  ;;  %v2622_v7 = vpop.xlane.xlu1 %2621  ;;  %vm8476_vm10 = vmmov %vm8451_vm2  ;;  %v2807_v52 = vld [vmem:[#allocation5 + $0x128] sm:$0xff] }
 0x52c   : > { %3377 = vst.msk [vmem:[#allocation5 + $0xd8] sm:$0xff] %vm8463_vm11, %v3313_v32  ;;  %v2695_v49 = vadd.f32 %v2622_v7, %v2503_v27  ;;  %vm8477_vm11 = vmmov %vm8452_vm0 }
 0x52d   : > { %2755 = vst.msk [vmem:[#allocation6 + $0x188] sm:$0xff] %vm8464_vm5, %v2690_v26  ;;  %v2624_v45 = vpop.xlane.xlu0 %2623  ;;  %vm8478_vm5 = vmmov %vm8451_vm2 }
 0x52e   : > { %3375 = vst.msk [vmem:[#allocation5 + $0xc8] sm:$0xff] %vm8465_vm4, %v3311_v54  ;;  %v2696_v56 = vadd.f32 %v2624_v45, %v2504_v28  ;;  %v5765_v22 = vpop.f32.mrb[60].mxu0  ;;  %vm8479_vm4 = vmmov %vm8451_vm2 }
 0x52f   : > { %2760 = vst.msk [vmem:[#allocation6 + $0x1b0] sm:$0xff] %vm8466_vm12, %v2695_v49  ;;  %v2618_v59 = vpop.xlane.xlu1 %2617  ;;  %v3316_v8 = vadd.f32 %v5765_v22, %v2800_v57  ;;  %v3077_v30 = vpop.f32.mrb[61].mxu0  ;;  %vm8480_vm12 = vmmov %vm8452_vm0  ;;  %v2512_v57 = vld [vmem:[#allocation6 + $0x1f8] sm:$0xff] }
 0x530   : > { %2761 = vst.msk [vmem:[#allocation6 + $0x1b8] sm:$0xff] %vm8451_vm2, %v2696_v56  ;;  %v2693_v46 = vadd.f32 %v2618_v59, %v2501_v0  ;;  %v3314_v19 = vadd.f32 %v3077_v30, %v2798_v63  ;;  %v5766_v6 = vpop.f32.mrb[62].mxu0  ;;  %v2812_v0 = vld [vmem:[#allocation5 + $0x150] sm:$0xff]  ;;  %v2810_v56 = vld [vmem:[#allocation5 + $0x140] sm:$0xff]  ;;  %v2813_v59 = vld [vmem:[#allocation5 + $0x158] sm:$0xff] }
 0x531   : > { %v2620_v48 = vpop.xlane.xlu0 %2619  ;;  %3380 = vst.msk [vmem:[#allocation5 + $0xf0] sm:$0xff] %vm8452_vm0, %v3316_v8  ;;  %v3317_v20 = vadd.f32 %v5766_v6, %v2801_v50  ;;  %v3080_v13 = vpop.f32.mrb[63].mxu0  ;;  %v2811_v30 = vld [vmem:[#allocation5 + $0x148] sm:$0xff] }
 0x532   : > { %2758 = vst.msk [vmem:[#allocation6 + $0x1a0] sm:$0xff] %vm8467_vm6, %v2693_v46  ;;  %v2694_v39 = vadd.f32 %v2620_v48, %v2502_v3  ;;  %v3315_v62 = vadd.f32 %v3080_v13, %v2799_v23  ;;  %v5785_v36 = vpop.f32.mrb[48].mxu1  ;;  %vm8481_vm6 = vmmov %vm8452_vm0  ;;  %v2816_v48 = vld [vmem:[#allocation5 + $0x170] sm:$0xff]  ;;  %v2817_v13 = vld [vmem:[#allocation5 + $0x178] sm:$0xff] }
 0x533   : > { %3378 = vst.msk [vmem:[#allocation5 + $0xe0] sm:$0xff] %vm8468_vm1, %v3314_v19  ;;  %v2630_v10 = vpop.xlane.xlu1 %2629  ;;  %v3320_v29 = vadd.f32 %v5785_v36, %v2804_v12  ;;  %v3126_v4 = vpop.f32.mrb[49].mxu1  ;;  %vm8482_vm1 = vmmov %vm8451_vm2 }
 0x534   : > { %3381 = vst.msk [vmem:[#allocation5 + $0xf8] sm:$0xff] %vm8469_vm7, %v3317_v20  ;;  %v2699_v5 = vadd.f32 %v2630_v10, %v2507_v33  ;;  %v3318_v41 = vadd.f32 %v3126_v4, %v2802_v18  ;;  %v5786_v43 = vpop.f32.mrb[50].mxu1  ;;  %vm8483_vm7 = vmmov %vm8452_vm0  ;;  %v2814_v33 = vld [vmem:[#allocation5 + $0x160] sm:$0xff]  ;;  %v2820_v4 = vld [vmem:[#allocation5 + $0x190] sm:$0xff] }
 0x535   : > { %2759 = vst.msk [vmem:[#allocation6 + $0x1a8] sm:$0xff] %vm8470_vm3, %v2694_v39  ;;  %v2632_v24 = vpop.xlane.xlu0 %2631  ;;  %v3321_v21 = vadd.f32 %v5786_v43, %v2805_v9  ;;  %v3129_v47 = vpop.f32.mrb[51].mxu1  ;;  %vm8484_vm3 = vmmov %vm8482_vm1 }
 0x536   : > { %3379 = vst.msk [vmem:[#allocation5 + $0xe8] sm:$0xff] %vm8471_vm9, %v3315_v62  ;;  %v2700_v15 = vadd.f32 %v2632_v24, %v2508_v35  ;;  %v3319_v61 = vadd.f32 %v3129_v47, %v2803_v37  ;;  %vm8485_vm9 = vmmov %vm8482_vm1  ;;  %v2815_v62 = vld [vmem:[#allocation5 + $0x168] sm:$0xff]  ;;  %v2818_v37 = vld [vmem:[#allocation5 + $0x180] sm:$0xff] }
 0x537   : > { %3384 = vst.msk [vmem:[#allocation5 + $0x110] sm:$0xff] %vm8472_vm13, %v3320_v29  ;;  %v2626_v2 = vpop.xlane.xlu1 %2625  ;;  %vm8486_vm13 = vmmov %vm8452_vm0 }
 0x538   : > { %2764 = vst.msk [vmem:[#allocation6 + $0x1d0] sm:$0xff] %vm8473_vm15, %v2699_v5  ;;  %v2697_v11 = vadd.f32 %v2626_v2, %v2505_v31  ;;  %vm8487_vm15 = vmmov %vm8452_vm0  ;;  %v2819_v31 = vld [vmem:[#allocation5 + $0x188] sm:$0xff] }
 0x539   : > { %3382 = vst.msk [vmem:[#allocation5 + $0x100] sm:$0xff] %vm8474_vm8, %v3318_v41  ;;  %v2628_v55 = vpop.xlane.xlu0 %2627  ;;  %vm8488_vm8 = vmmov %vm8452_vm0  ;;  %v2821_v41 = vld [vmem:[#allocation5 + $0x198] sm:$0xff] }
 0x53a   : > { %3385 = vst.msk [vmem:[#allocation5 + $0x118] sm:$0xff] %vm8475_vm14, %v3321_v21  ;;  %v2698_v40 = vadd.f32 %v2628_v55, %v2506_v34  ;;  %vm8489_vm14 = vmmov %vm8452_vm0  ;;  %v2824_v34 = vld [vmem:[#allocation5 + $0x1b0] sm:$0xff]  ;;  %v2825_v55 = vld [vmem:[#allocation5 + $0x1b8] sm:$0xff] }
 0x53b   : > { %2765 = vst.msk [vmem:[#allocation6 + $0x1d8] sm:$0xff] %vm8476_vm10, %v2700_v15  ;;  %v5789_v53 = vpop.f32.mrb[52].mxu1  ;;  %v2634_v51 = vpop.xlane.xlu1 %2633  ;;  %vm8490_vm10 = vmmov %vm8452_vm0 }
 0x53c   : > { %3383 = vst.msk [vmem:[#allocation5 + $0x108] sm:$0xff] %vm8477_vm11, %v3319_v61  ;;  %v3324_v44 = vadd.f32 %v5789_v53, %v2808_v14  ;;  %v3142_v60 = vpop.f32.mrb[53].mxu1  ;;  %v2701_v1 = vadd.f32 %v2634_v51, %v2509_v38  ;;  %vm8491_vm11 = vmmov %vm8452_vm0 }
 0x53d   : > { %2762 = vst.msk [vmem:[#allocation6 + $0x1c0] sm:$0xff] %vm8478_vm5, %v2697_v11  ;;  %v3322_v17 = vadd.f32 %v3142_v60, %v2806_v25  ;;  %v5790_v27 = vpop.f32.mrb[54].mxu1  ;;  %v2636_v32 = vpop.xlane.xlu0 %2635  ;;  %vm8492_vm5 = vmmov %vm8452_vm0  ;;  %v2822_v11 = vld [vmem:[#allocation5 + $0x1a0] sm:$0xff]  ;;  %v2828_v60 = vld [vmem:[#allocation5 + $0x1d0] sm:$0xff] }
 0x53e   : > { %2763 = vst.msk [vmem:[#allocation6 + $0x1c8] sm:$0xff] %vm8479_vm4, %v2698_v40  ;;  %v3325_v26 = vadd.f32 %v5790_v27, %v2809_v58  ;;  %v3145_v54 = vpop.f32.mrb[55].mxu1  ;;  %v2702_v7 = vadd.f32 %v2636_v32, %v2510_v42  ;;  %vm8493_vm4 = vmmov %vm8452_vm0  ;;  %v2823_v40 = vld [vmem:[#allocation5 + $0x1a8] sm:$0xff] }
 0x53f   : > { %3388 = vst.msk [vmem:[#allocation5 + $0x130] sm:$0xff] %vm8480_vm12, %v3324_v44  ;;  %v3323_v28 = vadd.f32 %v3145_v54, %v2807_v52  ;;  %v2638_v49 = vpop.xlane.xlu1 %2637  ;;  %vm8494_vm12 = vmmov %vm8452_vm0  ;;  %v2826_v52 = vld [vmem:[#allocation5 + $0x1c0] sm:$0xff] }
 0x540   : > { %2766 = vst.msk [vmem:[#allocation6 + $0x1e0] sm:$0xff] %vm8451_vm2, %v2701_v1  ;;  %v2703_v45 = vadd.f32 %v2638_v49, %v2511_v16  ;;  %vm8495_vm2 = vmmov %vm8452_vm0  ;;  %v2827_v16 = vld [vmem:[#allocation5 + $0x1c8] sm:$0xff] }
 0x541   : > { %3386 = vst.msk [vmem:[#allocation5 + $0x120] sm:$0xff] %vm8452_vm0, %v3322_v17  ;;  %v2640_v63 = vpop.xlane.xlu0 %2639  ;;  %v2829_v17 = vld [vmem:[#allocation5 + $0x1d8] sm:$0xff] }
 0x542   : > { %3389 = vst.msk [vmem:[#allocation5 + $0x138] sm:$0xff] %vm8481_vm6, %v3325_v26  ;;  %v2704_v22 = vadd.f32 %v2640_v63, %v2512_v57  ;;  %vm8496_vm6 = vmmov %vm8452_vm0  ;;  %v2832_v57 = vld [vmem:[#allocation5 + $0x1f0] sm:$0xff]  ;;  %v2833_v63 = vld [vmem:[#allocation5 + $0x1f8] sm:$0xff] }
 0x543   : > { %2767 = vst.msk [vmem:[#allocation6 + $0x1e8] sm:$0xff] %vm8482_vm1, %v2702_v7  ;;  %v5793_v50 = vpop.f32.mrb[56].mxu1  ;;  %vm8497_vm1 = vmmov %vm8452_vm0 }
 0x544   : > { %3387 = vst.msk [vmem:[#allocation5 + $0x128] sm:$0xff] %vm8483_vm7, %v3323_v28  ;;  %v3328_v3 = vadd.f32 %v5793_v50, %v2812_v0  ;;  %v3158_v8 = vpop.f32.mrb[57].mxu1  ;;  %vm8498_vm7 = vmmov %vm8452_vm0  ;;  %v2831_v50 = vld [vmem:[#allocation5 + $0x1e8] sm:$0xff] }
 0x545   : > { %2768 = vst.msk [vmem:[#allocation6 + $0x1f0] sm:$0xff] %vm8484_vm3, %v2703_v45  ;;  %v3326_v23 = vadd.f32 %v3158_v8, %v2810_v56  ;;  %v5794_v46 = vpop.f32.mrb[58].mxu1  ;;  %vm8499_vm3 = vmmov %vm8452_vm0  ;;  %v2830_v45 = vld [vmem:[#allocation5 + $0x1e0] sm:$0xff] }
 0x546   : > { %2769 = vst.msk [vmem:[#allocation6 + $0x1f8] sm:$0xff] %vm8485_vm9, %v2704_v22  ;;  %v3329_v19 = vadd.f32 %v5794_v46, %v2813_v59  ;;  %v3161_v6 = vpop.f32.mrb[59].mxu1  ;;  %vm8500_vm9 = vmmov %vm8452_vm0  ;;  %v3420_v46 = vld [vmem:[#allocation6 + $0x10] sm:$0xff] (!%p5312_p6) }
 0x547   : > { %3392 = vst.msk [vmem:[#allocation5 + $0x150] sm:$0xff] %vm8486_vm13, %v3328_v3  ;;  %v3327_v12 = vadd.f32 %v3161_v6, %v2811_v30  ;;  %vm8501_vm13 = vmmov %vm8452_vm0  ;;  %v3421_v6 = vld [vmem:[#allocation6 + $0x18] sm:$0xff] (!%p5312_p6)  ;;  %6177 = vrcp.f32 (!%p5312_p6), %v3420_v46 }
 0x548   : > { %3390 = vst.msk [vmem:[#allocation5 + $0x140] sm:$0xff] %vm8487_vm15, %v3326_v23  ;;  %vm8502_vm15 = vmmov %vm8452_vm0 }
 0x549   : > { %3393 = vst.msk [vmem:[#allocation5 + $0x158] sm:$0xff] %vm8488_vm8, %v3329_v19  ;;  %vm8503_vm8 = vmmov %vm8452_vm0  ;;  %v3418_v19 = vld [vmem:[#allocation6] sm:$0xff] (!%p5312_p6) }
 0x54a   : > { %3391 = vst.msk [vmem:[#allocation5 + $0x148] sm:$0xff] %vm8489_vm14, %v3327_v12  ;;  %vm8504_vm14 = vmmov %vm8452_vm0  ;;  %v6429_v12 = vmov (!%p5312_p6), 0   ;;  %6179 = vrcp.f32 (!%p5312_p6), %v3418_v19 }
 0x54b   : > { %v5797_v20 = vpop.f32.mrb[60].mxu1  ;;  %6176 = vset.pattern.permute.xlu1 (!%p5312_p6), %v6429_v12  ;;  %6175 = vset.pattern.permute.xlu0 (!%p5312_p6), %v6429_v12  ;;  %6181 = vrcp.f32 (!%p5312_p6), %v3421_v6  ;;  %v3430_v12 = vld [vmem:[#allocation6 + $0x60] sm:$0xff] (!%p5312_p6) }
 0x54c   : > { %v3332_v18 = vadd.f32 %v5797_v20, %v2816_v48  ;;  %v3174_v39 = vpop.f32.mrb[61].mxu1  ;;  %v3419_v48 = vld [vmem:[#allocation6 + $0x8] sm:$0xff] (!%p5312_p6)  ;;  %v3434_v20 = vld [vmem:[#allocation6 + $0x80] sm:$0xff] (!%p5312_p6) }
 0x54d   : > { %v3330_v36 = vadd.f32 %v3174_v39, %v2814_v33  ;;  %v5798_v9 = vpop.f32.mrb[62].mxu1  ;;  %v3435_v33 = vld [vmem:[#allocation6 + $0x88] sm:$0xff] (!%p5312_p6)  ;;  %6183 = vrcp.f32 (!%p5312_p6), %v3419_v48 }
 0x54e   : > { %3396 = vst.msk [vmem:[#allocation5 + $0x170] sm:$0xff] %vm8490_vm10, %v3332_v18  ;;  %v3333_v10 = vadd.f32 %v5798_v9, %v2817_v13  ;;  %v3177_v35 = vpop.f32.mrb[63].mxu1  ;;  %vm8505_vm10 = vmmov %vm8452_vm0  ;;  %6185 = vrcp.f32 (!%p5312_p6), %v3435_v33  ;;  %v3437_v13 = vld [vmem:[#allocation6 + $0x98] sm:$0xff] (!%p5312_p6)  ;;  %v3436_v18 = vld [vmem:[#allocation6 + $0x90] sm:$0xff] (!%p5312_p6) }
 0x54f   : > { %3394 = vst.msk [vmem:[#allocation5 + $0x160] sm:$0xff] %vm8491_vm11, %v3330_v36  ;;  %v3331_v29 = vadd.f32 %v3177_v35, %v2815_v62  ;;  %vm8506_vm11 = vmmov %vm8452_vm0  ;;  %6187 = vrcp.f32 (!%p5312_p6), %v3434_v20  ;;  %v3423_v39 = vld [vmem:[#allocation6 + $0x28] sm:$0xff] (!%p5312_p6)  ;;  %v3422_v36 = vld [vmem:[#allocation6 + $0x20] sm:$0xff] (!%p5312_p6) }
 0x550   : > { %3397 = vst.msk [vmem:[#allocation5 + $0x178] sm:$0xff] %vm8492_vm5, %v3333_v10  ;;  %vm8507_vm5 = vmmov %vm8452_vm0  ;;  %6189 = vrcp.f32 (!%p5312_p6), %v3437_v13 }
 0x551   : > { %3395 = vst.msk [vmem:[#allocation5 + $0x168] sm:$0xff] %vm8493_vm4, %v3331_v29  ;;  %vm8508_vm4 = vmmov %vm8452_vm0  ;;  %6191 = vrcp.f32 (!%p5312_p6), %v3436_v18  ;;  %v6178_v62 = vpop.eup (!%p5312_p6), %6177 }
 0x552   : > { %6193 = vrcp.f32 (!%p5312_p6), %v3423_v39 }
 0x553   : > { %6195 = vrcp.f32 (!%p5312_p6), %v3422_v36 }
 0x554   : > { %v6180_v9 = vpop.eup (!%p5312_p6), %6179 }
 0x555   : > { %v6182_v35 = vpop.eup (!%p5312_p6), %6181 }
 0x556   : > { %v5817_v5 = vpop.f32.mrb[64].mxu0 }
 0x557   : > { %v3336_v43 = vadd.f32 %v5817_v5, %v2820_v4  ;;  %v3223_v24 = vpop.f32.mrb[65].mxu0  ;;  %v6184_v4 = vpop.eup (!%p5312_p6), %6183  ;;  %v3425_v5 = vld [vmem:[#allocation6 + $0x38] sm:$0xff] (!%p5312_p6) }
 0x558   : > { %v3334_v21 = vadd.f32 %v3223_v24, %v2818_v37  ;;  %v5818_v47 = vpop.f32.mrb[66].mxu0  ;;  %v3424_v24 = vld [vmem:[#allocation6 + $0x30] sm:$0xff] (!%p5312_p6)  ;;  %6197 = vrcp.f32 (!%p5312_p6), %v3425_v5 }
 0x559   : > { %3400 = vst.msk [vmem:[#allocation5 + $0x190] sm:$0xff] %vm8494_vm12, %v3336_v43  ;;  %v3337_v15 = vadd.f32 %v5818_v47, %v2821_v41  ;;  %v3226_v61 = vpop.f32.mrb[67].mxu0  ;;  %vm3484_vm12 = vcmp.gt.f32.partialorder (!%p5312_p6), %v3420_v46, 0.0  ;;  %v6186_v41 = vpop.eup (!%p5312_p6), %6185  ;;  %6199 = vrcp.f32 (!%p5312_p6), %v3424_v24  ;;  %v3439_v47 = vld [vmem:[#allocation6 + $0xa8] sm:$0xff] (!%p5312_p6) }
 0x55a   : > { %3398 = vst.msk [vmem:[#allocation5 + $0x180] sm:$0xff] %vm8495_vm2, %v3334_v21  ;;  %v3335_v2 = vadd.f32 %v3226_v61, %v2819_v31  ;;  %vm3482_vm2 = vcmp.gt.f32.partialorder (!%p5312_p6), %v3418_v19, 0.0  ;;  %v3612_v10 = vsel (!%p5312_p6), %vm3484_vm12, %v6178_v62, 0.0  ;;  %v6188_v31 = vpop.eup (!%p5312_p6), %6187  ;;  %6201 = vrcp.f32 (!%p5312_p6), %v3439_v47  ;;  %v3431_v46 = vld [vmem:[#allocation6 + $0x68] sm:$0xff] (!%p5312_p6) }
 0x55b   : > { %3401 = vst.msk [vmem:[#allocation5 + $0x198] sm:$0xff] %vm8452_vm0, %v3337_v15  ;;  %vm3485_vm0 = vcmp.gt.f32.partialorder (!%p5312_p6), %v3421_v6, 0.0  ;;  %3750 = vperm.xlu1 (!%p5312_p6), %6176, %v3612_v10   ;;  %v3610_v29 = vsel (!%p5312_p6), %vm3482_vm2, %v6180_v9, 0.0  ;;  %v6190_v15 = vpop.eup (!%p5312_p6), %6189  ;;  %v3447_v9 = vld [vmem:[#allocation6 + $0xe8] sm:$0xff] (!%p5312_p6) }
 0x55c   : > { %3399 = vst.msk [vmem:[#allocation5 + $0x188] sm:$0xff] %vm8496_vm6, %v3335_v2  ;;  %vm3483_vm6 = vcmp.gt.f32.partialorder (!%p5312_p6), %v3419_v48, 0.0  ;;  %3740 = vperm.xlu0 (!%p5312_p6), %6175, %v3610_v29   ;;  %v3613_v37 = vsel (!%p5312_p6), %vm3485_vm0, %v6182_v35, 0.0  ;;  %v3438_v2 = vld [vmem:[#allocation6 + $0xa0] sm:$0xff] (!%p5312_p6) }
 0x55d   : > { %v3611_v43 = vsel (!%p5312_p6), %vm3483_vm6, %v6184_v4, 0.0  ;;  %6203 = vrcp.f32 (!%p5312_p6), %v3438_v2  ;;  %v3446_v29 = vld [vmem:[#allocation6 + $0xe0] sm:$0xff] (!%p5312_p6) }
 0x55e   : > { %v5821_v14 = vpop.f32.mrb[68].mxu0 }
 0x55f   : > { %v3340_v38 = vadd.f32 %v5821_v14, %v2824_v34  ;;  %v3239_v25 = vpop.f32.mrb[69].mxu0  ;;  %3755 = vperm.xlu1 (!%p5312_p6), %6176, %v3613_v37   ;;  %v6192_v34 = vpop.eup (!%p5312_p6), %6191  ;;  %v3441_v14 = vld [vmem:[#allocation6 + $0xb8] sm:$0xff] (!%p5312_p6) }
 0x560   : > { %v3338_v53 = vadd.f32 %v3239_v25, %v2822_v11  ;;  %v5822_v58 = vpop.f32.mrb[70].mxu0  ;;  %3745 = vperm.xlu0 (!%p5312_p6), %6175, %v3611_v43   ;;  %v3440_v25 = vld [vmem:[#allocation6 + $0xb0] sm:$0xff] (!%p5312_p6)  ;;  %6205 = vrcp.f32 (!%p5312_p6), %v3441_v14 }
 0x561   : > { %3404 = vst.msk [vmem:[#allocation5 + $0x1b0] sm:$0xff] %vm8497_vm1, %v3340_v38  ;;  %v3341_v51 = vadd.f32 %v5822_v58, %v2825_v55  ;;  %v3242_v42 = vpop.f32.mrb[71].mxu0  ;;  %vm3499_vm1 = vcmp.gt.f32.partialorder (!%p5312_p6), %v3435_v33, 0.0  ;;  %v6194_v55 = vpop.eup (!%p5312_p6), %6193  ;;  %v4155_v58 = vld [vmem:[%s8260_s5 + $0x4] sm:$0xf] (!%p5312_p6)  ;;  %6207 = vrcp.f32 (!%p5312_p6), %v3440_v25  ;;  %vm3504_vm12 = vcmp.gt.f32.partialorder (!%p5312_p6), %v3440_v25, 0.0 }
 0x562   : > { %3402 = vst.msk [vmem:[#allocation5 + $0x1a0] sm:$0xff] %vm8498_vm7, %v3338_v53  ;;  %v3339_v44 = vadd.f32 %v3242_v42, %v2823_v40  ;;  %vm3498_vm7 = vcmp.gt.f32.partialorder (!%p5312_p6), %v3434_v20, 0.0  ;;  %v3627_v21 = vsel (!%p5312_p6), %vm3499_vm1, %v6186_v41, 0.0  ;;  %v6196_v40 = vpop.eup (!%p5312_p6), %6195  ;;  %v4154_v53 = vld [vmem:[%s8260_s5] sm:$0xf] (!%p5312_p6)  ;;  %v3427_v42 = vld [vmem:[#allocation6 + $0x48] sm:$0xff] (!%p5312_p6) }
 0x563   : > { %3405 = vst.msk [vmem:[#allocation5 + $0x1b8] sm:$0xff] %vm8499_vm3, %v3341_v51  ;;  %v3626_v61 = vsel (!%p5312_p6), %vm3498_vm7, %v6188_v31, 0.0  ;;  %vm3501_vm3 = vcmp.gt.f32.partialorder (!%p5312_p6), %v3437_v13, 0.0  ;;  %3825 = vperm.xlu1 (!%p5312_p6), %6176, %v3627_v21   ;;  %6209 = vrcp.f32 (!%p5312_p6), %v3427_v42  ;;  %vm3491_vm2 = vcmp.gt.f32.partialorder (!%p5312_p6), %v3427_v42, 0.0  ;;  %v3433_v20 = vld [vmem:[#allocation6 + $0x78] sm:$0xff] (!%p5312_p6)  ;;  %v3452_v25 = vld [vmem:[#allocation6 + $0x110] sm:$0xff] (!%p5312_p6) }
 0x564   : > { %3403 = vst.msk [vmem:[#allocation5 + $0x1a8] sm:$0xff] %vm8500_vm9, %v3339_v44  ;;  %vm3500_vm9 = vcmp.gt.f32.partialorder (!%p5312_p6), %v3436_v18, 0.0  ;;  %3820 = vperm.xlu0 (!%p5312_p6), %6175, %v3626_v61   ;;  %v3629_v11 = vsel (!%p5312_p6), %vm3501_vm3, %v6190_v15, 0.0  ;;  %v6198_v44 = vpop.eup (!%p5312_p6), %6197 }
 0x565   : > { %v3628_v38 = vsel (!%p5312_p6), %vm3500_vm9, %v6192_v34, 0.0 }
 0x566   : > { %v5825_v1 = vpop.f32.mrb[72].mxu0 }
 0x567   : > { %v3344_v27 = vadd.f32 %v5825_v1, %v2828_v60  ;;  %v3255_v32 = vpop.f32.mrb[73].mxu0  ;;  %3835 = vperm.xlu1 (!%p5312_p6), %6176, %v3629_v11   ;;  %v6200_v1 = vpop.eup (!%p5312_p6), %6199 }
 0x568   : > { %v3342_v26 = vadd.f32 %v3255_v32, %v2826_v52  ;;  %v5826_v54 = vpop.f32.mrb[74].mxu0  ;;  %3830 = vperm.xlu0 (!%p5312_p6), %6175, %v3628_v38   ;;  %v3426_v52 = vld [vmem:[#allocation6 + $0x40] sm:$0xff] (!%p5312_p6) }
 0x569   : > { %3408 = vst.msk [vmem:[#allocation5 + $0x1d0] sm:$0xff] %vm8501_vm13, %v3344_v27  ;;  %v3345_v7 = vadd.f32 %v5826_v54, %v2829_v17  ;;  %v3258_v28 = vpop.f32.mrb[75].mxu0  ;;  %vm3487_vm13 = vcmp.gt.f32.partialorder (!%p5312_p6), %v3423_v39, 0.0  ;;  %6211 = vrcp.f32 (!%p5312_p6), %v3426_v52  ;;  %vm3490_vm0 = vcmp.gt.f32.partialorder (!%p5312_p6), %v3426_v52, 0.0  ;;  %v3432_v39 = vld [vmem:[#allocation6 + $0x70] sm:$0xff] (!%p5312_p6) }
 0x56a   : > { %3406 = vst.msk [vmem:[#allocation5 + $0x1c0] sm:$0xff] %vm8502_vm15, %v3342_v26  ;;  %v3343_v49 = vadd.f32 %v3258_v28, %v2827_v16  ;;  %vm3486_vm15 = vcmp.gt.f32.partialorder (!%p5312_p6), %v3422_v36, 0.0  ;;  %v3615_v51 = vsel (!%p5312_p6), %vm3487_vm13, %v6194_v55, 0.0  ;;  %v3429_v16 = vld [vmem:[#allocation6 + $0x58] sm:$0xff] (!%p5312_p6)  ;;  %v6202_v26 = vpop.eup (!%p5312_p6), %6201 }
 0x56b   : > { %3409 = vst.msk [vmem:[#allocation5 + $0x1d8] sm:$0xff] %vm8503_vm8, %v3345_v7  ;;  %v3614_v60 = vsel (!%p5312_p6), %vm3486_vm15, %v6196_v40, 0.0  ;;  %vm3489_vm8 = vcmp.gt.f32.partialorder (!%p5312_p6), %v3425_v5, 0.0  ;;  %3765 = vperm.xlu1 (!%p5312_p6), %6176, %v3615_v51   ;;  %v3428_v7 = vld [vmem:[#allocation6 + $0x50] sm:$0xff] (!%p5312_p6)  ;;  %v6204_v28 = vpop.eup (!%p5312_p6), %6203  ;;  %6213 = vrcp.f32 (!%p5312_p6), %v3429_v16  ;;  %vm3493_vm6 = vcmp.gt.f32.partialorder (!%p5312_p6), %v3429_v16, 0.0  ;;  %v3449_v5 = vld [vmem:[#allocation6 + $0xf8] sm:$0xff] (!%p5312_p6) }
 0x56c   : > { %3407 = vst.msk [vmem:[#allocation5 + $0x1c8] sm:$0xff] %vm8504_vm14, %v3343_v49  ;;  %vm4182_vm14 = vcmask (!%p5312_p6), 1043456   ;;  %3760 = vperm.xlu0 (!%p5312_p6), %6175, %v3614_v60   ;;  %v3617_v32 = vsel (!%p5312_p6), %vm3489_vm8, %v6198_v44, 0.0  ;;  %6215 = vrcp.f32 (!%p5312_p6), %v3428_v7  ;;  %vm3492_vm1 = vcmp.gt.f32.partialorder (!%p5312_p6), %v3428_v7, 0.0  ;;  %v3466_v44 = vld [vmem:[#allocation6 + $0x180] sm:$0xff] (!%p5312_p6) }
 0x56d   : > { %5939 = vmatprep.subr.msk.bf16.mxu0 (!%p5312_p6), %vm4182_vm14, %v4154_v53  ;;  %v4184_v17 = vsel (!%p5312_p6), %vm4182_vm14, %v4154_v53, 0  ;;  %5940 = vmatprep.subr.msk.bf16.mxu1 (!%p5312_p6), %vm4182_vm14, %v4155_v58  ;;  %v4308_v27 = vsel (!%p5312_p6), %vm4182_vm14, %v4155_v58, 0  ;;  %vm3495_vm15 = vcmp.gt.f32.partialorder (!%p5312_p6), %v3431_v46, 0.0  ;;  %vm3494_vm8 = vcmp.gt.f32.partialorder (!%p5312_p6), %v3430_v12, 0.0  ;;  %v3467_v58 = vld [vmem:[#allocation6 + $0x188] sm:$0xff] (!%p5312_p6) }
 0x56e   : > { %v5829_v0 = vpop.f32.mrb[76].mxu0  ;;  %3417 = sbr.rel (%p5312_p6) target bundleno = 1876 (0x754), region = 94  ;;  %5832 = vmatpush3.bf16.msra.mxu0 (!%p5312_p6), %v4184_v17  ;;  %5850 = vmatpush3.bf16.msra.mxu1 (!%p5312_p6), %v4308_v27 }
 0x56f   : > { %v3348_v56 = vadd.f32 %v5829_v0, %v2832_v57  ;;  %v3271_v22 = vpop.f32.mrb[77].mxu0  ;;  %3775 = vperm.xlu1 (!%p5312_p6), %6176, %v3617_v32   ;;  %v3443_v57 = vld [vmem:[#allocation6 + $0xc8] sm:$0xff] (!%p5312_p6)  ;;  %v3468_v32 = vld [vmem:[#allocation6 + $0x190] sm:$0xff] (!%p5312_p6) }
 0x570   : > { %v3346_v59 = vadd.f32 %v3271_v22, %v2830_v45  ;;  %v5830_v3 = vpop.f32.mrb[78].mxu0  ;;  %v6206_v45 = vpop.eup (!%p5312_p6), %6205  ;;  %6217 = vrcp.f32 (!%p5312_p6), %v3443_v57  ;;  %vm3507_vm7 = vcmp.gt.f32.partialorder (!%p5312_p6), %v3443_v57, 0.0 }
 0x571   : > { %3412 = vst.msk [vmem:[#allocation5 + $0x1f0] sm:$0xff] %vm8505_vm10, %v3348_v56  ;;  %v3349_v8 = vadd.f32 %v5830_v3, %v2833_v63  ;;  %v3274_v30 = vpop.f32.mrb[79].mxu0  ;;  %vm3488_vm10 = vcmp.gt.f32.partialorder (!%p5312_p6), %v3424_v24, 0.0  ;;  %v3442_v63 = vld [vmem:[#allocation6 + $0xc0] sm:$0xff] (!%p5312_p6)  ;;  %v6208_v56 = vpop.eup (!%p5312_p6), %6207  ;;  %v3448_v24 = vld [vmem:[#allocation6 + $0xf0] sm:$0xff] (!%p5312_p6) }
 0x572   : > { %3410 = vst.msk [vmem:[#allocation5 + $0x1e0] sm:$0xff] %vm8506_vm11, %v3346_v59  ;;  %v3347_v23 = vadd.f32 %v3274_v30, %v2831_v50  ;;  %v3616_v54 = vsel (!%p5312_p6), %vm3488_vm10, %v6200_v1, 0.0  ;;  %vm3503_vm11 = vcmp.gt.f32.partialorder (!%p5312_p6), %v3439_v47, 0.0  ;;  %6219 = vrcp.f32 (!%p5312_p6), %v3442_v63  ;;  %v3445_v50 = vld [vmem:[#allocation6 + $0xd8] sm:$0xff] (!%p5312_p6)  ;;  %v6210_v59 = vpop.eup (!%p5312_p6), %6209  ;;  %v3451_v47 = vld [vmem:[#allocation6 + $0x108] sm:$0xff] (!%p5312_p6) }
 0x573   : > { %3413 = vst.msk [vmem:[#allocation5 + $0x1f8] sm:$0xff] %vm8507_vm5, %v3349_v8  ;;  %vm3502_vm5 = vcmp.gt.f32.partialorder (!%p5312_p6), %v3438_v2, 0.0  ;;  %3770 = vperm.xlu0 (!%p5312_p6), %6175, %v3616_v54   ;;  %v3631_v49 = vsel (!%p5312_p6), %vm3503_vm11, %v6202_v26, 0.0  ;;  %v3632_v3 = vsel (!%p5312_p6), %vm3504_vm12, %v6208_v56, 0.0  ;;  %v3444_v8 = vld [vmem:[#allocation6 + $0xd0] sm:$0xff] (!%p5312_p6)  ;;  %v6212_v30 = vpop.eup (!%p5312_p6), %6211  ;;  %6221 = vrcp.f32 (!%p5312_p6), %v3445_v50  ;;  %v3450_v2 = vld [vmem:[#allocation6 + $0x100] sm:$0xff] (!%p5312_p6) }
 0x574   : > { %3411 = vst.msk [vmem:[#allocation5 + $0x1e8] sm:$0xff] %vm8508_vm4, %v3347_v23  ;;  %v3630_v0 = vsel (!%p5312_p6), %vm3502_vm5, %v6204_v28, 0.0  ;;  %vm3505_vm4 = vcmp.gt.f32.partialorder (!%p5312_p6), %v3441_v14, 0.0  ;;  %3845 = vperm.xlu1 (!%p5312_p6), %6176, %v3631_v49   ;;  %v3619_v23 = vsel (!%p5312_p6), %vm3491_vm2, %v6210_v59, 0.0  ;;  %6223 = vrcp.f32 (!%p5312_p6), %v3444_v8  ;;  %v3453_v14 = vld [vmem:[#allocation6 + $0x118] sm:$0xff] (!%p5312_p6)  ;;  %v3455_v54 = vld [vmem:[#allocation6 + $0x128] sm:$0xff] (!%p5312_p6) }
 0x575   : > { %v3633_v22 = vsel %vm3505_vm4, %v6206_v45, 0.0  ;;  %v6214_v19 = vpop.eup %6213  ;;  %v3618_v6 = vsel %vm3490_vm0, %v6212_v30, 0.0  ;;  %6225 = vrcp.f32 %v3431_v46  ;;  %vm3506_vm3 = vcmp.gt.f32.partialorder %v3442_v63, 0.0  ;;  %v3469_v1 = vld [vmem:[#allocation6 + $0x198] sm:$0xff]  ;;  %v3454_v49 = vld [vmem:[#allocation6 + $0x120] sm:$0xff] }
 0x576   : > { %v6216_v48 = vpop.eup %6215  ;;  %v3621_v33 = vsel %vm3493_vm6, %v6214_v19, 0.0  ;;  %6227 = vrcp.f32 %v3430_v12  ;;  %vm3509_vm9 = vcmp.gt.f32.partialorder %v3445_v50, 0.0  ;;  %vm3508_vm13 = vcmp.gt.f32.partialorder %v3444_v8, 0.0  ;;  %v4156_v59 = vld [vmem:[%s8260_s5 + $0x8] sm:$0xf]  ;;  %v3470_v19 = vld [vmem:[#allocation6 + $0x1a0] sm:$0xff] }
 0x577   : > { %3840 = vperm.xlu0 %6175, %v3630_v0   ;;  %v3620_v18 = vsel %vm3492_vm1, %v6216_v48, 0.0  ;;  %6229 = vrcp.f32 %v3433_v20  ;;  %vm3497_vm10 = vcmp.gt.f32.partialorder %v3433_v20, 0.0  ;;  %vm3496_vm11 = vcmp.gt.f32.partialorder %v3432_v39, 0.0  ;;  %v3457_v0 = vld [vmem:[#allocation6 + $0x138] sm:$0xff]  ;;  %v3471_v8 = vld [vmem:[#allocation6 + $0x1a8] sm:$0xff]  ;;  %5941 = vmatprep.subr.msk.bf16.mxu0 %vm4182_vm14, %v4156_v59 }
 0x578   : > { %3855 = vperm.xlu1 %6176, %v3633_v22   ;;  %6231 = vrcp.f32 %v3432_v39  ;;  %vm3511_vm5 = vcmp.gt.f32.partialorder %v3447_v9, 0.0  ;;  %vm3510_vm4 = vcmp.gt.f32.partialorder %v3446_v29, 0.0  ;;  %vm3513_vm12 = vcmp.gt.f32.partialorder %v3449_v5, 0.0  ;;  %v3456_v22 = vld [vmem:[#allocation6 + $0x130] sm:$0xff]  ;;  %v4157_v12 = vld [vmem:[%s8260_s5 + $0xc] sm:$0xf] }
 0x579   : > { %6233 = vrcp.f32 %v3447_v9  ;;  %vm3512_vm2 = vcmp.gt.f32.partialorder %v3448_v24, 0.0  ;;  %vm3515_vm0 = vcmp.gt.f32.partialorder %v3451_v47, 0.0  ;;  %vm3514_vm6 = vcmp.gt.f32.partialorder %v3450_v2, 0.0  ;;  %5942 = vmatprep.subr.msk.bf16.mxu1 %vm4182_vm14, %v4157_v12  ;;  %v3459_v9 = vld [vmem:[#allocation6 + $0x148] sm:$0xff] }
 0x57a   : > { %v6218_v13 = vpop.eup %6217  ;;  %6235 = vrcp.f32 %v3446_v29  ;;  %vm3517_vm1 = vcmp.gt.f32.partialorder %v3453_v14, 0.0  ;;  %v7936_v30 = vsel %vm4182_vm14, %v4156_v59, 0  ;;  %v3458_v29 = vld [vmem:[#allocation6 + $0x140] sm:$0xff] }
 0x57b   : > { %3850 = vperm.xlu0 %6175, %v3632_v3   ;;  %v3635_v36 = vsel %vm3507_vm7, %v6218_v13, 0.0  ;;  %6237 = vrcp.f32 %v3449_v5  ;;  %vm3516_vm7 = vcmp.gt.f32.partialorder %v3452_v25, 0.0  ;;  %v3461_v5 = vld [vmem:[#allocation6 + $0x158] sm:$0xff] }
 0x57c   : > { %3785 = vperm.xlu1 %6176, %v3619_v23   ;;  %v6220_v62 = vpop.eup %6219  ;;  %6239 = vrcp.f32 %v3448_v24  ;;  %v3460_v24 = vld [vmem:[#allocation6 + $0x150] sm:$0xff] }
 0x57d   : > { %v6222_v10 = vpop.eup %6221  ;;  %v3634_v35 = vsel %vm3506_vm3, %v6220_v62, 0.0  ;;  %6241 = vrcp.f32 %v3451_v47  ;;  %vm3531_vm3 = vcmp.gt.f32.partialorder %v3467_v58, 0.0  ;;  %v7943_v62 = vsel %vm4182_vm14, %v4157_v12, 0  ;;  %v3475_v47 = vld [vmem:[#allocation6 + $0x1c8] sm:$0xff] }
 0x57e   : > { %v6224_v4 = vpop.eup %6223  ;;  %v3637_v37 = vsel %vm3509_vm9, %v6222_v10, 0.0  ;;  %6243 = vrcp.f32 %v3450_v2  ;;  %vm3530_vm9 = vcmp.gt.f32.partialorder %v3466_v44, 0.0  ;;  %vm3535_vm14 = vcmp.gt.f32.partialorder %v3471_v8, 0.0  ;;  %v3474_v2 = vld [vmem:[#allocation6 + $0x1c0] sm:$0xff] }
 0x57f   : > { %3780 = vperm.xlu0 %6175, %v3618_v6   ;;  %v6226_v41 = vpop.eup %6225  ;;  %v3636_v43 = vsel %vm3508_vm13, %v6224_v4, 0.0  ;;  %6245 = vrcp.f32 %v3453_v14  ;;  %vm3533_vm13 = vcmp.gt.f32.partialorder %v3469_v1, 0.0  ;;  %v3477_v14 = vld [vmem:[#allocation6 + $0x1d8] sm:$0xff] }
 0x580   : > { %3795 = vperm.xlu1 %6176, %v3621_v33   ;;  %v6228_v31 = vpop.eup %6227  ;;  %v3623_v21 = vsel %vm3495_vm15, %v6226_v41, 0.0  ;;  %6247 = vrcp.f32 %v3452_v25  ;;  %vm3532_vm15 = vcmp.gt.f32.partialorder %v3468_v32, 0.0  ;;  %v3473_v33 = vld [vmem:[#allocation6 + $0x1b8] sm:$0xff]  ;;  %v3476_v25 = vld [vmem:[#allocation6 + $0x1d0] sm:$0xff] }
 0x581   : > { %v6230_v15 = vpop.eup %6229  ;;  %v3622_v61 = vsel %vm3494_vm8, %v6228_v31, 0.0  ;;  %6249 = vrcp.f32 %v3467_v58  ;;  %vm3519_vm8 = vcmp.gt.f32.partialorder %v3455_v54, 0.0  ;;  %v3463_v58 = vld [vmem:[#allocation6 + $0x168] sm:$0xff] }
 0x582   : > { %v6232_v34 = vpop.eup %6231  ;;  %v3625_v11 = vsel %vm3497_vm10, %v6230_v15, 0.0  ;;  %6251 = vrcp.f32 %v3466_v44  ;;  %vm3518_vm10 = vcmp.gt.f32.partialorder %v3454_v49, 0.0  ;;  %v3462_v44 = vld [vmem:[#allocation6 + $0x160] sm:$0xff] }
 0x583   : > { %3790 = vperm.xlu0 %6175, %v3620_v18   ;;  %v6234_v55 = vpop.eup %6233  ;;  %v3624_v38 = vsel %vm3496_vm11, %v6232_v34, 0.0  ;;  %6253 = vrcp.f32 %v3469_v1  ;;  %v3472_v18 = vld [vmem:[#allocation6 + $0x1b0] sm:$0xff]  ;;  %vm3521_vm11 = vcmp.gt.f32.partialorder %v3457_v0, 0.0  ;;  %v3465_v1 = vld [vmem:[#allocation6 + $0x178] sm:$0xff] }
 0x584   : > { %3865 = vperm.xlu1 %6176, %v3635_v36   ;;  %v6236_v40 = vpop.eup %6235  ;;  %v3639_v53 = vsel %vm3511_vm5, %v6234_v55, 0.0  ;;  %6255 = vrcp.f32 %v3468_v32  ;;  %vm3520_vm5 = vcmp.gt.f32.partialorder %v3456_v22, 0.0  ;;  %v3464_v32 = vld [vmem:[#allocation6 + $0x170] sm:$0xff] }
 0x585   : > { %v6238_v51 = vpop.eup %6237  ;;  %v3638_v42 = vsel %vm3510_vm4, %v6236_v40, 0.0  ;;  %6257 = vrcp.f32 %v3455_v54  ;;  %vm3534_vm4 = vcmp.gt.f32.partialorder %v3470_v19, 0.0  ;;  %v3479_v54 = vld [vmem:[#allocation6 + $0x1e8] sm:$0xff] }
 0x586   : > { %v6240_v60 = vpop.eup %6239  ;;  %v3641_v52 = vsel %vm3513_vm12, %v6238_v51, 0.0  ;;  %6259 = vrcp.f32 %v3454_v49  ;;  %vm3537_vm12 = vcmp.gt.f32.partialorder %v3473_v33, 0.0  ;;  %v3478_v49 = vld [vmem:[#allocation6 + $0x1e0] sm:$0xff] }
 0x587   : > { %3860 = vperm.xlu0 %6175, %v3634_v35   ;;  %v6242_v17 = vpop.eup %6241  ;;  %v3640_v27 = vsel %vm3512_vm2, %v6240_v60, 0.0  ;;  %6261 = vrcp.f32 %v3457_v0  ;;  %vm3536_vm2 = vcmp.gt.f32.partialorder %v3472_v18, 0.0  ;;  %v3481_v0 = vld [vmem:[#allocation6 + $0x1f8] sm:$0xff] }
 0x588   : > { %3875 = vperm.xlu1 %6176, %v3637_v37   ;;  %v6244_v16 = vpop.eup %6243  ;;  %v3643_v26 = vsel %vm3515_vm0, %v6242_v17, 0.0  ;;  %6263 = vrcp.f32 %v3456_v22  ;;  %vm3523_vm0 = vcmp.gt.f32.partialorder %v3459_v9, 0.0  ;;  %v3480_v22 = vld [vmem:[#allocation6 + $0x1f0] sm:$0xff] }
 0x589   : > { %v6246_v7 = vpop.eup %6245  ;;  %v3642_v28 = vsel %vm3514_vm6, %v6244_v16, 0.0  ;;  %6265 = vrcp.f32 %v3471_v8  ;;  %vm3522_vm6 = vcmp.gt.f32.partialorder %v3458_v29, 0.0 }
 0x58a   : > { %v6248_v57 = vpop.eup %6247  ;;  %v3645_v45 = vsel %vm3517_vm1, %v6246_v7, 0.0  ;;  %6267 = vrcp.f32 %v3470_v19  ;;  %vm3525_vm1 = vcmp.gt.f32.partialorder %v3461_v5, 0.0 }
 0x58b   : > { %3870 = vperm.xlu0 %6175, %v3636_v43   ;;  %v6250_v63 = vpop.eup %6249  ;;  %v3644_v56 = vsel %vm3516_vm7, %v6248_v57, 0.0  ;;  %6269 = vrcp.f32 %v3473_v33  ;;  %vm3524_vm7 = vcmp.gt.f32.partialorder %v3460_v24, 0.0 }
 0x58c   : > { %3805 = vperm.xlu1 %6176, %v3623_v21   ;;  %v6252_v50 = vpop.eup %6251  ;;  %v3659_v3 = vsel %vm3531_vm3, %v6250_v63, 0.0  ;;  %6271 = vrcp.f32 %v3472_v18  ;;  %vm3539_vm3 = vcmp.gt.f32.partialorder %v3475_v47, 0.0 }
 0x58d   : > { %v6254_v23 = vpop.eup %6253  ;;  %v3658_v46 = vsel %vm3530_vm9, %v6252_v50, 0.0  ;;  %6273 = vrcp.f32 %v3459_v9  ;;  %vm3538_vm9 = vcmp.gt.f32.partialorder %v3474_v2, 0.0 }
 0x58e   : > { %v6256_v6 = vpop.eup %6255  ;;  %v3661_v48 = vsel %vm3533_vm13, %v6254_v23, 0.0  ;;  %6275 = vrcp.f32 %v3458_v29  ;;  %vm3541_vm13 = vcmp.gt.f32.partialorder %v3477_v14, 0.0  ;;  %v3674_v29 = vld [vmem:[#allocation5] sm:$0xff] }
 0x58f   : > { %3800 = vperm.xlu0 %6175, %v3622_v61   ;;  %v6258_v20 = vpop.eup %6257  ;;  %v3660_v13 = vsel %vm3532_vm15, %v6256_v6, 0.0  ;;  %6277 = vrcp.f32 %v3461_v5  ;;  %vm3540_vm15 = vcmp.gt.f32.partialorder %v3476_v25, 0.0 }
 0x590   : > { %3815 = vperm.xlu1 %6176, %v3625_v11   ;;  %v6260_v39 = vpop.eup %6259  ;;  %v3647_v36 = vsel %vm3519_vm8, %v6258_v20, 0.0  ;;  %6279 = vrcp.f32 %v3460_v24  ;;  %vm3527_vm8 = vcmp.gt.f32.partialorder %v3463_v58, 0.0 }
 0x591   : > { %v6262_v10 = vpop.eup %6261  ;;  %v3646_v35 = vsel %vm3518_vm10, %v6260_v39, 0.0  ;;  %6281 = vrcp.f32 %v3475_v47  ;;  %vm3526_vm10 = vcmp.gt.f32.partialorder %v3462_v44, 0.0 }
 0x592   : > { %v6264_v4 = vpop.eup %6263  ;;  %v3649_v37 = vsel %vm3521_vm11, %v6262_v10, 0.0  ;;  %6283 = vrcp.f32 %v3474_v2  ;;  %vm3529_vm11 = vcmp.gt.f32.partialorder %v3465_v1, 0.0  ;;  %v3676_v10 = vld [vmem:[#allocation5 + $0x10] sm:$0xff] }
 0x593   : > { %3810 = vperm.xlu0 %6175, %v3624_v38   ;;  %v6266_v41 = vpop.eup %6265  ;;  %v3648_v43 = vsel %vm3520_vm5, %v6264_v4, 0.0  ;;  %6285 = vrcp.f32 %v3477_v14  ;;  %vm3528_vm5 = vcmp.gt.f32.partialorder %v3464_v32, 0.0  ;;  %v3675_v4 = vld [vmem:[#allocation5 + $0x8] sm:$0xff] }
 0x594   : > { %3885 = vperm.xlu1 %6176, %v3639_v53   ;;  %v6268_v31 = vpop.eup %6267  ;;  %v3663_v21 = vsel %vm3535_vm14, %v6266_v41, 0.0  ;;  %6287 = vrcp.f32 %v3476_v25  ;;  %vm3543_vm14 = vcmp.gt.f32.partialorder %v3479_v54, 0.0 }
 0x595   : > { %v6270_v15 = vpop.eup %6269  ;;  %v3662_v61 = vsel %vm3534_vm4, %v6268_v31, 0.0  ;;  %6289 = vrcp.f32 %v3463_v58  ;;  %vm3542_vm4 = vcmp.gt.f32.partialorder %v3478_v49, 0.0 }
 0x596   : > { %v6272_v34 = vpop.eup %6271  ;;  %v3665_v11 = vsel %vm3537_vm12, %v6270_v15, 0.0  ;;  %6291 = vrcp.f32 %v3462_v44  ;;  %vm3545_vm12 = vcmp.gt.f32.partialorder %v3481_v0, 0.0  ;;  %v3690_v15 = vld [vmem:[#allocation5 + $0x80] sm:$0xff] }
 0x597   : > { %3880 = vperm.xlu0 %6175, %v3638_v42   ;;  %v6274_v55 = vpop.eup %6273  ;;  %v3664_v38 = vsel %vm3536_vm2, %v6272_v34, 0.0  ;;  %6293 = vrcp.f32 %v3465_v1  ;;  %vm3544_vm2 = vcmp.gt.f32.partialorder %v3480_v22, 0.0  ;;  %v3678_v44 = vld [vmem:[#allocation5 + $0x20] sm:$0xff] }
 0x598   : > { %3895 = vperm.xlu1 %6176, %v3641_v52   ;;  %v6276_v40 = vpop.eup %6275  ;;  %v3651_v53 = vsel %vm3523_vm0, %v6274_v55, 0.0  ;;  %6295 = vrcp.f32 %v3464_v32  ;;  %vm8509_vm0 = vcmask 64512   ;;  %v3693_v55 = vld [vmem:[#allocation5 + $0x98] sm:$0xff] }
 0x599   : > { %v6278_v51 = vpop.eup %6277  ;;  %v3650_v42 = vsel %vm3522_vm6, %v6276_v40, 0.0  ;;  %6297 = vrcp.f32 %v3479_v54  ;;  %vm8510_vm6 = vmmov %vm8509_vm0  ;;  %v3681_v32 = vld [vmem:[#allocation5 + $0x38] sm:$0xff] }
 0x59a   : > { %v6280_v60 = vpop.eup %6279  ;;  %v3653_v52 = vsel %vm3525_vm1, %v6278_v51, 0.0  ;;  %6299 = vrcp.f32 %v3478_v49  ;;  %vm8511_vm1 = vmmov %vm8509_vm0  ;;  %v3695_v49 = vld [vmem:[#allocation5 + $0xa8] sm:$0xff] }
 0x59b   : > { %3890 = vperm.xlu0 %6175, %v3640_v27   ;;  %v6282_v17 = vpop.eup %6281  ;;  %v3652_v27 = vsel %vm3524_vm7, %v6280_v60, 0.0  ;;  %6301 = vrcp.f32 %v3481_v0  ;;  %vm8512_vm7 = vmmov %vm8509_vm0 }
 0x59c   : > { %3905 = vperm.xlu1 %6176, %v3643_v26   ;;  %v6284_v16 = vpop.eup %6283  ;;  %v3667_v26 = vsel %vm3539_vm3, %v6282_v17, 0.0  ;;  %6303 = vrcp.f32 %v3480_v22  ;;  %vm8513_vm3 = vmmov %vm8509_vm0 }
 0x59d   : > { %v6286_v7 = vpop.eup %6285 }
 0x59e   : > { %v6288_v57 = vpop.eup %6287 }
 0x59f   : > { %3900 = vperm.xlu0 %6175, %v3642_v28   ;;  %v3666_v28 = vsel %vm3538_vm9, %v6284_v16, 0.0  ;;  %v6290_v63 = vpop.eup %6289  ;;  %v3680_v16 = vld [vmem:[#allocation5 + $0x30] sm:$0xff]  ;;  %vm8514_vm9 = vmmov %vm8509_vm0 }
 0x5a0   : > { %3915 = vperm.xlu1 %6176, %v3645_v45   ;;  %v3669_v45 = vsel %vm3541_vm13, %v6286_v7, 0.0  ;;  %v6292_v50 = vpop.eup %6291  ;;  %v3655_v59 = vsel %vm3527_vm8, %v6290_v63, 0.0  ;;  %vm8515_vm13 = vmmov %vm8509_vm0 }
 0x5a1   : > { %v3654_v8 = vsel %vm3526_vm10, %v6292_v50, 0.0  ;;  %v3697_v50 = vld [vmem:[#allocation5 + $0xb8] sm:$0xff]  ;;  %vm8517_vm8 = vmmov %vm8509_vm0 }
 0x5a2   : > { %vm8518_vm10 = vmmov %vm8509_vm0 }
 0x5a3   : > { %3910 = vperm.xlu0 %6175, %v3644_v56   ;;  %v3668_v56 = vsel %vm3540_vm15, %v6288_v57, 0.0  ;;  %v3694_v57 = vld [vmem:[#allocation5 + $0xa0] sm:$0xff]  ;;  %vm8516_vm15 = vmmov %vm8509_vm0 }
 0x5a4   : > { %3985 = vperm.xlu1 %6176, %v3659_v3   ;;  %v6294_v3 = vpop.eup %6293 }
 0x5a5   : > { %v6296_v23 = vpop.eup %6295 }
 0x5a6   : > { %v6298_v19 = vpop.eup %6297  ;;  %v3656_v6 = vsel %vm3528_vm5, %v6296_v23, 0.0  ;;  %vm8520_vm5 = vmmov %vm8509_vm0 }
 0x5a7   : > { %3980 = vperm.xlu0 %6175, %v3658_v46   ;;  %v3657_v46 = vsel %vm3529_vm11, %v6294_v3, 0.0  ;;  %v6300_v12 = vpop.eup %6299  ;;  %vm8519_vm11 = vmmov %vm8509_vm0 }
 0x5a8   : > { %3995 = vperm.xlu1 %6176, %v3661_v48   ;;  %v3671_v48 = vsel %vm3543_vm14, %v6298_v19, 0.0  ;;  %v6302_v33 = vpop.eup %6301  ;;  %v3670_v20 = vsel %vm3542_vm4, %v6300_v12, 0.0  ;;  %v3683_v19 = vld [vmem:[#allocation5 + $0x48] sm:$0xff]  ;;  %vm8521_vm14 = vmmov %vm8509_vm0 }
 0x5a9   : > { %v3673_v18 = vsel %vm3545_vm12, %v6302_v33, 0.0  ;;  %vm8522_vm4 = vmmov %vm8509_vm0 }
 0x5aa   : > { %vm8523_vm12 = vmmov %vm8509_vm0 }
 0x5ab   : > { %3990 = vperm.xlu0 %6175, %v3660_v13   ;;  %v6304_v13 = vpop.eup %6303 }
 0x5ac   : > { %3925 = vperm.xlu1 %6176, %v3647_v36   ;;  %v3672_v39 = vsel %vm3544_vm2, %v6304_v13, 0.0  ;;  %vm8524_vm2 = vmmov %vm8509_vm0 }
 0x5af   : > { %3920 = vperm.xlu0 %6175, %v3646_v35   ;;  %v3677_v35 = vld [vmem:[#allocation5 + $0x18] sm:$0xff] }
 0x5b0   : > { %3935 = vperm.xlu1 %6176, %v3649_v37  }
 0x5b3   : > { %3930 = vperm.xlu0 %6175, %v3648_v43  }
 0x5b4   : > { %4005 = vperm.xlu1 %6176, %v3663_v21   ;;  %v3691_v21 = vld [vmem:[#allocation5 + $0x88] sm:$0xff] }
 0x5b7   : > { %4000 = vperm.xlu0 %6175, %v3662_v61  }
 0x5b8   : > { %4015 = vperm.xlu1 %6176, %v3665_v11  }
 0x5bb   : > { %4010 = vperm.xlu0 %6175, %v3664_v38   ;;  %v3692_v38 = vld [vmem:[#allocation5 + $0x90] sm:$0xff] }
 0x5bc   : > { %3945 = vperm.xlu1 %6176, %v3651_v53  }
 0x5bf   : > { %3940 = vperm.xlu0 %6175, %v3650_v42   ;;  %v3679_v42 = vld [vmem:[#allocation5 + $0x28] sm:$0xff] }
 0x5c0   : > { %3955 = vperm.xlu1 %6176, %v3653_v52  }
 0x5c3   : > { %3950 = vperm.xlu0 %6175, %v3652_v27  }
 0x5c4   : > { %4025 = vperm.xlu1 %6176, %v3667_v26  }
 0x5c7   : > { %4020 = vperm.xlu0 %6175, %v3666_v28  }
 0x5c8   : > { %4035 = vperm.xlu1 %6176, %v3669_v45  }
 0x5cb   : > { %4030 = vperm.xlu0 %6175, %v3668_v56  }
 0x5cc   : > { %3965 = vperm.xlu1 %6176, %v3655_v59   ;;  %v3696_v59 = vld [vmem:[#allocation5 + $0xb0] sm:$0xff] }
 0x5cf   : > { %3960 = vperm.xlu0 %6175, %v3654_v8  }
 0x5d0   : > { %3975 = vperm.xlu1 %6176, %v3657_v46  }
 0x5d3   : > { %3970 = vperm.xlu0 %6175, %v3656_v6   ;;  %v3682_v6 = vld [vmem:[#allocation5 + $0x40] sm:$0xff] }
 0x5d4   : > { %4045 = vperm.xlu1 %6176, %v3671_v48  }
 0x5d7   : > { %4040 = vperm.xlu0 %6175, %v3670_v20  }
 0x5d8   : > { %4055 = vperm.xlu1 %6176, %v3673_v18   ;;  %v3685_v18 = vld [vmem:[#allocation5 + $0x58] sm:$0xff] }
 0x5da   : > { %v3751_v36 = vpop.permute.xlu1 %3750 }
 0x5db   : > { %4050 = vperm.xlu0 %6175, %v3672_v39   ;;  %v3741_v9 = vpop.permute.xlu0 %3740  ;;  %v4060_v5 = vmul.f32 %v3751_v36, %v3676_v10  ;;  %v3684_v39 = vld [vmem:[#allocation5 + $0x50] sm:$0xff] }
 0x5dc   : > { %v4058_v24 = vmul.f32 %v3741_v9, %v3674_v29 }
 0x5de   : > { %v3756_v37 = vpop.permute.xlu1 %3755 }
 0x5df   : > { %v4061_v41 = vmul.f32 %v3756_v37, %v3677_v35  ;;  %v3746_v43 = vpop.permute.xlu0 %3745  ;;  %v3698_v37 = vld [vmem:[#allocation5 + $0xc0] sm:$0xff] }
 0x5e0   : > { %v4059_v31 = vmul.f32 %v3746_v43, %v3675_v4  ;;  %v3699_v4 = vld [vmem:[#allocation5 + $0xc8] sm:$0xff] }
 0x5e1   : > { %v4123_v47 = vpack.c.bf16 %v4061_v41, %v4060_v5 }
 0x5e2   : > { %v3826_v61 = vpop.permute.xlu1 %3825  ;;  %v4122_v2 = vpack.c.bf16 %v4059_v31, %v4058_v24 }
 0x5e3   : > { %v4075_v34 = vmul.f32 %v3826_v61, %v3691_v21  ;;  %v3821_v11 = vpop.permute.xlu0 %3820  ;;  %v3701_v21 = vld [vmem:[#allocation5 + $0xd8] sm:$0xff] }
 0x5e4   : > { %v4074_v14 = vmul.f32 %v3821_v11, %v3690_v15  ;;  %5833 = vmatprep.mubr.msk.bf16.mxu0 %vm8509_vm0, %v4122_v2 }
 0x5e5   : > { %5834 = vmatmul.mubr.msk.bf16.vlgmr.msra.gmra.mrb[0].mxu0 %vm8510_vm6, %v4123_v47  ;;  %v3700_v47 = vld [vmem:[#allocation5 + $0xd0] sm:$0xff]  ;;  %vm8525_vm6 = vmmov %vm8509_vm0 }
 0x5e6   : > { %v3836_v25 = vpop.permute.xlu1 %3835  ;;  %v4130_v40 = vpack.c.bf16 %v4075_v34, %v4074_v14  ;;  %5868 = vmatpush3.bf16.msra.mxu0 %v7936_v30  ;;  %v3687_v14 = vld [vmem:[#allocation5 + $0x68] sm:$0xff] }
 0x5e7   : > { %v4077_v53 = vmul.f32 %v3836_v25, %v3693_v55  ;;  %v3831_v58 = vpop.permute.xlu0 %3830  ;;  %v3686_v55 = vld [vmem:[#allocation5 + $0x60] sm:$0xff] }
 0x5e8   : > { %v4076_v51 = vmul.f32 %v3831_v58, %v3692_v38  ;;  %5851 = vmatprep.mubr.msk.bf16.mxu1 %vm8511_vm1, %v4130_v40  ;;  %vm8526_vm1 = vmmov %vm8509_vm0 }
 0x5ea   : > { %v4131_v60 = vpack.c.bf16 %v4077_v53, %v4076_v51  ;;  %v3766_v52 = vpop.permute.xlu1 %3765  ;;  %v3689_v51 = vld [vmem:[#allocation5 + $0x78] sm:$0xff] }
 0x5eb   : > { %v4063_v1 = vmul.f32 %v3766_v52, %v3679_v42  ;;  %v3761_v17 = vpop.permute.xlu0 %3760  ;;  %v3688_v42 = vld [vmem:[#allocation5 + $0x70] sm:$0xff] }
 0x5ec   : > { %v4062_v27 = vmul.f32 %v3761_v17, %v3678_v44  ;;  %5852 = vmatmul.mubr.msk.bf16.vlgmr.msra.gmra.mrb[0].mxu1 %vm8512_vm7, %v4131_v60  ;;  %vm8527_vm7 = vmmov %vm8509_vm0 }
 0x5ed   : > { %5886 = vmatpush3.bf16.msra.mxu1 %v7943_v62 }
 0x5ee   : > { %v4124_v26 = vpack.c.bf16 %v4063_v1, %v4062_v27  ;;  %v3776_v30 = vpop.permute.xlu1 %3775  ;;  %v3703_v27 = vld [vmem:[#allocation5 + $0xe8] sm:$0xff] }
 0x5ef   : > { %v4065_v54 = vmul.f32 %v3776_v30, %v3681_v32  ;;  %v3702_v32 = vld [vmem:[#allocation5 + $0xe0] sm:$0xff] }
 0x5f0   : > { %5837 = vmatprep.mubr.msk.bf16.mxu0 %vm8513_vm3, %v4124_v26  ;;  %vm8528_vm3 = vmmov %vm8509_vm0 }
 0x5f2   : > { %v3771_v7 = vpop.permute.xlu0 %3770 }
 0x5f3   : > { %v4064_v28 = vmul.f32 %v3771_v7, %v3680_v16  ;;  %v3846_v0 = vpop.permute.xlu1 %3845 }
 0x5f4   : > { %v4079_v63 = vmul.f32 %v3846_v0, %v3695_v49  ;;  %v3704_v49 = vld [vmem:[#allocation5 + $0xf0] sm:$0xff] }
 0x5f5   : > { %v4125_v45 = vpack.c.bf16 %v4065_v54, %v4064_v28  ;;  %v3705_v28 = vld [vmem:[#allocation5 + $0xf8] sm:$0xff] }
 0x5f6   : > { %v3841_v56 = vpop.permute.xlu0 %3840 }
 0x5f7   : > { %v4078_v22 = vmul.f32 %v3841_v56, %v3694_v57  ;;  %5838 = vmatmul.mubr.msk.bf16.gmra.mrb[4].mxu0 %vm8514_vm9, %v4125_v45  ;;  %v3856_v62 = vpop.permute.xlu1 %3855  ;;  %vm8529_vm9 = vmmov %vm8509_vm0 }
 0x5f8   : > { %v4081_v8 = vmul.f32 %v3856_v62, %v3697_v50  ;;  %v3706_v50 = vld [vmem:[#allocation5 + $0x100] sm:$0xff] }
 0x5f9   : > { %v4132_v3 = vpack.c.bf16 %v4079_v63, %v4078_v22  ;;  %v3707_v22 = vld [vmem:[#allocation5 + $0x108] sm:$0xff] }
 0x5fa   : > { %v3851_v23 = vpop.permute.xlu0 %3850 }
 0x5fb   : > { %v4080_v46 = vmul.f32 %v3851_v23, %v3696_v59  ;;  %5855 = vmatprep.mubr.msk.bf16.mxu1 %vm8515_vm13, %v4132_v3  ;;  %v3786_v48 = vpop.permute.xlu1 %3785  ;;  %vm8530_vm13 = vmmov %vm8509_vm0 }
 0x5fc   : > { %v4067_v33 = vmul.f32 %v3786_v48, %v3683_v19  ;;  %v3708_v19 = vld [vmem:[#allocation5 + $0x110] sm:$0xff] }
 0x5fd   : > { %v4133_v12 = vpack.c.bf16 %v4081_v8, %v4080_v46  ;;  %v3709_v46 = vld [vmem:[#allocation5 + $0x118] sm:$0xff] }
 0x5fe   : > { %v3781_v20 = vpop.permute.xlu0 %3780 }
 0x5ff   : > { %v4066_v13 = vmul.f32 %v3781_v20, %v3682_v6  ;;  %5856 = vmatmul.mubr.msk.bf16.gmra.mrb[4].mxu1 %vm8516_vm15, %v4133_v12  ;;  %v3796_v9 = vpop.permute.xlu1 %3795  ;;  %vm8531_vm15 = vmmov %vm8509_vm0 }
 0x600   : > { %v4069_v10 = vmul.f32 %v3796_v9, %v3685_v18  ;;  %v3722_v18 = vld [vmem:[#allocation5 + $0x180] sm:$0xff] }
 0x601   : > { %v4126_v36 = vpack.c.bf16 %v4067_v33, %v4066_v13  ;;  %v3723_v13 = vld [vmem:[#allocation5 + $0x188] sm:$0xff] }
 0x602   : > { %v3791_v35 = vpop.permute.xlu0 %3790 }
 0x603   : > { %v4068_v29 = vmul.f32 %v3791_v35, %v3684_v39  ;;  %5841 = vmatprep.mubr.msk.bf16.mxu0 %vm8517_vm8, %v4126_v36  ;;  %v3866_v41 = vpop.permute.xlu1 %3865  ;;  %vm8532_vm8 = vmmov %vm8509_vm0 }
 0x604   : > { %v4083_v43 = vmul.f32 %v3866_v41, %v3699_v4  ;;  %v3724_v4 = vld [vmem:[#allocation5 + $0x190] sm:$0xff] }
 0x605   : > { %v4127_v5 = vpack.c.bf16 %v4069_v10, %v4068_v29  ;;  %v3725_v29 = vld [vmem:[#allocation5 + $0x198] sm:$0xff] }
 0x606   : > { %v3861_v24 = vpop.permute.xlu0 %3860 }
 0x607   : > { %v4082_v31 = vmul.f32 %v3861_v24, %v3698_v37  ;;  %5842 = vmatmul.mubr.msk.bf16.gmra.mrb[8].mxu0 %vm8518_vm10, %v4127_v5  ;;  %v3876_v61 = vpop.permute.xlu1 %3875  ;;  %vm8533_vm10 = vmmov %vm8509_vm0 }
 0x608   : > { %v4085_v2 = vmul.f32 %v3876_v61, %v3701_v21  ;;  %v3710_v21 = vld [vmem:[#allocation5 + $0x120] sm:$0xff] }
 0x609   : > { %v4134_v15 = vpack.c.bf16 %v4083_v43, %v4082_v31  ;;  %v3711_v31 = vld [vmem:[#allocation5 + $0x128] sm:$0xff] }
 0x60a   : > { %v3871_v34 = vpop.permute.xlu0 %3870 }
 0x60b   : > { %v4084_v11 = vmul.f32 %v3871_v34, %v3700_v47  ;;  %5859 = vmatprep.mubr.msk.bf16.mxu1 %vm8519_vm11, %v4134_v15  ;;  %v3806_v25 = vpop.permute.xlu1 %3805  ;;  %vm8534_vm11 = vmmov %vm8509_vm0 }
 0x60c   : > { %v4071_v40 = vmul.f32 %v3806_v25, %v3687_v14  ;;  %v3712_v14 = vld [vmem:[#allocation5 + $0x130] sm:$0xff] }
 0x60d   : > { %v4135_v38 = vpack.c.bf16 %v4085_v2, %v4084_v11  ;;  %v3713_v11 = vld [vmem:[#allocation5 + $0x138] sm:$0xff] }
 0x60e   : > { %v3801_v53 = vpop.permute.xlu0 %3800 }
 0x60f   : > { %v4070_v58 = vmul.f32 %v3801_v53, %v3686_v55  ;;  %5860 = vmatmul.mubr.msk.bf16.gmra.mrb[8].mxu1 %vm8520_vm5, %v4135_v38  ;;  %v3816_v60 = vpop.permute.xlu1 %3815  ;;  %vm8535_vm5 = vmmov %vm8509_vm0 }
 0x610   : > { %v4073_v52 = vmul.f32 %v3816_v60, %v3689_v51  ;;  %v3726_v51 = vld [vmem:[#allocation5 + $0x1a0] sm:$0xff] }
 0x611   : > { %v4128_v44 = vpack.c.bf16 %v4071_v40, %v4070_v58  ;;  %v3727_v58 = vld [vmem:[#allocation5 + $0x1a8] sm:$0xff] }
 0x612   : > { %v3811_v1 = vpop.permute.xlu0 %3810 }
 0x613   : > { %v4072_v17 = vmul.f32 %v3811_v1, %v3688_v42  ;;  %5845 = vmatprep.mubr.msk.bf16.mxu0 %vm8521_vm14, %v4128_v44  ;;  %v3886_v26 = vpop.permute.xlu1 %3885  ;;  %vm8536_vm14 = vmmov %vm8509_vm0 }
 0x614   : > { %v4087_v30 = vmul.f32 %v3886_v26, %v3703_v27  ;;  %v3728_v27 = vld [vmem:[#allocation5 + $0x1b0] sm:$0xff] }
 0x615   : > { %v4129_v16 = vpack.c.bf16 %v4073_v52, %v4072_v17  ;;  %v3729_v17 = vld [vmem:[#allocation5 + $0x1b8] sm:$0xff] }
 0x616   : > { %v3881_v54 = vpop.permute.xlu0 %3880 }
 0x617   : > { %v4086_v7 = vmul.f32 %v3881_v54, %v3702_v32  ;;  %5846 = vmatmul.mubr.msk.bf16.gmra.mrb[12].mxu0 %vm8522_vm4, %v4129_v16  ;;  %v3896_v45 = vpop.permute.xlu1 %3895  ;;  %vm8537_vm4 = vmmov %vm8509_vm0 }
 0x618   : > { %v4089_v0 = vmul.f32 %v3896_v45, %v3705_v28  ;;  %v3714_v28 = vld [vmem:[#allocation5 + $0x140] sm:$0xff] }
 0x619   : > { %v4136_v57 = vpack.c.bf16 %v4087_v30, %v4086_v7  ;;  %v3715_v7 = vld [vmem:[#allocation5 + $0x148] sm:$0xff] }
 0x61a   : > { %v3891_v63 = vpop.permute.xlu0 %3890 }
 0x61b   : > { %v4088_v56 = vmul.f32 %v3891_v63, %v3704_v49  ;;  %5863 = vmatprep.mubr.msk.bf16.mxu1 %vm8523_vm12, %v4136_v57  ;;  %v3906_v3 = vpop.permute.xlu1 %3905  ;;  %vm8538_vm12 = vmmov %vm8509_vm0 }
 0x61c   : > { %v4091_v62 = vmul.f32 %v3906_v3, %v3707_v22  ;;  %v3716_v22 = vld [vmem:[#allocation5 + $0x150] sm:$0xff] }
 0x61d   : > { %v4137_v59 = vpack.c.bf16 %v4089_v0, %v4088_v56  ;;  %v3717_v56 = vld [vmem:[#allocation5 + $0x158] sm:$0xff] }
 0x61e   : > { %v3901_v8 = vpop.permute.xlu0 %3900 }
 0x61f   : > { %v4090_v23 = vmul.f32 %v3901_v8, %v3706_v50  ;;  %5864 = vmatmul.mubr.msk.bf16.gmra.mrb[12].mxu1 %vm8524_vm2, %v4137_v59  ;;  %v3916_v12 = vpop.permute.xlu1 %3915  ;;  %vm8539_vm2 = vmmov %vm8509_vm0 }
 0x620   : > { %v4093_v48 = vmul.f32 %v3916_v12, %v3709_v46  ;;  %v3730_v46 = vld [vmem:[#allocation5 + $0x1c0] sm:$0xff] }
 0x621   : > { %v4138_v6 = vpack.c.bf16 %v4091_v62, %v4090_v23  ;;  %v3731_v23 = vld [vmem:[#allocation5 + $0x1c8] sm:$0xff] }
 0x622   : > { %v3911_v33 = vpop.permute.xlu0 %3910 }
 0x623   : > { %v4092_v20 = vmul.f32 %v3911_v33, %v3708_v19  ;;  %5869 = vmatprep.mubr.msk.bf16.mxu0 %vm8509_vm0, %v4138_v6  ;;  %v3986_v36 = vpop.permute.xlu1 %3985  ;;  %vm8540_vm0 = vcmask 261120  }
 0x624   : > { %v4107_v9 = vmul.f32 %v3986_v36, %v3723_v13  ;;  %v3732_v13 = vld [vmem:[#allocation5 + $0x1d0] sm:$0xff] }
 0x625   : > { %v4139_v39 = vpack.c.bf16 %v4093_v48, %v4092_v20  ;;  %v3733_v20 = vld [vmem:[#allocation5 + $0x1d8] sm:$0xff] }
 0x626   : > { %v3981_v10 = vpop.permute.xlu0 %3980 }
 0x627   : > { %v4106_v35 = vmul.f32 %v3981_v10, %v3722_v18  ;;  %5870 = vmatmul.mubr.msk.bf16.vlgmr.msra.gmra.mrb[16].mxu0 %vm8525_vm6, %v4139_v39  ;;  %v3996_v5 = vpop.permute.xlu1 %3995  ;;  %vm8541_vm6 = vmmov %vm8540_vm0 }
 0x628   : > { %v4109_v41 = vmul.f32 %v3996_v5, %v3725_v29  ;;  %v3718_v29 = vld [vmem:[#allocation5 + $0x160] sm:$0xff] }
 0x629   : > { %v4146_v37 = vpack.c.bf16 %v4107_v9, %v4106_v35  ;;  %v3719_v35 = vld [vmem:[#allocation5 + $0x168] sm:$0xff] }
 0x62a   : > { %v3991_v43 = vpop.permute.xlu0 %3990 }
 0x62b   : > { %v4108_v24 = vmul.f32 %v3991_v43, %v3724_v4  ;;  %5887 = vmatprep.mubr.msk.bf16.mxu1 %vm8526_vm1, %v4146_v37  ;;  %v3926_v15 = vpop.permute.xlu1 %3925  ;;  %vm8542_vm1 = vmmov %vm8540_vm0 }
 0x62c   : > { %v4095_v61 = vmul.f32 %v3926_v15, %v3711_v31  ;;  %v3720_v31 = vld [vmem:[#allocation5 + $0x170] sm:$0xff] }
 0x62d   : > { %v4147_v47 = vpack.c.bf16 %v4109_v41, %v4108_v24  ;;  %v3721_v24 = vld [vmem:[#allocation5 + $0x178] sm:$0xff] }
 0x62e   : > { %v3921_v2 = vpop.permute.xlu0 %3920 }
 0x62f   : > { %v4094_v34 = vmul.f32 %v3921_v2, %v3710_v21  ;;  %5888 = vmatmul.mubr.msk.bf16.vlgmr.msra.gmra.mrb[16].mxu1 %vm8527_vm7, %v4147_v47  ;;  %v3936_v38 = vpop.permute.xlu1 %3935  ;;  %vm8543_vm7 = vmmov %vm8540_vm0 }
 0x630   : > { %v4097_v25 = vmul.f32 %v3936_v38, %v3713_v11  ;;  %v3734_v11 = vld [vmem:[#allocation5 + $0x1e0] sm:$0xff] }
 0x631   : > { %v4140_v55 = vpack.c.bf16 %v4095_v61, %v4094_v34  ;;  %v3735_v34 = vld [vmem:[#allocation5 + $0x1e8] sm:$0xff] }
 0x632   : > { %v3931_v40 = vpop.permute.xlu0 %3930 }
 0x633   : > { %v4096_v53 = vmul.f32 %v3931_v40, %v3712_v14  ;;  %5873 = vmatprep.mubr.msk.bf16.mxu0 %vm8528_vm3, %v4140_v55  ;;  %v4006_v44 = vpop.permute.xlu1 %4005  ;;  %vm8544_vm3 = vmmov %vm8540_vm0 }
 0x634   : > { %v4111_v60 = vmul.f32 %v4006_v44, %v3727_v58  ;;  %v3736_v58 = vld [vmem:[#allocation5 + $0x1f0] sm:$0xff] }
 0x635   : > { %v4141_v42 = vpack.c.bf16 %v4097_v25, %v4096_v53  ;;  %v3737_v53 = vld [vmem:[#allocation5 + $0x1f8] sm:$0xff] }
 0x636   : > { %v4001_v52 = vpop.permute.xlu0 %4000 }
 0x637   : > { %v4110_v1 = vmul.f32 %v4001_v52, %v3726_v51  ;;  %5874 = vmatmul.mubr.msk.bf16.gmra.mrb[20].mxu0 %vm8529_vm9, %v4141_v42  ;;  %v4016_v16 = vpop.permute.xlu1 %4015  ;;  %vm8545_vm9 = vmmov %vm8540_vm0 }
 0x638   : > { %v4113_v26 = vmul.f32 %v4016_v16, %v3729_v17 }
 0x639   : > { %v4148_v32 = vpack.c.bf16 %v4111_v60, %v4110_v1 }
 0x63a   : > { %v4011_v30 = vpop.permute.xlu0 %4010 }
 0x63b   : > { %v4112_v54 = vmul.f32 %v4011_v30, %v3728_v27  ;;  %5891 = vmatprep.mubr.msk.bf16.mxu1 %vm8530_vm13, %v4148_v32  ;;  %v3946_v57 = vpop.permute.xlu1 %3945  ;;  %vm8546_vm13 = vmmov %vm8540_vm0 }
 0x63c   : > { %v4099_v45 = vmul.f32 %v3946_v57, %v3715_v7 }
 0x63d   : > { %v4149_v49 = vpack.c.bf16 %v4113_v26, %v4112_v54 }
 0x63e   : > { %v3941_v0 = vpop.permute.xlu0 %3940 }
 0x63f   : > { %v4098_v63 = vmul.f32 %v3941_v0, %v3714_v28  ;;  %5892 = vmatmul.mubr.msk.bf16.gmra.mrb[20].mxu1 %vm8531_vm15, %v4149_v49  ;;  %v3956_v59 = vpop.permute.xlu1 %3955  ;;  %vm8547_vm15 = vmmov %vm8540_vm0 }
 0x640   : > { %v4101_v3 = vmul.f32 %v3956_v59, %v3717_v56 }
 0x641   : > { %v4142_v50 = vpack.c.bf16 %v4099_v45, %v4098_v63 }
 0x642   : > { %v3951_v62 = vpop.permute.xlu0 %3950 }
 0x643   : > { %v4100_v8 = vmul.f32 %v3951_v62, %v3716_v22  ;;  %5877 = vmatprep.mubr.msk.bf16.mxu0 %vm8532_vm8, %v4142_v50  ;;  %v4026_v6 = vpop.permute.xlu1 %4025  ;;  %vm8548_vm8 = vmmov %vm8540_vm0 }
 0x644   : > { %v4115_v12 = vmul.f32 %v4026_v6, %v3731_v23 }
 0x645   : > { %v4143_v19 = vpack.c.bf16 %v4101_v3, %v4100_v8 }
 0x646   : > { %v4021_v48 = vpop.permute.xlu0 %4020 }
 0x647   : > { %v4114_v33 = vmul.f32 %v4021_v48, %v3730_v46  ;;  %5878 = vmatmul.mubr.msk.bf16.gmra.mrb[24].mxu0 %vm8533_vm10, %v4143_v19  ;;  %v4036_v39 = vpop.permute.xlu1 %4035  ;;  %vm8549_vm10 = vmmov %vm8540_vm0 }
 0x648   : > { %v4117_v36 = vmul.f32 %v4036_v39, %v3733_v20 }
 0x649   : > { %v4150_v18 = vpack.c.bf16 %v4115_v12, %v4114_v33 }
 0x64a   : > { %v4031_v9 = vpop.permute.xlu0 %4030 }
 0x64b   : > { %v4116_v10 = vmul.f32 %v4031_v9, %v3732_v13  ;;  %5895 = vmatprep.mubr.msk.bf16.mxu1 %vm8534_vm11, %v4150_v18  ;;  %v3966_v37 = vpop.permute.xlu1 %3965  ;;  %vm8550_vm11 = vmmov %vm8540_vm0 }
 0x64c   : > { %v4103_v5 = vmul.f32 %v3966_v37, %v3719_v35 }
 0x64d   : > { %v4151_v4 = vpack.c.bf16 %v4117_v36, %v4116_v10 }
 0x64e   : > { %v3961_v41 = vpop.permute.xlu0 %3960 }
 0x64f   : > { %v4102_v43 = vmul.f32 %v3961_v41, %v3718_v29  ;;  %5896 = vmatmul.mubr.msk.bf16.gmra.mrb[24].mxu1 %vm8535_vm5, %v4151_v4  ;;  %v3976_v47 = vpop.permute.xlu1 %3975  ;;  %vm8551_vm5 = vmmov %vm8540_vm0 }
 0x650   : > { %v4105_v15 = vmul.f32 %v3976_v47, %v3721_v24 }
 0x651   : > { %v4144_v21 = vpack.c.bf16 %v4103_v5, %v4102_v43 }
 0x652   : > { %v3971_v61 = vpop.permute.xlu0 %3970 }
 0x653   : > { %v4104_v2 = vmul.f32 %v3971_v61, %v3720_v31  ;;  %5881 = vmatprep.mubr.msk.bf16.mxu0 %vm8536_vm14, %v4144_v21  ;;  %v4046_v55 = vpop.permute.xlu1 %4045  ;;  %vm8552_vm14 = vmmov %vm8540_vm0 }
 0x654   : > { %v4119_v38 = vmul.f32 %v4046_v55, %v3735_v34 }
 0x655   : > { %v4145_v14 = vpack.c.bf16 %v4105_v15, %v4104_v2 }
 0x656   : > { %v4041_v25 = vpop.permute.xlu0 %4040 }
 0x657   : > { %v4118_v40 = vmul.f32 %v4041_v25, %v3734_v11  ;;  %5882 = vmatmul.mubr.msk.bf16.gmra.mrb[28].mxu0 %vm8537_vm4, %v4145_v14  ;;  %v4056_v42 = vpop.permute.xlu1 %4055  ;;  %vm8553_vm4 = vmmov %vm8540_vm0 }
 0x658   : > { %v4121_v44 = vmul.f32 %v4056_v42, %v3737_v53 }
 0x659   : > { %v4152_v51 = vpack.c.bf16 %v4119_v38, %v4118_v40 }
 0x65a   : > { %v4051_v60 = vpop.permute.xlu0 %4050 }
 0x65b   : > { %v4120_v52 = vmul.f32 %v4051_v60, %v3736_v58  ;;  %5899 = vmatprep.mubr.msk.bf16.mxu1 %vm8538_vm12, %v4152_v51  ;;  %vm8554_vm12 = vmmov %vm8540_vm0 }
 0x65d   : > { %v4153_v1 = vpack.c.bf16 %v4121_v44, %v4120_v52 }
 0x65f   : > { %5900 = vmatmul.mubr.msk.bf16.gmra.mrb[28].mxu1 %vm8539_vm2, %v4153_v1  ;;  %vm8555_vm2 = vmmov %vm8540_vm0 }
 0x6b8   : > { %v5835_v17 = vpop.f32.mrb[0].mxu0 }
 0x6b9   : > { %v4220_v27 = vpop.f32.mrb[1].mxu0  ;;  %v4669_v30 = vsel %vm8540_vm0, %v5835_v17, 0.0 }
 0x6ba   : > { %v5836_v32 = vpop.f32.mrb[2].mxu0  ;;  %v4655_v28 = vsel %vm8542_vm1, %v4220_v27, 0.0  ;;  %vm8557_vm1 = vmmov %vm8540_vm0 }
 0x6bb   : > { %v4223_v16 = vpop.f32.mrb[3].mxu0  ;;  %v4676_v0 = vsel %vm8544_vm3, %v5836_v32, 0.0  ;;  %vm8559_vm3 = vmmov %vm8540_vm0 }
 0x6bc   : > { %v4662_v50 = vsel %vm8546_vm13, %v4223_v16, 0.0  ;;  %vm8561_vm13 = vmmov %vm8540_vm0 }
 0x6bf   : > { %v5853_v26 = vpop.f32.mrb[0].mxu1 }
 0x6c0   : > { %v4670_v54 = vsel %vm8541_vm6, %v5853_v26, 0.0  ;;  %v4344_v7 = vpop.f32.mrb[1].mxu1  ;;  %vm8556_vm6 = vmmov %vm8540_vm0 }
 0x6c1   : > { %v7982_v49 = vadd.f32 %v4670_v54, %v4669_v30  ;;  %v4656_v57 = vsel %vm8543_vm7, %v4344_v7, 0.0  ;;  %v5854_v45 = vpop.f32.mrb[2].mxu1  ;;  %vm8558_vm7 = vmmov %vm8540_vm0 }
 0x6c2   : > { %v7986_v63 = vadd.f32 %v4656_v57, %v4655_v28  ;;  %v4677_v56 = vsel %vm8545_vm9, %v5854_v45, 0.0  ;;  %v4347_v22 = vpop.f32.mrb[3].mxu1  ;;  %vm8560_vm9 = vmmov %vm8540_vm0 }
 0x6c3   : > { %v7990_v59 = vadd.f32 %v4677_v56, %v4676_v0  ;;  %v4663_v3 = vsel %vm8547_vm15, %v4347_v22, 0.0  ;;  %vm8562_vm15 = vmmov %vm8540_vm0 }
 0x6c4   : > { %v7993_v62 = vadd.f32 %v4663_v3, %v4662_v50 }
 0x6ca   : > { %v5839_v8 = vpop.f32.mrb[4].mxu0 }
 0x6cb   : > { %v4236_v23 = vpop.f32.mrb[5].mxu0  ;;  %v4697_v12 = vsel %vm8548_vm8, %v5839_v8, 0.0  ;;  %vm8563_vm8 = vmmov %vm8540_vm0 }
 0x6cc   : > { %v5840_v46 = vpop.f32.mrb[6].mxu0  ;;  %v4683_v20 = vsel %vm8550_vm11, %v4236_v23, 0.0  ;;  %vm8565_vm11 = vmmov %vm8540_vm0 }
 0x6cd   : > { %v4239_v19 = vpop.f32.mrb[7].mxu0  ;;  %v4704_v36 = vsel %vm8552_vm14, %v5840_v46, 0.0  ;;  %vm8567_vm14 = vmmov %vm8540_vm0 }
 0x6ce   : > { %v4690_v29 = vsel %vm8554_vm12, %v4239_v19, 0.0  ;;  %vm8569_vm12 = vmmov %vm8540_vm0 }
 0x6d2   : > { %v5857_v6 = vpop.f32.mrb[4].mxu1 }
 0x6d3   : > { %v4698_v48 = vsel %vm8549_vm10, %v5857_v6, 0.0  ;;  %v4360_v33 = vpop.f32.mrb[5].mxu1  ;;  %vm8564_vm10 = vmmov %vm8540_vm0 }
 0x6d4   : > { %v7998_v13 = vadd.f32 %v4698_v48, %v4697_v12  ;;  %v4684_v18 = vsel %vm8551_vm5, %v4360_v33, 0.0  ;;  %v5858_v39 = vpop.f32.mrb[6].mxu1  ;;  %vm8566_vm5 = vmmov %vm8540_vm0 }
 0x6d5   : > { %v8002_v9 = vadd.f32 %v4684_v18, %v4683_v20  ;;  %v4705_v10 = vsel %vm8553_vm4, %v5858_v39, 0.0  ;;  %v4363_v35 = vpop.f32.mrb[7].mxu1  ;;  %vm8568_vm4 = vmmov %vm8540_vm0 }
 0x6d6   : > { %v8006_v4 = vadd.f32 %v4705_v10, %v4704_v36  ;;  %v4691_v37 = vsel %vm8555_vm2, %v4363_v35, 0.0  ;;  %vm8570_vm2 = vmmov %vm8540_vm0  ;;  %v8055_v35 = vld [vmem:[%s8261_s6] ss:$0 sm:$0xff] }
 0x6d7   : > { %v8009_v5 = vadd.f32 %v4691_v37, %v4690_v29 }
 0x6da   : > { %v5843_v41 = vpop.f32.mrb[8].mxu0 }
 0x6db   : > { %v4252_v43 = vpop.f32.mrb[9].mxu0  ;;  %v4725_v47 = vsel %vm8540_vm0, %v5843_v41, 0.0 }
 0x6dc   : > { %v5844_v24 = vpop.f32.mrb[10].mxu0  ;;  %v4711_v2 = vsel %vm8557_vm1, %v4252_v43, 0.0  ;;  %vm8572_vm1 = vmmov %vm8540_vm0 }
 0x6dd   : > { %v4255_v31 = vpop.f32.mrb[11].mxu0  ;;  %v4732_v55 = vsel %vm8559_vm3, %v5844_v24, 0.0  ;;  %vm8574_vm3 = vmmov %vm8540_vm0 }
 0x6de   : > { %v4718_v53 = vsel %vm8561_vm13, %v4255_v31, 0.0  ;;  %vm8576_vm13 = vmmov %vm8540_vm0 }
 0x6e2   : > { %v5861_v21 = vpop.f32.mrb[8].mxu1 }
 0x6e3   : > { %v4726_v15 = vsel %vm8556_vm6, %v5861_v21, 0.0  ;;  %v4376_v61 = vpop.f32.mrb[9].mxu1  ;;  %vm8571_vm6 = vmmov %vm8540_vm0  ;;  %v4790_v21 = vld [vmem:[%s6588_s19] sm:$0xff] }
 0x6e4   : > { %v8014_v34 = vadd.f32 %v4726_v15, %v4725_v47  ;;  %v4712_v11 = vsel %vm8558_vm7, %v4376_v61, 0.0  ;;  %v5862_v14 = vpop.f32.mrb[10].mxu1  ;;  %vm8573_vm7 = vmmov %vm8540_vm0 }
 0x6e5   : > { %v8018_v38 = vadd.f32 %v4712_v11, %v4711_v2  ;;  %v4733_v25 = vsel %vm8560_vm9, %v5862_v14, 0.0  ;;  %v4379_v40 = vpop.f32.mrb[11].mxu1  ;;  %vm8575_vm9 = vmmov %vm8540_vm0  ;;  %v4793_v2 = vld [vmem:[%s6588_s19 + $0x18] sm:$0xff] }
 0x6e6   : > { %v8022_v58 = vadd.f32 %v4733_v25, %v4732_v55  ;;  %v4719_v51 = vsel %vm8562_vm15, %v4379_v40, 0.0  ;;  %vm8577_vm15 = vmmov %vm8540_vm0  ;;  %v4791_v25 = vld [vmem:[%s6588_s19 + $0x8] sm:$0xff] }
 0x6e7   : > { %v8025_v42 = vadd.f32 %v4719_v51, %v4718_v53 }
 0x6ea   : > { %v5847_v44 = vpop.f32.mrb[12].mxu0 }
 0x6eb   : > { %v4268_v60 = vpop.f32.mrb[13].mxu0  ;;  %v4753_v27 = vsel %vm8563_vm8, %v5847_v44, 0.0  ;;  %vm8578_vm8 = vmmov %vm8540_vm0 }
 0x6ec   : > { %v5848_v52 = vpop.f32.mrb[14].mxu0  ;;  %v4739_v26 = vsel %vm8565_vm11, %v4268_v60, 0.0  ;;  %vm8580_vm11 = vmmov %vm8540_vm0 }
 0x6ed   : > { %v4271_v1 = vpop.f32.mrb[15].mxu0  ;;  %v4760_v28 = vsel %vm8567_vm14, %v5848_v52, 0.0  ;;  %vm8582_vm14 = vmmov %vm8540_vm0 }
 0x6ee   : > { %v4746_v56 = vsel %vm8569_vm12, %v4271_v1, 0.0  ;;  %vm8584_vm12 = vmmov %vm8540_vm0 }
 0x6f2   : > { %v5865_v17 = vpop.f32.mrb[12].mxu1 }
 0x6f3   : > { %v4754_v32 = vsel %vm8564_vm10, %v5865_v17, 0.0  ;;  %v4392_v16 = vpop.f32.mrb[13].mxu1  ;;  %vm8579_vm10 = vmmov %vm8540_vm0 }
 0x6f4   : > { %v8030_v30 = vadd.f32 %v4754_v32, %v4753_v27  ;;  %v4740_v54 = vsel %vm8566_vm5, %v4392_v16, 0.0  ;;  %v5866_v7 = vpop.f32.mrb[14].mxu1  ;;  %vm8581_vm5 = vmmov %vm8540_vm0 }
 0x6f5   : > { %v8034_v57 = vadd.f32 %v4740_v54, %v4739_v26  ;;  %v4761_v45 = vsel %vm8568_vm4, %v5866_v7, 0.0  ;;  %v4395_v0 = vpop.f32.mrb[15].mxu1  ;;  %vm8583_vm4 = vmmov %vm8540_vm0 }
 0x6f6   : > { %v8038_v22 = vadd.f32 %v4761_v45, %v4760_v28  ;;  %v4747_v50 = vsel %vm8570_vm2, %v4395_v0, 0.0  ;;  %vm8585_vm2 = vmmov %vm8540_vm0 }
 0x6f7   : > { %v8041_v3 = vadd.f32 %v4747_v50, %v4746_v56 }
 0x6fa   : > { %v5871_v8 = vpop.f32.mrb[16].mxu0 }
 0x6fb   : > { %v4672_v23 = vsel %vm8540_vm0, %v5871_v8, 0.0  ;;  %v4468_v46 = vpop.f32.mrb[17].mxu0 }
 0x6fc   : > { %v4673_v19 = vadd.f32 %v4672_v23, %v7982_v49  ;;  %v4658_v6 = vsel %vm8571_vm6, %v4468_v46, 0.0  ;;  %v5872_v12 = vpop.f32.mrb[18].mxu0  ;;  %vm8586_vm6 = vmmov %vm8540_vm0 }
 0x6fd   : > { %v4659_v48 = vadd.f32 %v4658_v6, %v7986_v63  ;;  %v4679_v33 = vsel %vm8572_vm1, %v5872_v12, 0.0  ;;  %v4471_v20 = vpop.f32.mrb[19].mxu0  ;;  %vm8587_vm1 = vmmov %vm8540_vm0 }
 0x6fe   : > { %v4680_v18 = vadd.f32 %v4679_v33, %v7990_v59  ;;  %v4665_v39 = vsel %vm8573_vm7, %v4471_v20, 0.0  ;;  %v4792_v59 = vld [vmem:[%s6588_s19 + $0x10] sm:$0xff]  ;;  %vm8588_vm7 = vmmov %vm8540_vm0 }
 0x6ff   : > { %v4666_v36 = vadd.f32 %v4665_v39, %v7993_v62 }
 0x702   : > { %v5889_v10 = vpop.f32.mrb[16].mxu1 }
 0x703   : > { %v4674_v49 = vsel %vm8574_vm3, %v5889_v10, 0.0  ;;  %v4592_v63 = vpop.f32.mrb[17].mxu1  ;;  %vm8589_vm3 = vmmov %vm8540_vm0 }
 0x704   : > { %v4675_v29 = vadd.f32 %v4674_v49, %v4673_v19  ;;  %v4660_v37 = vsel %vm8575_vm9, %v4592_v63, 0.0  ;;  %v5890_v41 = vpop.f32.mrb[18].mxu1  ;;  %vm8590_vm9 = vmmov %vm8540_vm0 }
 0x705   : > { %v4661_v43 = vadd.f32 %v4660_v37, %v4659_v48  ;;  %v4681_v62 = vsel %vm8576_vm13, %v5890_v41, 0.0  ;;  %v4595_v24 = vpop.f32.mrb[19].mxu1  ;;  %vm8591_vm13 = vmmov %vm8540_vm0  ;;  %v4796_v41 = vld [vmem:[%s6588_s19 + $0x30] sm:$0xff] }
 0x706   : > { %v4776_v31 = vadd.f32 %v8055_v35, %v4675_v29  ;;  %v4682_v47 = vadd.f32 %v4681_v62, %v4680_v18  ;;  %v4667_v15 = vsel %vm8577_vm15, %v4595_v24, 0.0  ;;  %vm8592_vm15 = vmmov %vm8540_vm0 }
 0x707   : > { %v4774_v61 = vadd.f32 %v8055_v35, %v4661_v43  ;;  %v4668_v11 = vadd.f32 %v4667_v15, %v4666_v36 }
 0x708   : > { %v4808_v14 = vadd.f32 %v4792_v59, %v4776_v31  ;;  %v4777_v55 = vadd.f32 %v8055_v35, %v4682_v47  ;;  %v4794_v31 = vld [vmem:[%s6588_s19 + $0x20] sm:$0xff] }
 0x709   : > { %v4806_v40 = vadd.f32 %v4790_v21, %v4774_v61  ;;  %v4775_v53 = vadd.f32 %v8055_v35, %v4668_v11  ;;  %v4797_v61 = vld [vmem:[%s6588_s19 + $0x38] sm:$0xff] }
 0x70a   : > { %4824 = vst.msk [vmem:[%s6598_s15 + $0x10] sm:$0xff] %vm8578_vm8, %v4808_v14  ;;  %v4809_v51 = vadd.f32 %v4793_v2, %v4777_v55  ;;  %v5875_v44 = vpop.f32.mrb[20].mxu0  ;;  %v4841_v27 = vsel %vm8581_vm5, %v4808_v14, 0.0  ;;  %v4877_v32 = vmul.f32 %v4808_v14, %v4808_v14  ;;  %vm8593_vm8 = vmmov %vm8540_vm0  ;;  %v4795_v55 = vld [vmem:[%s6588_s19 + $0x28] sm:$0xff] }
 0x70b   : > { %4822 = vst.msk [vmem:[%s6598_s15] sm:$0xff] %vm8579_vm10, %v4806_v40  ;;  %v4875_v60 = vmul.f32 %v4806_v40, %v4806_v40  ;;  %v4807_v52 = vadd.f32 %v4791_v25, %v4775_v53  ;;  %v4700_v1 = vsel %vm8580_vm11, %v5875_v44, 0.0  ;;  %v4484_v17 = vpop.f32.mrb[21].mxu0  ;;  %v4838_v54 = vsel %vm8583_vm4, %v4806_v40, 0.0  ;;  %vm8594_vm10 = vmmov %vm8540_vm0 }
 0x70c   : > { %4825 = vst.msk [vmem:[%s6598_s15 + $0x18] sm:$0xff] %vm8582_vm14, %v4809_v51  ;;  %v4701_v16 = vadd.f32 %v4700_v1, %v7998_v13  ;;  %v5876_v26 = vpop.f32.mrb[22].mxu0  ;;  %v4686_v45 = vsel %vm8540_vm0, %v4484_v17, 0.0  ;;  %v4878_v56 = vmul.f32 %v4809_v51, %v4809_v51  ;;  %v4894_v20 = vsel %vm8590_vm9, %v4877_v32, 0.0  ;;  %vm8595_vm11 = vmmov %vm8540_vm0 }
 0x70d   : > { %4823 = vst.msk [vmem:[%s6598_s15 + $0x8] sm:$0xff] %vm8584_vm12, %v4807_v52  ;;  %v4839_v7 = vsel %vm8585_vm2, %v4807_v52, 0.0  ;;  %v4876_v28 = vmul.f32 %v4807_v52, %v4807_v52  ;;  %v4487_v0 = vpop.f32.mrb[23].mxu0  ;;  %v4687_v8 = vadd.f32 %v4686_v45, %v8002_v9  ;;  %v4707_v23 = vsel %vm8586_vm6, %v5876_v26, 0.0  ;;  %vm8596_vm5 = vmmov %vm8540_vm0 }
 0x70e   : > { %v4840_v50 = vadd.f32 %v4839_v7, %v4838_v54  ;;  %v4891_v46 = vsel %vm8587_vm1, %v4875_v60, 0.0  ;;  %v4708_v19 = vadd.f32 %v4707_v23, %v8006_v4  ;;  %v4693_v6 = vsel %vm8589_vm3, %v4487_v0, 0.0  ;;  %vm8597_vm14 = vmmov %vm8540_vm0 }
 0x70f   : > { %v4892_v13 = vsel %vm8588_vm7, %v4876_v28, 0.0  ;;  %v4694_v33 = vadd.f32 %v4693_v6, %v8009_v5  ;;  %v4843_v18 = vsel %vm8591_vm13, %v4809_v51, 0.0  ;;  %v4896_v10 = vsel %vm8592_vm15, %v4878_v56, 0.0  ;;  %vm8598_vm4 = vmmov %vm8540_vm0 }
 0x710   : > { %v4842_v12 = vadd.f32 %v4841_v27, %v4840_v50  ;;  %v4893_v48 = vadd.f32 %v4892_v13, %v4891_v46  ;;  %vm8599_vm12 = vmmov %vm8540_vm0 }
 0x711   : > { %vm8600_vm2 = vmmov %vm8540_vm0 }
 0x712   : > { %v4895_v9 = vadd.f32 %v4894_v20, %v4893_v48  ;;  %v5893_v39 = vpop.f32.mrb[20].mxu1  ;;  %v4844_v36 = vadd.f32 %v4843_v18, %v4842_v12  ;;  %vm8601_vm6 = vmmov %vm8540_vm0 }
 0x713   : > { %v4702_v4 = vsel %vm8593_vm8, %v5893_v39, 0.0  ;;  %v4608_v49 = vpop.f32.mrb[21].mxu1  ;;  %vm8602_vm1 = vmmov %vm8540_vm0 }
 0x714   : > { %v4703_v63 = vadd.f32 %v4702_v4, %v4701_v16  ;;  %v4688_v29 = vsel %vm8594_vm10, %v4608_v49, 0.0  ;;  %v4897_v37 = vadd.f32 %v4896_v10, %v4895_v9  ;;  %v5894_v5 = vpop.f32.mrb[22].mxu1  ;;  %vm8603_vm7 = vmmov %vm8540_vm0 }
 0x715   : > { %v4689_v59 = vadd.f32 %v4688_v29, %v4687_v8  ;;  %v4709_v43 = vsel %vm8595_vm11, %v5894_v5, 0.0  ;;  %v4611_v62 = vpop.f32.mrb[23].mxu1  ;;  %vm8604_vm3 = vmmov %vm8540_vm0  ;;  %v4800_v29 = vld [vmem:[%s6588_s19 + $0x50] sm:$0xff] }
 0x716   : > { %v4780_v24 = vadd.f32 %v8055_v35, %v4703_v63  ;;  %v4710_v21 = vadd.f32 %v4709_v43, %v4708_v19  ;;  %v4695_v47 = vsel %vm8596_vm5, %v4611_v62, 0.0  ;;  %vm8605_vm9 = vmmov %vm8540_vm0  ;;  %v4798_v43 = vld [vmem:[%s6588_s19 + $0x40] sm:$0xff] }
 0x717   : > { %v4778_v15 = vadd.f32 %v8055_v35, %v4689_v59  ;;  %v4696_v2 = vadd.f32 %v4695_v47, %v4694_v33  ;;  %vm8606_vm13 = vmmov %vm8540_vm0 }
 0x718   : > { %v4812_v11 = vadd.f32 %v4796_v41, %v4780_v24  ;;  %v4781_v14 = vadd.f32 %v8055_v35, %v4710_v21  ;;  %vm8607_vm15 = vmmov %vm8540_vm0  ;;  %v4801_v21 = vld [vmem:[%s6588_s19 + $0x58] sm:$0xff] }
 0x719   : > { %v4810_v25 = vadd.f32 %v4794_v31, %v4778_v15  ;;  %v4779_v40 = vadd.f32 %v8055_v35, %v4696_v2  ;;  %vm8608_vm8 = vmmov %vm8540_vm0  ;;  %v4799_v2 = vld [vmem:[%s6588_s19 + $0x48] sm:$0xff] }
 0x71a   : > { %4828 = vst.msk [vmem:[%s6598_s15 + $0x30] sm:$0xff] %vm8597_vm14, %v4812_v11  ;;  %v4813_v53 = vadd.f32 %v4797_v61, %v4781_v14  ;;  %v5879_v51 = vpop.f32.mrb[24].mxu0  ;;  %v4849_v27 = vsel %vm8540_vm0, %v4812_v11, 0.0  ;;  %v4881_v32 = vmul.f32 %v4812_v11, %v4812_v11  ;;  %vm8609_vm10 = vmmov %vm8540_vm0 }
 0x71b   : > { %4826 = vst.msk [vmem:[%s6598_s15 + $0x20] sm:$0xff] %vm8598_vm4, %v4810_v25  ;;  %v4845_v44 = vsel %vm8599_vm12, %v4810_v25, 0.0  ;;  %v4879_v60 = vmul.f32 %v4810_v25, %v4810_v25  ;;  %v4811_v52 = vadd.f32 %v4795_v55, %v4779_v40  ;;  %v4728_v1 = vsel %vm8600_vm2, %v5879_v51, 0.0  ;;  %v4500_v17 = vpop.f32.mrb[25].mxu0  ;;  %vm8610_vm11 = vmmov %vm8540_vm0 }
 0x71c   : > { %v4846_v16 = vadd.f32 %v4845_v44, %v4844_v36  ;;  %4829 = vst.msk [vmem:[%s6598_s15 + $0x38] sm:$0xff] %vm8601_vm6, %v4813_v53  ;;  %v5880_v26 = vpop.f32.mrb[26].mxu0  ;;  %v4729_v45 = vadd.f32 %v4728_v1, %v8014_v34  ;;  %v4882_v50 = vmul.f32 %v4813_v53, %v4813_v53  ;;  %v4714_v23 = vsel %vm8605_vm9, %v4500_v17, 0.0  ;;  %vm8611_vm5 = vmmov %vm8540_vm0 }
 0x71d   : > { %v4898_v54 = vsel %vm8602_vm1, %v4879_v60, 0.0  ;;  %4827 = vst.msk [vmem:[%s6598_s15 + $0x28] sm:$0xff] %vm8603_vm7, %v4811_v52  ;;  %v4847_v7 = vsel %vm8604_vm3, %v4811_v52, 0.0  ;;  %v4880_v28 = vmul.f32 %v4811_v52, %v4811_v52  ;;  %v4503_v0 = vpop.f32.mrb[27].mxu0  ;;  %v4715_v13 = vadd.f32 %v4714_v23, %v8018_v38  ;;  %vm8612_vm14 = vmmov %vm8540_vm0 }
 0x71e   : > { %v4899_v56 = vadd.f32 %v4898_v54, %v4897_v37  ;;  %v4848_v8 = vadd.f32 %v4847_v7, %v4846_v16  ;;  %v4735_v19 = vsel %vm8607_vm15, %v5880_v26, 0.0  ;;  %v4721_v6 = vsel %vm8608_vm8, %v4503_v0, 0.0  ;;  %vm8613_vm4 = vmmov %vm8540_vm0 }
 0x71f   : > { %v4900_v46 = vsel %vm8606_vm13, %v4880_v28, 0.0  ;;  %v4736_v33 = vadd.f32 %v4735_v19, %v8022_v58  ;;  %v4722_v34 = vadd.f32 %v4721_v6, %v8025_v42  ;;  %v4902_v20 = vsel %vm8609_vm10, %v4881_v32, 0.0  ;;  %vm8614_vm12 = vmmov %vm8540_vm0 }
 0x720   : > { %v4850_v12 = vadd.f32 %v4849_v27, %v4848_v8  ;;  %v4901_v48 = vadd.f32 %v4900_v46, %v4899_v56  ;;  %v4851_v18 = vsel %vm8610_vm11, %v4813_v53, 0.0  ;;  %v4904_v38 = vsel %vm8611_vm5, %v4882_v50, 0.0  ;;  %vm8615_vm2 = vmmov %vm8540_vm0 }
 0x721   : > { %vm8616_vm6 = vmmov %vm8540_vm0 }
 0x722   : > { %v4903_v9 = vadd.f32 %v4902_v20, %v4901_v48  ;;  %v5897_v39 = vpop.f32.mrb[24].mxu1  ;;  %v4852_v36 = vadd.f32 %v4851_v18, %v4850_v12  ;;  %vm8617_vm1 = vmmov %vm8540_vm0 }
 0x723   : > { %v4730_v10 = vsel %vm8612_vm14, %v5897_v39, 0.0  ;;  %v4624_v4 = vpop.f32.mrb[25].mxu1  ;;  %vm8618_vm7 = vmmov %vm8540_vm0 }
 0x724   : > { %v4731_v49 = vadd.f32 %v4730_v10, %v4729_v45  ;;  %v4716_v63 = vsel %vm8613_vm4, %v4624_v4, 0.0  ;;  %v4905_v58 = vadd.f32 %v4904_v38, %v4903_v9  ;;  %v5898_v42 = vpop.f32.mrb[26].mxu1  ;;  %vm8619_vm3 = vmmov %vm8540_vm0  ;;  %v4804_v38 = vld [vmem:[%s6588_s19 + $0x70] sm:$0xff] }
 0x725   : > { %v4717_v37 = vadd.f32 %v4716_v63, %v4715_v13  ;;  %v4737_v5 = vsel %vm8614_vm12, %v5898_v42, 0.0  ;;  %v4627_v41 = vpop.f32.mrb[27].mxu1  ;;  %vm8620_vm9 = vmmov %vm8540_vm0 }
 0x726   : > { %v4784_v59 = vadd.f32 %v8055_v35, %v4731_v49  ;;  %v4738_v62 = vadd.f32 %v4737_v5, %v4736_v33  ;;  %v4723_v24 = vsel %vm8615_vm2, %v4627_v41, 0.0  ;;  %vm8621_vm13 = vmmov %vm8540_vm0  ;;  %v4805_v5 = vld [vmem:[%s6588_s19 + $0x78] sm:$0xff] }
 0x727   : > { %v4782_v31 = vadd.f32 %v8055_v35, %v4717_v37  ;;  %v4724_v47 = vadd.f32 %v4723_v24, %v4722_v34  ;;  %vm8622_vm15 = vmmov %vm8540_vm0 }
 0x728   : > { %v4816_v15 = vadd.f32 %v4800_v29, %v4784_v59  ;;  %v4785_v61 = vadd.f32 %v8055_v35, %v4738_v62  ;;  %vm8623_vm8 = vmmov %vm8540_vm0  ;;  %v4803_v62 = vld [vmem:[%s6588_s19 + $0x68] sm:$0xff] }
 0x729   : > { %v4814_v11 = vadd.f32 %v4798_v43, %v4782_v31  ;;  %v4783_v14 = vadd.f32 %v8055_v35, %v4724_v47  ;;  %vm8624_vm10 = vmmov %vm8540_vm0 }
 0x72a   : > { %4832 = vst.msk [vmem:[%s6598_s15 + $0x50] sm:$0xff] %vm8540_vm0, %v4816_v15  ;;  %v4817_v55 = vadd.f32 %v4801_v21, %v4785_v61  ;;  %v5883_v25 = vpop.f32.mrb[28].mxu0  ;;  %v4857_v52 = vsel %vm8619_vm3, %v4816_v15, 0.0  ;;  %v4885_v1 = vmul.f32 %v4816_v15, %v4816_v15  ;;  %vm8625_vm11 = vmmov %vm8540_vm0 }
 0x72b   : > { %4830 = vst.msk [vmem:[%s6598_s15 + $0x40] sm:$0xff] %vm8616_vm6, %v4814_v11  ;;  %v4853_v40 = vsel %vm8617_vm1, %v4814_v11, 0.0  ;;  %v4883_v53 = vmul.f32 %v4814_v11, %v4814_v11  ;;  %v4815_v51 = vadd.f32 %v4799_v2, %v4783_v14  ;;  %v4756_v44 = vsel %vm8618_vm7, %v5883_v25, 0.0  ;;  %v4516_v60 = vpop.f32.mrb[29].mxu0  ;;  %vm8626_vm5 = vmmov %vm8540_vm0 }
 0x72c   : > { %v4854_v17 = vadd.f32 %v4853_v40, %v4852_v36  ;;  %4833 = vst.msk [vmem:[%s6598_s15 + $0x58] sm:$0xff] %vm8620_vm9, %v4817_v55  ;;  %v5884_v27 = vpop.f32.mrb[30].mxu0  ;;  %v4757_v54 = vadd.f32 %v4756_v44, %v8030_v30  ;;  %v4886_v45 = vmul.f32 %v4817_v55, %v4817_v55  ;;  %v4742_v56 = vsel %vm8624_vm10, %v4516_v60, 0.0  ;;  %vm8627_vm14 = vmmov %vm8540_vm0 }
 0x72d   : > { %v4906_v32 = vsel %vm8621_vm13, %v4883_v53, 0.0  ;;  %4831 = vst.msk [vmem:[%s6598_s15 + $0x48] sm:$0xff] %vm8622_vm15, %v4815_v51  ;;  %v4855_v16 = vsel %vm8623_vm8, %v4815_v51, 0.0  ;;  %v4884_v26 = vmul.f32 %v4815_v51, %v4815_v51  ;;  %v4519_v7 = vpop.f32.mrb[31].mxu0  ;;  %v4743_v8 = vadd.f32 %v4742_v56, %v8034_v57  ;;  %vm8628_vm4 = vmmov %vm8540_vm0 }
 0x72e   : > { %v4907_v28 = vadd.f32 %v4906_v32, %v4905_v58  ;;  %v4856_v0 = vadd.f32 %v4855_v16, %v4854_v17  ;;  %v4763_v23 = vsel %vm8626_vm5, %v5884_v27, 0.0  ;;  %v4749_v46 = vsel %vm8627_vm14, %v4519_v7, 0.0  ;;  %vm8629_vm12 = vmmov %vm8540_vm0  ;;  %v4802_v58 = vld [vmem:[%s6588_s19 + $0x60] sm:$0xff] }
 0x72f   : > { %v4908_v50 = vsel %vm8625_vm11, %v4884_v26, 0.0  ;;  %v4764_v6 = vadd.f32 %v4763_v23, %v8038_v22  ;;  %v4750_v30 = vadd.f32 %v4749_v46, %v8041_v3  ;;  %v4910_v12 = vsel %vm8628_vm4, %v4885_v1, 0.0  ;;  %vm8630_vm2 = vmmov %vm8540_vm0 }
 0x730   : > { %v4858_v13 = vadd.f32 %v4857_v52, %v4856_v0  ;;  %v4909_v19 = vadd.f32 %v4908_v50, %v4907_v28  ;;  %v4859_v48 = vsel %vm8629_vm12, %v4817_v55, 0.0  ;;  %v4912_v57 = vsel %vm8630_vm2, %v4886_v45, 0.0  ;;  %vm8631_vm6 = vmmov %vm8540_vm0 }
 0x731   : > { %vm8632_vm1 = vmmov %vm8540_vm0 }
 0x732   : > { %v4911_v33 = vadd.f32 %v4910_v12, %v4909_v19  ;;  %v5901_v34 = vpop.f32.mrb[28].mxu1  ;;  %v4860_v20 = vadd.f32 %v4859_v48, %v4858_v13  ;;  %vm8633_vm7 = vmmov %vm8540_vm0 }
 0x733   : > { %v4758_v18 = vsel %vm8540_vm0, %v5901_v34, 0.0  ;;  %v4640_v9 = vpop.f32.mrb[29].mxu1  ;;  %vm8634_vm3 = vmmov %vm8540_vm0 }
 0x734   : > { %v4759_v39 = vadd.f32 %v4758_v18, %v4757_v54  ;;  %v4744_v36 = vsel %vm8631_vm6, %v4640_v9, 0.0  ;;  %v4913_v22 = vadd.f32 %v4912_v57, %v4911_v33  ;;  %v5902_v3 = vpop.f32.mrb[30].mxu1  ;;  %vm8635_vm9 = vmmov %vm8540_vm0  ;;  %vm4930_vm6 = vcmask 254976  }
 0x735   : > { %v4745_v10 = vadd.f32 %v4744_v36, %v4743_v8  ;;  %v4765_v4 = vsel %vm8632_vm1, %v5902_v3, 0.0  ;;  %v4643_v49 = vpop.f32.mrb[31].mxu1  ;;  %vm8636_vm13 = vmmov %vm8540_vm0 }
 0x736   : > { %v4788_v63 = vadd.f32 %v8055_v35, %v4759_v39  ;;  %v4766_v42 = vadd.f32 %v4765_v4, %v4764_v6  ;;  %v4751_v29 = vsel %vm8633_vm7, %v4643_v49, 0.0  ;;  %vm8637_vm15 = vmmov %vm8540_vm0 }
 0x737   : > { %v4786_v37 = vadd.f32 %v8055_v35, %v4745_v10  ;;  %v4752_v41 = vadd.f32 %v4751_v29, %v4750_v30  ;;  %vm8638_vm8 = vmmov %vm8540_vm0 }
 0x738   : > { %v4820_v59 = vadd.f32 %v4804_v38, %v4788_v63  ;;  %v4789_v43 = vadd.f32 %v8055_v35, %v4766_v42  ;;  %vm8639_vm10 = vmmov %vm8540_vm0 }
 0x739   : > { %v4818_v24 = vadd.f32 %v4802_v58, %v4786_v37  ;;  %v4787_v31 = vadd.f32 %v8055_v35, %v4752_v41  ;;  %vm8640_vm11 = vmmov %vm8540_vm0 }
 0x73a   : > { %4836 = vst.msk [vmem:[%s6598_s15 + $0x70] sm:$0xff] %vm8634_vm3, %v4820_v59  ;;  %v4821_v21 = vadd.f32 %v4805_v5, %v4789_v43  ;;  %v4889_v11 = vmul.f32 %v4820_v59, %v4820_v59  ;;  %vm8641_vm5 = vmmov %vm8540_vm0 }
 0x73b   : > { %4834 = vst.msk [vmem:[%s6598_s15 + $0x60] sm:$0xff] %vm8635_vm9, %v4818_v24  ;;  %v4861_v47 = vsel %vm8636_vm13, %v4818_v24, 0.0  ;;  %v4887_v15 = vmul.f32 %v4818_v24, %v4818_v24  ;;  %v4819_v61 = vadd.f32 %v4803_v62, %v4787_v31  ;;  %v4865_v53 = vsel %vm8641_vm5, %v4820_v59, 0.0  ;;  %vm8642_vm14 = vmmov %vm8540_vm0 }
 0x73c   : > { %v4862_v2 = vadd.f32 %v4861_v47, %v4860_v20  ;;  %4837 = vst.msk [vmem:[%s6598_s15 + $0x78] sm:$0xff] %vm8637_vm15, %v4821_v21  ;;  %v4890_v51 = vmul.f32 %v4821_v21, %v4821_v21  ;;  %vm8643_vm4 = vmmov %vm8540_vm0 }
 0x73d   : > { %v4914_v14 = vsel %vm8638_vm8, %v4887_v15, 0.0  ;;  %4835 = vst.msk [vmem:[%s6598_s15 + $0x68] sm:$0xff] %vm8639_vm10, %v4819_v61  ;;  %v4863_v55 = vsel %vm8640_vm11, %v4819_v61, 0.0  ;;  %v4888_v35 = vmul.f32 %v4819_v61, %v4819_v61  ;;  %v4918_v1 = vsel %vm8643_vm4, %v4889_v11, 0.0  ;;  %vm8644_vm12 = vmmov %vm8540_vm0 }
 0x73e   : > { %v4915_v25 = vadd.f32 %v4914_v14, %v4913_v22  ;;  %v4864_v40 = vadd.f32 %v4863_v55, %v4862_v2  ;;  %v4867_v17 = vsel %vm8644_vm12, %v4821_v21, 0.0  ;;  %vm8645_vm2 = vmmov %vm8540_vm0  ;;  %vm4928_vm0 = vcmask 1040384  }
 0x73f   : > { %v4916_v44 = vsel %vm8642_vm14, %v4888_v35, 0.0  ;;  %v4920_v16 = vsel %vm8645_vm2, %v4890_v51, 0.0 }
 0x740   : > { %v4866_v60 = vadd.f32 %v4865_v53, %v4864_v40  ;;  %v4917_v52 = vadd.f32 %v4916_v44, %v4915_v25 }
 0x742   : > { %v4868_v27 = vadd.f32 %v4867_v17, %v4866_v60  ;;  %v4919_v32 = vadd.f32 %v4918_v1, %v4917_v52 }
 0x744   : > { %v4869_v26 = vrot.slane %v4868_v27, 4  ;;  %v4921_v54 = vadd.f32 %v4920_v16, %v4919_v32 }
 0x746   : > { %v4870_v7 = vadd.f32 %v4869_v26, %v4868_v27  ;;  %v4922_v28 = vrot.slane %v4921_v54, 4 }
 0x748   : > { %v4871_v45 = vrot.slane %v4870_v7, 2  ;;  %v4923_v0 = vadd.f32 %v4922_v28, %v4921_v54 }
 0x74a   : > { %v4872_v56 = vadd.f32 %v4871_v45, %v4870_v7  ;;  %v4924_v50 = vrot.slane %v4923_v0, 2 }
 0x74c   : > { %v4873_v8 = vrot.slane %v4872_v56, 1  ;;  %v4925_v23 = vadd.f32 %v4924_v50, %v4923_v0 }
 0x74e   : > { %v4926_v46 = vrot.slane %v4925_v23, 1  ;;  %v4874_v13 = vadd.f32 %v4873_v8, %v4872_v56 }
 0x750   : > { %v4927_v19 = vadd.f32 %v4926_v46, %v4925_v23 }
 0x752   : > { %v4929_v6 = vsel %vm4928_vm0, %v4874_v13, %v4927_v19 }
 0x753   : > { %4931 = vst.msk [vmem:[%s406_s17] sm:$0x3] %vm4930_vm6, %v4929_v6 }
 0x754 PF: > { %s5347_s15 = sshll.u32 %s6403_s11, 5  ;;  %s4955_s21 = sshll.u32 %s406_s17, 4  ;;  %s4956_s21 = int_to_ptr.vmem [resolvable:$true] %s4955_s21 }
 0x755   : > { %s8198_s18 = scalar_lea.hbm %s8263_s8, %s5347_s15  ;;  %s8646_s16 = sand.u32 1, %s6383_s28  }
 0x756   : > { %s4938_s9 = scalar_lea.sflag [#allocation9], %s8646_s16  ;;  %s6305_s10 = scalar_lea.vmem %s4956_s21, 32 }
 0x757   : > { %p6306_p8 = scmp.ne.s32.totalorder %s4956_s21, %s6305_s10  ;;  %s6430_s20 = smov [#allocation8]  }
 0x758   : > { %s6309_s24 = sshll.u32 %s6430_s20, 4  ;;  %s6310_s24 = int_to_ptr.vmem [resolvable:$false] %s6309_s24 }
 0x759   : > { %p6307_p9 = pnand %p6306_p8, %p6548_p7  ;;  %s6311_s25 = scalar_lea.vmem %s6310_s24, 64 }
 0x75a   : > { %p6312_p11 = scmp.lt.s32.totalorder %s4956_s21, %s6310_s24  ;;  %p6313_p13 = scmp.lt.s32.totalorder %s6311_s25, %s6305_s10 }
 0x75b   : > { %p6308_p10 = pneg %p6307_p9 }
 0x75c   : > { %p6314_p0 = por %p6313_p13, %p6312_p11 }
 0x75e   : > { %p6315_p1 = pnand %p6314_p0, %p6308_p10 }
 0x760   : > { %6318 = shalt.err (!%p6315_p1)
}
 0x761   : > { %s6319_s11 = scalar_lea.hbm %s8198_s18, 32  ;;  %s6323_s22 = scalar_lea.hbm %s8263_s8, 64 }
 0x762   : > { %p6320_p2 = scmp.ne.s32.totalorder %s8198_s18, %s6319_s11  ;;  %p6324_p5 = scmp.lt.u32.totalorder %s8198_s18, %s8263_s8 }
 0x763   : > { %p6325_p6 = scmp.lt.u32.totalorder %s6323_s22, %s6319_s11  ;;  %p6327_p9 = scmp.lt.u32.totalorder %s6319_s11, %s8198_s18 }
 0x764   : > { %p6321_p3 = pnand %p6320_p2, %p6548_p7 }
 0x765   : > { %p6326_p8 = por %p6325_p6, %p6324_p5 }
 0x766   : > { %p6322_p4 = pneg %p6321_p3 }
 0x767   : > { %p6328_p10 = por %p6327_p9, %p6326_p8 }
 0x769   : > { %p6329_p11 = pnand %p6328_p10, %p6322_p4 }
 0x76b   : > { %6332 = shalt.err (!%p6329_p11)
}
 0x76c   : > { %5943 = dma.vmem_to_hbm [thread:$0]  (%p6548_p7), %s4956_s21, 32, %s8198_s18, %s4938_s9  }
 0x76d PF: > { %s8647_s2 = sld [smem:[#allocation11_spill]]  ;;  %p5949_p13 = scmp.ge.s32.totalorder %s6415_s14, 2 }
 0x76f   : > { %p5946_p0 = pnand %p5949_p13, %p6556_p12 }
 0x773   : > { %s4975_s15 = sand.u32 1, %s8647_s2  }
 0x774   : > { %s4976_s19 = scalar_lea.sflag [#allocation9], %s4975_s15 }
 0x775   : > { %6374 = dma.done.wait (!%p5946_p0), %s4976_s19, 32  }
 0x776   : > { %6376 = vsyncadd (!%p5946_p0), %s4976_s19, 4294967264  ;;  %s22_s14 = sadd.s32 1, %s6415_s14   ;;  %s8649_s13 = sld [smem:[#allocation18_spill]] }
 0x777   : > { %p19_p1 = scmp.ge.s32.totalorder %s22_s14, 6   ;;  %s8650_s30 = sld [smem:[#allocation12_spill]] }
 0x778   : > { %s8651_s9 = sld [smem:[#allocation19_spill]]  ;;  %s8652_s10 = sld [smem:[#allocation13_spill]] }
 0x779   : > { %s8653_s11 = sld [smem:[#allocation14_spill]]  ;;  %s8654_s12 = sld [smem:[#allocation15_spill]] }
 0x77a   : > { %s8655_s23 = sld [smem:[#allocation16_spill]]  ;;  %s8656_s27 = smov %s6383_s28 }
 0x77b   : > { %s8657_s28 = smov %s6387_s29  ;;  %21 = sbr.rel (!%p19_p1) target bundleno = 8 (0x8), region = 161 }
 0x77c   : > { %s8658_s29 = smov %s8649_s13 }
 0x780   : > { %s8659_s13 = smov %s8655_s23 }
 0x782   :  { %4981 = vsyncpa [#allocation9], 1 }
 0x783   :  { %4983 = vsyncpa [#allocation9 + $0x1], 1 }

</bundles_post_ra>
